<compile_context>
chip_gen: v7x
topology: tpu7x:2x2x1
jax: 0.10.0
libtpu: 0.0.40
codegen_flags: <defaults>
</compile_context>

<pallas_src>
import math

import jax
import jax.numpy as jnp
from jax.experimental import pallas as pl
from jax.experimental.pallas import tpu as pltpu


def _round_up(x, m):
    return (x + m - 1) // m * m


def _full_spec(shape):
    zero = (0,) * len(shape)
    return pl.BlockSpec(shape, lambda *_: zero)


# (row/col shift a, source parity s) pairs covering si = oi + dy - 1 in {-1,0,1,2}
# via 2*a + s == si.  Shared by the kernel tail and the wrapper weight/mask packing.
_TAIL_PAIRS = ((-1, 1), (0, 0), (0, 1), (1, 0))


def _pack_conv_weight(w, cin_pad=None):
    """(Cout, Cin, 3, 3) PyTorch layout -> (Cout, 9*Cin) bf16, taps (dy, dx) major."""
    cout, cin, _, _ = w.shape
    if cin_pad is not None and cin_pad > cin:
        w = jnp.pad(w, ((0, 0), (0, cin_pad - cin), (0, 0), (0, 0)))
    return jnp.transpose(w, (0, 2, 3, 1)).reshape(cout, -1).astype(jnp.bfloat16)


def _make_net_kernel(num_channels, base_channel, num_residuals, N, H, W):
    NHW = N * H * W
    C = base_channel
    Cn = num_channels

    def kernel(*refs):
        *in_refs, out_ref, x9_ref = refs
        it = iter(in_refs)
        x_ref = next(it)
        mask9_ref = next(it)            # (9*C, NHW)  f32 {0,1}, pre-broadcast per tap
        mask16_ref = next(it)           # (16*C, NHW) f32 {0,1}, pre-broadcast per slab
        w_in, b_in = next(it), next(it)
        blocks = [tuple(next(it) for _ in range(4)) for _ in range(num_residuals)]
        w_mid, b_mid = next(it), next(it)
        w_up, b_up = next(it), next(it)
        w_tail, b_tail = next(it), next(it)

        def rolled(x, a, b):
            # x[:, p] -> x[:, p + a*W + b] (cyclic; boundary wraps zeroed by masks).
            off = a * W + b
            if off == 0:
                return x
            return pltpu.roll(x, shift=(-off) % NHW, axis=1)    # XLU lane rotate

        def conv3x3(x, w_ref, bias_ref=None):
            # im2col the 9 taps into the fixed VMEM scratch, mask all at once, then a
            # single weight-stationary bf16 MXU matmul with f32 accumulation.
            t = 0
            for dy in range(3):
                for dx in range(3):
                    x9_ref[t * C:(t + 1) * C, :] = rolled(x, dy - 1, dx - 1)
                    t += 1
            x9 = x9_ref[0:9 * C, :] * mask9_ref[...]
            y = jnp.dot(w_ref[...], x9.astype(jnp.bfloat16),
                        preferred_element_type=jnp.float32)
            return y if bias_ref is None else y + bias_ref[...]

        def batchnorm(x, g_ref, be_ref, relu):
            # training-mode BatchNorm2d; single-pass stats (independent reductions).
            inv_n = 1.0 / NHW
            mean = jnp.sum(x, axis=1, keepdims=True) * inv_n
            ex2 = jnp.sum(x * x, axis=1, keepdims=True) * inv_n
            var = jnp.maximum(ex2 - mean * mean, 0.0)
            scale = jax.lax.rsqrt(var + 1e-5) * g_ref[...]
            y = x * scale + (be_ref[...] - mean * scale)
            return jnp.maximum(y, 0.0) if relu else y

        x = conv3x3(x_ref[...], w_in, b_in)
        skip = x
        for (w1, w2, g, be) in blocks:
            res = x
            h = conv3x3(x, w1)                    # bias dropped: BN cancels it
            h = batchnorm(h, g, be, relu=True)
            h = conv3x3(h, w2)                    # bias dropped: BN cancels it
            h = batchnorm(h, g, be, relu=False)   # same shared BN module as PyTorch
            x = h + res
        x = conv3x3(x, w_mid, b_mid)
        x = x + skip

        # PixelShuffleBlock conv; output channels pre-permuted to parity-major order,
        # so rows [q*C:(q+1)*C] hold the 2x image's parity-(i, j) slab, q = i*2 + j.
        y_up = conv3x3(x, w_up, b_up)             # (4*C, NHW)

        # Sub-pixel output conv (output_conv folded with PixelShuffle): all four
        # output parities in ONE matmul.  The 36 (parity, tap) reads touch only the
        # 16 unique (source slab, shift) combinations assembled below.
        for ai, (a, si) in enumerate(_TAIL_PAIRS):
            for bi, (b, sj) in enumerate(_TAIL_PAIRS):
                t = ai * 4 + bi
                q = si * 2 + sj
                x9_ref[t * C:(t + 1) * C, :] = rolled(y_up[q * C:(q + 1) * C, :], a, b)
        x16 = x9_ref[...] * mask16_ref[...]
        o = jnp.dot(w_tail[...], x16.astype(jnp.bfloat16),
                    preferred_element_type=jnp.float32)
        out_ref[...] = (o + b_tail[...]).astype(out_ref.dtype)

    return kernel


# ---------------------------------------------------------------------------
# Parameter init (deterministic; mimics weight_init(mean=0, std=0.02))
# ---------------------------------------------------------------------------

def init_net_params(key, num_channels, base_channel, upscale_factor, num_residuals):
    n_up = int(math.log2(upscale_factor))
    keys = jax.random.split(key, 1 + 2 * num_residuals + 1 + n_up + 1)
    ki = iter(keys)

    def conv_init(k, cin, cout, std=0.02):
        w = jax.random.normal(k, (cout, cin, 3, 3), jnp.float32) * std
        b = jnp.zeros((cout,), jnp.float32)
        return w, b

    params = {"input_conv": conv_init(next(ki), num_channels, base_channel),
              "resblocks": [], "upscale": []}
    for _ in range(num_residuals):
        w1, b1 = conv_init(next(ki), base_channel, base_channel)
        w2, b2 = conv_init(next(ki), base_channel, base_channel)
        params["resblocks"].append({
            "w1": w1, "b1": b1, "w2": w2, "b2": b2,
            # one shared BatchNorm2d per ResnetBlock (default init gamma=1, beta=0)
            "gamma": jnp.ones((base_channel,), jnp.float32),
            "beta": jnp.zeros((base_channel,), jnp.float32),
        })
    params["mid_conv"] = conv_init(next(ki), base_channel, base_channel)
    for _ in range(n_up):
        params["upscale"].append(conv_init(next(ki), base_channel, 4 * base_channel))
    params["output_conv"] = conv_init(next(ki), base_channel, num_channels)
    return params


# ---------------------------------------------------------------------------
# Forward pass (Net.forward) — one fused pallas_call + tiny layout glue
# ---------------------------------------------------------------------------

def net_forward(params, x_nchw):
    w_in, b_in = params["input_conv"]
    C = int(w_in.shape[0])            # base_channel
    Cn = int(w_in.shape[1])           # num_channels
    N, _, H, W = x_nchw.shape
    NHW = N * H * W

    if len(params["upscale"]) != 1:
        # TODO(synk): the fused kernel only implements upscale_factor == 2
        # (one PixelShuffleBlock); larger factors need an in-kernel interleave stage.
        raise NotImplementedError("fused kernel supports upscale_factor == 2 only")
    if Cn > C:
        # TODO(synk): input channels are padded up to base_channel so one mask /
        # scratch layout serves every conv; Cn > C would need a second layout.
        raise NotImplementedError("fused kernel assumes num_channels <= base_channel")

    cin_pad = C

    # ---- one-off layout glue (outside the kernel, constant-folded under jit) ----
    x2 = jnp.transpose(x_nchw, (1, 0, 2, 3)).reshape(Cn, NHW)     # (C, N*H*W) slab
    x2 = jnp.pad(x2, ((0, cin_pad - Cn), (0, 0)))

    # 0/1 boundary-validity rows per (dy, dx) shift, pre-broadcast to channel blocks.
    p = jnp.arange(NHW, dtype=jnp.int32)
    hh = (p // W) % H
    ww = p % W

    def valid_row(a, b):
        v = (hh + a >= 0) & (hh + a < H) & (ww + b >= 0) & (ww + b < W)
        return v.astype(jnp.float32)

    mask9 = jnp.concatenate(
        [jnp.broadcast_to(valid_row(dy - 1, dx - 1)[None, :], (C, NHW))
         for dy in range(3) for dx in range(3)], axis=0)                  # (9*C, NHW)
    mask16 = jnp.concatenate(
        [jnp.broadcast_to(valid_row(a, b)[None, :], (C, NHW))
         for (a, _si) in _TAIL_PAIRS for (b, _sj) in _TAIL_PAIRS], axis=0)  # (16*C, NHW)

    args = [x2, mask9, mask16,
            _pack_conv_weight(w_in, cin_pad), b_in.reshape(-1, 1)]
    for blk in params["resblocks"]:
        # b1 / b2 intentionally not passed: BN mean subtraction cancels them.
        args += [_pack_conv_weight(blk["w1"]), _pack_conv_weight(blk["w2"]),
                 blk["gamma"].reshape(-1, 1), blk["beta"].reshape(-1, 1)]
    w_mid, b_mid = params["mid_conv"]
    args += [_pack_conv_weight(w_mid), b_mid.reshape(-1, 1)]

    w_up, b_up = params["upscale"][0]
    # permute PixelShuffle channel order (c*4 + i*2 + j) -> parity-major ((i*2+j)*C + c)
    perm = jnp.array([c * 4 + q for q in range(4) for c in range(C)], jnp.int32)
    args += [_pack_conv_weight(w_up)[perm], b_up[perm].reshape(-1, 1)]

    # Merged sub-pixel tail weight: rows = 4 output parities x Cn, cols = 16 slabs x C.
    w_out, b_out = params["output_conv"]
    w_tail = jnp.zeros((4 * Cn, 16 * C), jnp.float32)
    b_tail = jnp.zeros((4 * Cn, 1), jnp.float32)
    for oi in range(2):
        for oj in range(2):
            pidx = oi * 2 + oj
            b_tail = b_tail.at[pidx * Cn:(pidx + 1) * Cn, 0].set(b_out)
            for dy in range(3):
                for dx in range(3):
                    si, sj = oi + dy - 1, oj + dx - 1
                    ai = _TAIL_PAIRS.index((si // 2, si % 2))
                    bi = _TAIL_PAIRS.index((sj // 2, sj % 2))
                    t = ai * 4 + bi
                    w_tail = w_tail.at[pidx * Cn:(pidx + 1) * Cn,
                                       t * C:(t + 1) * C].set(w_out[:, :, dy, dx])
    args += [w_tail.astype(jnp.bfloat16), b_tail]

    kernel = _make_net_kernel(Cn, C, len(params["resblocks"]), N, H, W)

    nres = len(params["resblocks"])
    flops = (2 * C * (9 * C) * NHW                    # input conv
             + nres * 2 * 2 * C * (9 * C) * NHW       # residual convs
             + 2 * C * (9 * C) * NHW                  # mid conv
             + 2 * (4 * C) * (9 * C) * NHW            # upscale conv
             + 2 * (4 * Cn) * (16 * C) * NHW)         # fused sub-pixel output conv
    bytes_accessed = (sum(a.size * a.dtype.itemsize for a in args)
                      + 4 * Cn * NHW * 4)

    out = pl.pallas_call(
        kernel,
        out_shape=jax.ShapeDtypeStruct((4 * Cn, NHW), jnp.float32),
        in_specs=[_full_spec(a.shape) for a in args],
        out_specs=_full_spec((4 * Cn, NHW)),
        scratch_shapes=[pltpu.VMEM((16 * C, NHW), jnp.float32)],   # shared im2col slab
        cost_estimate=pl.CostEstimate(flops=flops, transcendentals=0,
                                      bytes_accessed=bytes_accessed),
    )(*args)

    # interleave the four output-parity row blocks -> NCHW at 2x resolution
    out = out.reshape(2, 2, Cn, N, H, W)
    out = jnp.transpose(out, (3, 2, 4, 0, 5, 1))
    return out.reshape(N, Cn, 2 * H, 2 * W)


# ---------------------------------------------------------------------------
# Main
# ---------------------------------------------------------------------------

if __name__ == "__main__":
    num_channels = 3
    base_channel = 8
    upscale_factor = 2
    num_residuals = 2
    N, H, W = 2, 16, 16

    key = jax.random.PRNGKey(0)
    k_in, k_par = jax.random.split(key)
    x = jax.random.normal(k_in, (N, num_channels, H, W), jnp.float32)  # NCHW like PyTorch
    params = init_net_params(k_par, num_channels, base_channel, upscale_factor,
                             num_residuals)

    fwd = jax.jit(net_forward)
    out = jax.block_until_ready(fwd(params, x))

    expected_shape = (N, num_channels, H * upscale_factor, W * upscale_factor)
    assert out.shape == expected_shape, (out.shape, expected_shape)
    assert bool(jnp.all(jnp.isfinite(out)))
    print("KERNEL_OK")
</pallas_src>

<mosaic_0001>
module attributes {stable_mosaic.version = 11 : i64} {
  func.func @kernel(%arg0: memref<8x512xf32, #tpu.memory_space<vmem>>, %arg1: memref<72x512xf32, #tpu.memory_space<vmem>>, %arg2: memref<128x512xf32, #tpu.memory_space<vmem>>, %arg3: memref<8x72xbf16, #tpu.memory_space<vmem>>, %arg4: memref<8x1xf32, #tpu.memory_space<vmem>>, %arg5: memref<8x72xbf16, #tpu.memory_space<vmem>>, %arg6: memref<8x72xbf16, #tpu.memory_space<vmem>>, %arg7: memref<8x1xf32, #tpu.memory_space<vmem>>, %arg8: memref<8x1xf32, #tpu.memory_space<vmem>>, %arg9: memref<8x72xbf16, #tpu.memory_space<vmem>>, %arg10: memref<8x72xbf16, #tpu.memory_space<vmem>>, %arg11: memref<8x1xf32, #tpu.memory_space<vmem>>, %arg12: memref<8x1xf32, #tpu.memory_space<vmem>>, %arg13: memref<8x72xbf16, #tpu.memory_space<vmem>>, %arg14: memref<8x1xf32, #tpu.memory_space<vmem>>, %arg15: memref<32x72xbf16, #tpu.memory_space<vmem>>, %arg16: memref<32x1xf32, #tpu.memory_space<vmem>>, %arg17: memref<12x128xbf16, #tpu.memory_space<vmem>>, %arg18: memref<12x1xf32, #tpu.memory_space<vmem>>, %arg19: memref<12x512xf32, #tpu.memory_space<vmem>>, %arg20: memref<128x512xf32, #tpu.memory_space<vmem>>) attributes {dimension_semantics = [], scalar_prefetch = 0 : i64, scratch_operands = 1 : i64, tpu.core_type = #tpu.core_type<tc>} {
    %c0 = arith.constant 0 : index
    %c0_0 = arith.constant 0 : index
    %0 = vector.load %arg0[%c0, %c0_0] : memref<8x512xf32, #tpu.memory_space<vmem>>, vector<8x512xf32>
    %c17_i32 = arith.constant 17 : i32
    %1 = tpu.dynamic_rotate %0 by %c17_i32 dim 1 : vector<8x512xf32>, i32 -> vector<8x512xf32>
    %c0_1 = arith.constant 0 : index
    %c0_2 = arith.constant 0 : index
    %2 = vector.load %arg20[%c0_1, %c0_2] : memref<128x512xf32, #tpu.memory_space<vmem>>, vector<8x512xf32>
    tpu.vector_store %arg20[%c0_1, %c0_2], %1 {strides = array<i32>} : memref<128x512xf32, #tpu.memory_space<vmem>>, vector<8x512xf32>,
    %c16_i32 = arith.constant 16 : i32
    %3 = tpu.dynamic_rotate %0 by %c16_i32 dim 1 : vector<8x512xf32>, i32 -> vector<8x512xf32>
    %c8 = arith.constant 8 : index
    %c0_3 = arith.constant 0 : index
    %4 = vector.load %arg20[%c8, %c0_3] : memref<128x512xf32, #tpu.memory_space<vmem>>, vector<8x512xf32>
    tpu.vector_store %arg20[%c8, %c0_3], %3 {strides = array<i32>} : memref<128x512xf32, #tpu.memory_space<vmem>>, vector<8x512xf32>,
    %c15_i32 = arith.constant 15 : i32
    %5 = tpu.dynamic_rotate %0 by %c15_i32 dim 1 : vector<8x512xf32>, i32 -> vector<8x512xf32>
    %c16 = arith.constant 16 : index
    %c0_4 = arith.constant 0 : index
    %6 = vector.load %arg20[%c16, %c0_4] : memref<128x512xf32, #tpu.memory_space<vmem>>, vector<8x512xf32>
    tpu.vector_store %arg20[%c16, %c0_4], %5 {strides = array<i32>} : memref<128x512xf32, #tpu.memory_space<vmem>>, vector<8x512xf32>,
    %c1_i32 = arith.constant 1 : i32
    %7 = tpu.dynamic_rotate %0 by %c1_i32 dim 1 : vector<8x512xf32>, i32 -> vector<8x512xf32>
    %c24 = arith.constant 24 : index
    %c0_5 = arith.constant 0 : index
    %8 = vector.load %arg20[%c24, %c0_5] : memref<128x512xf32, #tpu.memory_space<vmem>>, vector<8x512xf32>
    tpu.vector_store %arg20[%c24, %c0_5], %7 {strides = array<i32>} : memref<128x512xf32, #tpu.memory_space<vmem>>, vector<8x512xf32>,
    %c32 = arith.constant 32 : index
    %c0_6 = arith.constant 0 : index
    %9 = vector.load %arg20[%c32, %c0_6] : memref<128x512xf32, #tpu.memory_space<vmem>>, vector<8x512xf32>
    tpu.vector_store %arg20[%c32, %c0_6], %0 {strides = array<i32>} : memref<128x512xf32, #tpu.memory_space<vmem>>, vector<8x512xf32>,
    %c511_i32 = arith.constant 511 : i32
    %10 = tpu.dynamic_rotate %0 by %c511_i32 dim 1 : vector<8x512xf32>, i32 -> vector<8x512xf32>
    %c40 = arith.constant 40 : index
    %c0_7 = arith.constant 0 : index
    %11 = vector.load %arg20[%c40, %c0_7] : memref<128x512xf32, #tpu.memory_space<vmem>>, vector<8x512xf32>
    tpu.vector_store %arg20[%c40, %c0_7], %10 {strides = array<i32>} : memref<128x512xf32, #tpu.memory_space<vmem>>, vector<8x512xf32>,
    %c497_i32 = arith.constant 497 : i32
    %12 = tpu.dynamic_rotate %0 by %c497_i32 dim 1 : vector<8x512xf32>, i32 -> vector<8x512xf32>
    %c48 = arith.constant 48 : index
    %c0_8 = arith.constant 0 : index
    %13 = vector.load %arg20[%c48, %c0_8] : memref<128x512xf32, #tpu.memory_space<vmem>>, vector<8x512xf32>
    tpu.vector_store %arg20[%c48, %c0_8], %12 {strides = array<i32>} : memref<128x512xf32, #tpu.memory_space<vmem>>, vector<8x512xf32>,
    %c496_i32 = arith.constant 496 : i32
    %14 = tpu.dynamic_rotate %0 by %c496_i32 dim 1 : vector<8x512xf32>, i32 -> vector<8x512xf32>
    %c56 = arith.constant 56 : index
    %c0_9 = arith.constant 0 : index
    %15 = vector.load %arg20[%c56, %c0_9] : memref<128x512xf32, #tpu.memory_space<vmem>>, vector<8x512xf32>
    tpu.vector_store %arg20[%c56, %c0_9], %14 {strides = array<i32>} : memref<128x512xf32, #tpu.memory_space<vmem>>, vector<8x512xf32>,
    %c495_i32 = arith.constant 495 : i32
    %16 = tpu.dynamic_rotate %0 by %c495_i32 dim 1 : vector<8x512xf32>, i32 -> vector<8x512xf32>
    %c64 = arith.constant 64 : index
    %c0_10 = arith.constant 0 : index
    %17 = vector.load %arg20[%c64, %c0_10] : memref<128x512xf32, #tpu.memory_space<vmem>>, vector<8x512xf32>
    tpu.vector_store %arg20[%c64, %c0_10], %16 {strides = array<i32>} : memref<128x512xf32, #tpu.memory_space<vmem>>, vector<8x512xf32>,
    %c0_11 = arith.constant 0 : index
    %c0_12 = arith.constant 0 : index
    %18 = vector.load %arg20[%c0_11, %c0_12] : memref<128x512xf32, #tpu.memory_space<vmem>>, vector<72x512xf32>
    %c0_13 = arith.constant 0 : index
    %c0_14 = arith.constant 0 : index
    %19 = vector.load %arg1[%c0_13, %c0_14] : memref<72x512xf32, #tpu.memory_space<vmem>>, vector<72x512xf32>
    %20 = arith.mulf %18, %19 : vector<72x512xf32>
    %c0_15 = arith.constant 0 : index
    %c0_16 = arith.constant 0 : index
    %21 = vector.load %arg3[%c0_15, %c0_16] : memref<8x72xbf16, #tpu.memory_space<vmem>>, vector<8x72xbf16>
    %22 = arith.truncf %20 : vector<72x512xf32> to vector<72x512xbf16>
    %cst = arith.constant dense<0.000000e+00> : vector<8x512xf32>
    %23 = tpu.matmul %21, %22, %cst {dimension_numbers = #tpu.dot_dimension_numbers<[1], [0], [0], [1], [0, 0, 1, 1], [], []>} : vector<8x72xbf16>, vector<72x512xbf16>, vector<8x512xf32> -> vector<8x512xf32>
    %c0_17 = arith.constant 0 : index
    %c0_18 = arith.constant 0 : index
    %24 = vector.load %arg4[%c0_17, %c0_18] : memref<8x1xf32, #tpu.memory_space<vmem>>, vector<8x1xf32>
    %25 = vector.broadcast %24 : vector<8x1xf32> to vector<8x512xf32>
    %26 = arith.addf %23, %25 : vector<8x512xf32>
    %c17_i32_19 = arith.constant 17 : i32
    %27 = tpu.dynamic_rotate %26 by %c17_i32_19 dim 1 : vector<8x512xf32>, i32 -> vector<8x512xf32>
    %c0_20 = arith.constant 0 : index
    %c0_21 = arith.constant 0 : index
    %28 = vector.load %arg20[%c0_20, %c0_21] : memref<128x512xf32, #tpu.memory_space<vmem>>, vector<8x512xf32>
    tpu.vector_store %arg20[%c0_20, %c0_21], %27 {strides = array<i32>} : memref<128x512xf32, #tpu.memory_space<vmem>>, vector<8x512xf32>,
    %c16_i32_22 = arith.constant 16 : i32
    %29 = tpu.dynamic_rotate %26 by %c16_i32_22 dim 1 : vector<8x512xf32>, i32 -> vector<8x512xf32>
    %c8_23 = arith.constant 8 : index
    %c0_24 = arith.constant 0 : index
    %30 = vector.load %arg20[%c8_23, %c0_24] : memref<128x512xf32, #tpu.memory_space<vmem>>, vector<8x512xf32>
    tpu.vector_store %arg20[%c8_23, %c0_24], %29 {strides = array<i32>} : memref<128x512xf32, #tpu.memory_space<vmem>>, vector<8x512xf32>,
    %c15_i32_25 = arith.constant 15 : i32
    %31 = tpu.dynamic_rotate %26 by %c15_i32_25 dim 1 : vector<8x512xf32>, i32 -> vector<8x512xf32>
    %c16_26 = arith.constant 16 : index
    %c0_27 = arith.constant 0 : index
    %32 = vector.load %arg20[%c16_26, %c0_27] : memref<128x512xf32, #tpu.memory_space<vmem>>, vector<8x512xf32>
    tpu.vector_store %arg20[%c16_26, %c0_27], %31 {strides = array<i32>} : memref<128x512xf32, #tpu.memory_space<vmem>>, vector<8x512xf32>,
    %c1_i32_28 = arith.constant 1 : i32
    %33 = tpu.dynamic_rotate %26 by %c1_i32_28 dim 1 : vector<8x512xf32>, i32 -> vector<8x512xf32>
    %c24_29 = arith.constant 24 : index
    %c0_30 = arith.constant 0 : index
    %34 = vector.load %arg20[%c24_29, %c0_30] : memref<128x512xf32, #tpu.memory_space<vmem>>, vector<8x512xf32>
    tpu.vector_store %arg20[%c24_29, %c0_30], %33 {strides = array<i32>} : memref<128x512xf32, #tpu.memory_space<vmem>>, vector<8x512xf32>,
    %c32_31 = arith.constant 32 : index
    %c0_32 = arith.constant 0 : index
    %35 = vector.load %arg20[%c32_31, %c0_32] : memref<128x512xf32, #tpu.memory_space<vmem>>, vector<8x512xf32>
    tpu.vector_store %arg20[%c32_31, %c0_32], %26 {strides = array<i32>} : memref<128x512xf32, #tpu.memory_space<vmem>>, vector<8x512xf32>,
    %c511_i32_33 = arith.constant 511 : i32
    %36 = tpu.dynamic_rotate %26 by %c511_i32_33 dim 1 : vector<8x512xf32>, i32 -> vector<8x512xf32>
    %c40_34 = arith.constant 40 : index
    %c0_35 = arith.constant 0 : index
    %37 = vector.load %arg20[%c40_34, %c0_35] : memref<128x512xf32, #tpu.memory_space<vmem>>, vector<8x512xf32>
    tpu.vector_store %arg20[%c40_34, %c0_35], %36 {strides = array<i32>} : memref<128x512xf32, #tpu.memory_space<vmem>>, vector<8x512xf32>,
    %c497_i32_36 = arith.constant 497 : i32
    %38 = tpu.dynamic_rotate %26 by %c497_i32_36 dim 1 : vector<8x512xf32>, i32 -> vector<8x512xf32>
    %c48_37 = arith.constant 48 : index
    %c0_38 = arith.constant 0 : index
    %39 = vector.load %arg20[%c48_37, %c0_38] : memref<128x512xf32, #tpu.memory_space<vmem>>, vector<8x512xf32>
    tpu.vector_store %arg20[%c48_37, %c0_38], %38 {strides = array<i32>} : memref<128x512xf32, #tpu.memory_space<vmem>>, vector<8x512xf32>,
    %c496_i32_39 = arith.constant 496 : i32
    %40 = tpu.dynamic_rotate %26 by %c496_i32_39 dim 1 : vector<8x512xf32>, i32 -> vector<8x512xf32>
    %c56_40 = arith.constant 56 : index
    %c0_41 = arith.constant 0 : index
    %41 = vector.load %arg20[%c56_40, %c0_41] : memref<128x512xf32, #tpu.memory_space<vmem>>, vector<8x512xf32>
    tpu.vector_store %arg20[%c56_40, %c0_41], %40 {strides = array<i32>} : memref<128x512xf32, #tpu.memory_space<vmem>>, vector<8x512xf32>,
    %c495_i32_42 = arith.constant 495 : i32
    %42 = tpu.dynamic_rotate %26 by %c495_i32_42 dim 1 : vector<8x512xf32>, i32 -> vector<8x512xf32>
    %c64_43 = arith.constant 64 : index
    %c0_44 = arith.constant 0 : index
    %43 = vector.load %arg20[%c64_43, %c0_44] : memref<128x512xf32, #tpu.memory_space<vmem>>, vector<8x512xf32>
    tpu.vector_store %arg20[%c64_43, %c0_44], %42 {strides = array<i32>} : memref<128x512xf32, #tpu.memory_space<vmem>>, vector<8x512xf32>,
    %c0_45 = arith.constant 0 : index
    %c0_46 = arith.constant 0 : index
    %44 = vector.load %arg20[%c0_45, %c0_46] : memref<128x512xf32, #tpu.memory_space<vmem>>, vector<72x512xf32>
    %c0_47 = arith.constant 0 : index
    %c0_48 = arith.constant 0 : index
    %45 = vector.load %arg1[%c0_47, %c0_48] : memref<72x512xf32, #tpu.memory_space<vmem>>, vector<72x512xf32>
    %46 = arith.mulf %44, %45 : vector<72x512xf32>
    %c0_49 = arith.constant 0 : index
    %c0_50 = arith.constant 0 : index
    %47 = vector.load %arg5[%c0_49, %c0_50] : memref<8x72xbf16, #tpu.memory_space<vmem>>, vector<8x72xbf16>
    %48 = arith.truncf %46 : vector<72x512xf32> to vector<72x512xbf16>
    %cst_51 = arith.constant dense<0.000000e+00> : vector<8x512xf32>
    %49 = tpu.matmul %47, %48, %cst_51 {dimension_numbers = #tpu.dot_dimension_numbers<[1], [0], [0], [1], [0, 0, 1, 1], [], []>} : vector<8x72xbf16>, vector<72x512xbf16>, vector<8x512xf32> -> vector<8x512xf32>
    %cst_52 = arith.constant dense<0.000000e+00> : vector<8xf32>
    %50 = vector.multi_reduction <add>, %49, %cst_52 [1] : vector<8x512xf32> to vector<8xf32>
    %51 = vector.shape_cast %50 : vector<8xf32> to vector<8x1xf32>
    %cst_53 = arith.constant 0.001953125 : f32
    %52 = vector.broadcast %cst_53 : f32 to vector<8x1xf32>
    %53 = arith.mulf %51, %52 : vector<8x1xf32>
    %54 = arith.mulf %49, %49 : vector<8x512xf32>
    %cst_54 = arith.constant dense<0.000000e+00> : vector<8xf32>
    %55 = vector.multi_reduction <add>, %54, %cst_54 [1] : vector<8x512xf32> to vector<8xf32>
    %56 = vector.shape_cast %55 : vector<8xf32> to vector<8x1xf32>
    %cst_55 = arith.constant 0.001953125 : f32
    %57 = vector.broadcast %cst_55 : f32 to vector<8x1xf32>
    %58 = arith.mulf %56, %57 : vector<8x1xf32>
    %59 = arith.mulf %53, %53 : vector<8x1xf32>
    %60 = arith.subf %58, %59 : vector<8x1xf32>
    %cst_56 = arith.constant 0.000000e+00 : f32
    %61 = vector.broadcast %cst_56 : f32 to vector<8x1xf32>
    %62 = arith.maximumf %60, %61 : vector<8x1xf32>
    %cst_57 = arith.constant 9.99999974E-6 : f32
    %63 = vector.broadcast %cst_57 : f32 to vector<8x1xf32>
    %64 = arith.addf %62, %63 : vector<8x1xf32>
    %65 = math.rsqrt %64 : vector<8x1xf32>
    %c0_58 = arith.constant 0 : index
    %c0_59 = arith.constant 0 : index
    %66 = vector.load %arg7[%c0_58, %c0_59] : memref<8x1xf32, #tpu.memory_space<vmem>>, vector<8x1xf32>
    %67 = arith.mulf %65, %66 : vector<8x1xf32>
    %68 = vector.broadcast %67 : vector<8x1xf32> to vector<8x512xf32>
    %69 = arith.mulf %49, %68 : vector<8x512xf32>
    %c0_60 = arith.constant 0 : index
    %c0_61 = arith.constant 0 : index
    %70 = vector.load %arg8[%c0_60, %c0_61] : memref<8x1xf32, #tpu.memory_space<vmem>>, vector<8x1xf32>
    %71 = arith.mulf %53, %67 : vector<8x1xf32>
    %72 = arith.subf %70, %71 : vector<8x1xf32>
    %73 = vector.broadcast %72 : vector<8x1xf32> to vector<8x512xf32>
    %74 = arith.addf %69, %73 : vector<8x512xf32>
    %cst_62 = arith.constant 0.000000e+00 : f32
    %75 = vector.broadcast %cst_62 : f32 to vector<8x512xf32>
    %76 = arith.maximumf %74, %75 : vector<8x512xf32>
    %c17_i32_63 = arith.constant 17 : i32
    %77 = tpu.dynamic_rotate %76 by %c17_i32_63 dim 1 : vector<8x512xf32>, i32 -> vector<8x512xf32>
    %c0_64 = arith.constant 0 : index
    %c0_65 = arith.constant 0 : index
    %78 = vector.load %arg20[%c0_64, %c0_65] : memref<128x512xf32, #tpu.memory_space<vmem>>, vector<8x512xf32>
    tpu.vector_store %arg20[%c0_64, %c0_65], %77 {strides = array<i32>} : memref<128x512xf32, #tpu.memory_space<vmem>>, vector<8x512xf32>,
    %c16_i32_66 = arith.constant 16 : i32
    %79 = tpu.dynamic_rotate %76 by %c16_i32_66 dim 1 : vector<8x512xf32>, i32 -> vector<8x512xf32>
    %c8_67 = arith.constant 8 : index
    %c0_68 = arith.constant 0 : index
    %80 = vector.load %arg20[%c8_67, %c0_68] : memref<128x512xf32, #tpu.memory_space<vmem>>, vector<8x512xf32>
    tpu.vector_store %arg20[%c8_67, %c0_68], %79 {strides = array<i32>} : memref<128x512xf32, #tpu.memory_space<vmem>>, vector<8x512xf32>,
    %c15_i32_69 = arith.constant 15 : i32
    %81 = tpu.dynamic_rotate %76 by %c15_i32_69 dim 1 : vector<8x512xf32>, i32 -> vector<8x512xf32>
    %c16_70 = arith.constant 16 : index
    %c0_71 = arith.constant 0 : index
    %82 = vector.load %arg20[%c16_70, %c0_71] : memref<128x512xf32, #tpu.memory_space<vmem>>, vector<8x512xf32>
    tpu.vector_store %arg20[%c16_70, %c0_71], %81 {strides = array<i32>} : memref<128x512xf32, #tpu.memory_space<vmem>>, vector<8x512xf32>,
    %c1_i32_72 = arith.constant 1 : i32
    %83 = tpu.dynamic_rotate %76 by %c1_i32_72 dim 1 : vector<8x512xf32>, i32 -> vector<8x512xf32>
    %c24_73 = arith.constant 24 : index
    %c0_74 = arith.constant 0 : index
    %84 = vector.load %arg20[%c24_73, %c0_74] : memref<128x512xf32, #tpu.memory_space<vmem>>, vector<8x512xf32>
    tpu.vector_store %arg20[%c24_73, %c0_74], %83 {strides = array<i32>} : memref<128x512xf32, #tpu.memory_space<vmem>>, vector<8x512xf32>,
    %c32_75 = arith.constant 32 : index
    %c0_76 = arith.constant 0 : index
    %85 = vector.load %arg20[%c32_75, %c0_76] : memref<128x512xf32, #tpu.memory_space<vmem>>, vector<8x512xf32>
    tpu.vector_store %arg20[%c32_75, %c0_76], %76 {strides = array<i32>} : memref<128x512xf32, #tpu.memory_space<vmem>>, vector<8x512xf32>,
    %c511_i32_77 = arith.constant 511 : i32
    %86 = tpu.dynamic_rotate %76 by %c511_i32_77 dim 1 : vector<8x512xf32>, i32 -> vector<8x512xf32>
    %c40_78 = arith.constant 40 : index
    %c0_79 = arith.constant 0 : index
    %87 = vector.load %arg20[%c40_78, %c0_79] : memref<128x512xf32, #tpu.memory_space<vmem>>, vector<8x512xf32>
    tpu.vector_store %arg20[%c40_78, %c0_79], %86 {strides = array<i32>} : memref<128x512xf32, #tpu.memory_space<vmem>>, vector<8x512xf32>,
    %c497_i32_80 = arith.constant 497 : i32
    %88 = tpu.dynamic_rotate %76 by %c497_i32_80 dim 1 : vector<8x512xf32>, i32 -> vector<8x512xf32>
    %c48_81 = arith.constant 48 : index
    %c0_82 = arith.constant 0 : index
    %89 = vector.load %arg20[%c48_81, %c0_82] : memref<128x512xf32, #tpu.memory_space<vmem>>, vector<8x512xf32>
    tpu.vector_store %arg20[%c48_81, %c0_82], %88 {strides = array<i32>} : memref<128x512xf32, #tpu.memory_space<vmem>>, vector<8x512xf32>,
    %c496_i32_83 = arith.constant 496 : i32
    %90 = tpu.dynamic_rotate %76 by %c496_i32_83 dim 1 : vector<8x512xf32>, i32 -> vector<8x512xf32>
    %c56_84 = arith.constant 56 : index
    %c0_85 = arith.constant 0 : index
    %91 = vector.load %arg20[%c56_84, %c0_85] : memref<128x512xf32, #tpu.memory_space<vmem>>, vector<8x512xf32>
    tpu.vector_store %arg20[%c56_84, %c0_85], %90 {strides = array<i32>} : memref<128x512xf32, #tpu.memory_space<vmem>>, vector<8x512xf32>,
    %c495_i32_86 = arith.constant 495 : i32
    %92 = tpu.dynamic_rotate %76 by %c495_i32_86 dim 1 : vector<8x512xf32>, i32 -> vector<8x512xf32>
    %c64_87 = arith.constant 64 : index
    %c0_88 = arith.constant 0 : index
    %93 = vector.load %arg20[%c64_87, %c0_88] : memref<128x512xf32, #tpu.memory_space<vmem>>, vector<8x512xf32>
    tpu.vector_store %arg20[%c64_87, %c0_88], %92 {strides = array<i32>} : memref<128x512xf32, #tpu.memory_space<vmem>>, vector<8x512xf32>,
    %c0_89 = arith.constant 0 : index
    %c0_90 = arith.constant 0 : index
    %94 = vector.load %arg20[%c0_89, %c0_90] : memref<128x512xf32, #tpu.memory_space<vmem>>, vector<72x512xf32>
    %c0_91 = arith.constant 0 : index
    %c0_92 = arith.constant 0 : index
    %95 = vector.load %arg1[%c0_91, %c0_92] : memref<72x512xf32, #tpu.memory_space<vmem>>, vector<72x512xf32>
    %96 = arith.mulf %94, %95 : vector<72x512xf32>
    %c0_93 = arith.constant 0 : index
    %c0_94 = arith.constant 0 : index
    %97 = vector.load %arg6[%c0_93, %c0_94] : memref<8x72xbf16, #tpu.memory_space<vmem>>, vector<8x72xbf16>
    %98 = arith.truncf %96 : vector<72x512xf32> to vector<72x512xbf16>
    %cst_95 = arith.constant dense<0.000000e+00> : vector<8x512xf32>
    %99 = tpu.matmul %97, %98, %cst_95 {dimension_numbers = #tpu.dot_dimension_numbers<[1], [0], [0], [1], [0, 0, 1, 1], [], []>} : vector<8x72xbf16>, vector<72x512xbf16>, vector<8x512xf32> -> vector<8x512xf32>
    %cst_96 = arith.constant dense<0.000000e+00> : vector<8xf32>
    %100 = vector.multi_reduction <add>, %99, %cst_96 [1] : vector<8x512xf32> to vector<8xf32>
    %101 = vector.shape_cast %100 : vector<8xf32> to vector<8x1xf32>
    %cst_97 = arith.constant 0.001953125 : f32
    %102 = vector.broadcast %cst_97 : f32 to vector<8x1xf32>
    %103 = arith.mulf %101, %102 : vector<8x1xf32>
    %104 = arith.mulf %99, %99 : vector<8x512xf32>
    %cst_98 = arith.constant dense<0.000000e+00> : vector<8xf32>
    %105 = vector.multi_reduction <add>, %104, %cst_98 [1] : vector<8x512xf32> to vector<8xf32>
    %106 = vector.shape_cast %105 : vector<8xf32> to vector<8x1xf32>
    %cst_99 = arith.constant 0.001953125 : f32
    %107 = vector.broadcast %cst_99 : f32 to vector<8x1xf32>
    %108 = arith.mulf %106, %107 : vector<8x1xf32>
    %109 = arith.mulf %103, %103 : vector<8x1xf32>
    %110 = arith.subf %108, %109 : vector<8x1xf32>
    %cst_100 = arith.constant 0.000000e+00 : f32
    %111 = vector.broadcast %cst_100 : f32 to vector<8x1xf32>
    %112 = arith.maximumf %110, %111 : vector<8x1xf32>
    %cst_101 = arith.constant 9.99999974E-6 : f32
    %113 = vector.broadcast %cst_101 : f32 to vector<8x1xf32>
    %114 = arith.addf %112, %113 : vector<8x1xf32>
    %115 = math.rsqrt %114 : vector<8x1xf32>
    %c0_102 = arith.constant 0 : index
    %c0_103 = arith.constant 0 : index
    %116 = vector.load %arg7[%c0_102, %c0_103] : memref<8x1xf32, #tpu.memory_space<vmem>>, vector<8x1xf32>
    %117 = arith.mulf %115, %116 : vector<8x1xf32>
    %118 = vector.broadcast %117 : vector<8x1xf32> to vector<8x512xf32>
    %119 = arith.mulf %99, %118 : vector<8x512xf32>
    %c0_104 = arith.constant 0 : index
    %c0_105 = arith.constant 0 : index
    %120 = vector.load %arg8[%c0_104, %c0_105] : memref<8x1xf32, #tpu.memory_space<vmem>>, vector<8x1xf32>
    %121 = arith.mulf %103, %117 : vector<8x1xf32>
    %122 = arith.subf %120, %121 : vector<8x1xf32>
    %123 = vector.broadcast %122 : vector<8x1xf32> to vector<8x512xf32>
    %124 = arith.addf %119, %123 : vector<8x512xf32>
    %125 = arith.addf %124, %26 : vector<8x512xf32>
    %c17_i32_106 = arith.constant 17 : i32
    %126 = tpu.dynamic_rotate %125 by %c17_i32_106 dim 1 : vector<8x512xf32>, i32 -> vector<8x512xf32>
    %c0_107 = arith.constant 0 : index
    %c0_108 = arith.constant 0 : index
    %127 = vector.load %arg20[%c0_107, %c0_108] : memref<128x512xf32, #tpu.memory_space<vmem>>, vector<8x512xf32>
    tpu.vector_store %arg20[%c0_107, %c0_108], %126 {strides = array<i32>} : memref<128x512xf32, #tpu.memory_space<vmem>>, vector<8x512xf32>,
    %c16_i32_109 = arith.constant 16 : i32
    %128 = tpu.dynamic_rotate %125 by %c16_i32_109 dim 1 : vector<8x512xf32>, i32 -> vector<8x512xf32>
    %c8_110 = arith.constant 8 : index
    %c0_111 = arith.constant 0 : index
    %129 = vector.load %arg20[%c8_110, %c0_111] : memref<128x512xf32, #tpu.memory_space<vmem>>, vector<8x512xf32>
    tpu.vector_store %arg20[%c8_110, %c0_111], %128 {strides = array<i32>} : memref<128x512xf32, #tpu.memory_space<vmem>>, vector<8x512xf32>,
    %c15_i32_112 = arith.constant 15 : i32
    %130 = tpu.dynamic_rotate %125 by %c15_i32_112 dim 1 : vector<8x512xf32>, i32 -> vector<8x512xf32>
    %c16_113 = arith.constant 16 : index
    %c0_114 = arith.constant 0 : index
    %131 = vector.load %arg20[%c16_113, %c0_114] : memref<128x512xf32, #tpu.memory_space<vmem>>, vector<8x512xf32>
    tpu.vector_store %arg20[%c16_113, %c0_114], %130 {strides = array<i32>} : memref<128x512xf32, #tpu.memory_space<vmem>>, vector<8x512xf32>,
    %c1_i32_115 = arith.constant 1 : i32
    %132 = tpu.dynamic_rotate %125 by %c1_i32_115 dim 1 : vector<8x512xf32>, i32 -> vector<8x512xf32>
    %c24_116 = arith.constant 24 : index
    %c0_117 = arith.constant 0 : index
    %133 = vector.load %arg20[%c24_116, %c0_117] : memref<128x512xf32, #tpu.memory_space<vmem>>, vector<8x512xf32>
    tpu.vector_store %arg20[%c24_116, %c0_117], %132 {strides = array<i32>} : memref<128x512xf32, #tpu.memory_space<vmem>>, vector<8x512xf32>,
    %c32_118 = arith.constant 32 : index
    %c0_119 = arith.constant 0 : index
    %134 = vector.load %arg20[%c32_118, %c0_119] : memref<128x512xf32, #tpu.memory_space<vmem>>, vector<8x512xf32>
    tpu.vector_store %arg20[%c32_118, %c0_119], %125 {strides = array<i32>} : memref<128x512xf32, #tpu.memory_space<vmem>>, vector<8x512xf32>,
    %c511_i32_120 = arith.constant 511 : i32
    %135 = tpu.dynamic_rotate %125 by %c511_i32_120 dim 1 : vector<8x512xf32>, i32 -> vector<8x512xf32>
    %c40_121 = arith.constant 40 : index
    %c0_122 = arith.constant 0 : index
    %136 = vector.load %arg20[%c40_121, %c0_122] : memref<128x512xf32, #tpu.memory_space<vmem>>, vector<8x512xf32>
    tpu.vector_store %arg20[%c40_121, %c0_122], %135 {strides = array<i32>} : memref<128x512xf32, #tpu.memory_space<vmem>>, vector<8x512xf32>,
    %c497_i32_123 = arith.constant 497 : i32
    %137 = tpu.dynamic_rotate %125 by %c497_i32_123 dim 1 : vector<8x512xf32>, i32 -> vector<8x512xf32>
    %c48_124 = arith.constant 48 : index
    %c0_125 = arith.constant 0 : index
    %138 = vector.load %arg20[%c48_124, %c0_125] : memref<128x512xf32, #tpu.memory_space<vmem>>, vector<8x512xf32>
    tpu.vector_store %arg20[%c48_124, %c0_125], %137 {strides = array<i32>} : memref<128x512xf32, #tpu.memory_space<vmem>>, vector<8x512xf32>,
    %c496_i32_126 = arith.constant 496 : i32
    %139 = tpu.dynamic_rotate %125 by %c496_i32_126 dim 1 : vector<8x512xf32>, i32 -> vector<8x512xf32>
    %c56_127 = arith.constant 56 : index
    %c0_128 = arith.constant 0 : index
    %140 = vector.load %arg20[%c56_127, %c0_128] : memref<128x512xf32, #tpu.memory_space<vmem>>, vector<8x512xf32>
    tpu.vector_store %arg20[%c56_127, %c0_128], %139 {strides = array<i32>} : memref<128x512xf32, #tpu.memory_space<vmem>>, vector<8x512xf32>,
    %c495_i32_129 = arith.constant 495 : i32
    %141 = tpu.dynamic_rotate %125 by %c495_i32_129 dim 1 : vector<8x512xf32>, i32 -> vector<8x512xf32>
    %c64_130 = arith.constant 64 : index
    %c0_131 = arith.constant 0 : index
    %142 = vector.load %arg20[%c64_130, %c0_131] : memref<128x512xf32, #tpu.memory_space<vmem>>, vector<8x512xf32>
    tpu.vector_store %arg20[%c64_130, %c0_131], %141 {strides = array<i32>} : memref<128x512xf32, #tpu.memory_space<vmem>>, vector<8x512xf32>,
    %c0_132 = arith.constant 0 : index
    %c0_133 = arith.constant 0 : index
    %143 = vector.load %arg20[%c0_132, %c0_133] : memref<128x512xf32, #tpu.memory_space<vmem>>, vector<72x512xf32>
    %c0_134 = arith.constant 0 : index
    %c0_135 = arith.constant 0 : index
    %144 = vector.load %arg1[%c0_134, %c0_135] : memref<72x512xf32, #tpu.memory_space<vmem>>, vector<72x512xf32>
    %145 = arith.mulf %143, %144 : vector<72x512xf32>
    %c0_136 = arith.constant 0 : index
    %c0_137 = arith.constant 0 : index
    %146 = vector.load %arg9[%c0_136, %c0_137] : memref<8x72xbf16, #tpu.memory_space<vmem>>, vector<8x72xbf16>
    %147 = arith.truncf %145 : vector<72x512xf32> to vector<72x512xbf16>
    %cst_138 = arith.constant dense<0.000000e+00> : vector<8x512xf32>
    %148 = tpu.matmul %146, %147, %cst_138 {dimension_numbers = #tpu.dot_dimension_numbers<[1], [0], [0], [1], [0, 0, 1, 1], [], []>} : vector<8x72xbf16>, vector<72x512xbf16>, vector<8x512xf32> -> vector<8x512xf32>
    %cst_139 = arith.constant dense<0.000000e+00> : vector<8xf32>
    %149 = vector.multi_reduction <add>, %148, %cst_139 [1] : vector<8x512xf32> to vector<8xf32>
    %150 = vector.shape_cast %149 : vector<8xf32> to vector<8x1xf32>
    %cst_140 = arith.constant 0.001953125 : f32
    %151 = vector.broadcast %cst_140 : f32 to vector<8x1xf32>
    %152 = arith.mulf %150, %151 : vector<8x1xf32>
    %153 = arith.mulf %148, %148 : vector<8x512xf32>
    %cst_141 = arith.constant dense<0.000000e+00> : vector<8xf32>
    %154 = vector.multi_reduction <add>, %153, %cst_141 [1] : vector<8x512xf32> to vector<8xf32>
    %155 = vector.shape_cast %154 : vector<8xf32> to vector<8x1xf32>
    %cst_142 = arith.constant 0.001953125 : f32
    %156 = vector.broadcast %cst_142 : f32 to vector<8x1xf32>
    %157 = arith.mulf %155, %156 : vector<8x1xf32>
    %158 = arith.mulf %152, %152 : vector<8x1xf32>
    %159 = arith.subf %157, %158 : vector<8x1xf32>
    %cst_143 = arith.constant 0.000000e+00 : f32
    %160 = vector.broadcast %cst_143 : f32 to vector<8x1xf32>
    %161 = arith.maximumf %159, %160 : vector<8x1xf32>
    %cst_144 = arith.constant 9.99999974E-6 : f32
    %162 = vector.broadcast %cst_144 : f32 to vector<8x1xf32>
    %163 = arith.addf %161, %162 : vector<8x1xf32>
    %164 = math.rsqrt %163 : vector<8x1xf32>
    %c0_145 = arith.constant 0 : index
    %c0_146 = arith.constant 0 : index
    %165 = vector.load %arg11[%c0_145, %c0_146] : memref<8x1xf32, #tpu.memory_space<vmem>>, vector<8x1xf32>
    %166 = arith.mulf %164, %165 : vector<8x1xf32>
    %167 = vector.broadcast %166 : vector<8x1xf32> to vector<8x512xf32>
    %168 = arith.mulf %148, %167 : vector<8x512xf32>
    %c0_147 = arith.constant 0 : index
    %c0_148 = arith.constant 0 : index
    %169 = vector.load %arg12[%c0_147, %c0_148] : memref<8x1xf32, #tpu.memory_space<vmem>>, vector<8x1xf32>
    %170 = arith.mulf %152, %166 : vector<8x1xf32>
    %171 = arith.subf %169, %170 : vector<8x1xf32>
    %172 = vector.broadcast %171 : vector<8x1xf32> to vector<8x512xf32>
    %173 = arith.addf %168, %172 : vector<8x512xf32>
    %cst_149 = arith.constant 0.000000e+00 : f32
    %174 = vector.broadcast %cst_149 : f32 to vector<8x512xf32>
    %175 = arith.maximumf %173, %174 : vector<8x512xf32>
    %c17_i32_150 = arith.constant 17 : i32
    %176 = tpu.dynamic_rotate %175 by %c17_i32_150 dim 1 : vector<8x512xf32>, i32 -> vector<8x512xf32>
    %c0_151 = arith.constant 0 : index
    %c0_152 = arith.constant 0 : index
    %177 = vector.load %arg20[%c0_151, %c0_152] : memref<128x512xf32, #tpu.memory_space<vmem>>, vector<8x512xf32>
    tpu.vector_store %arg20[%c0_151, %c0_152], %176 {strides = array<i32>} : memref<128x512xf32, #tpu.memory_space<vmem>>, vector<8x512xf32>,
    %c16_i32_153 = arith.constant 16 : i32
    %178 = tpu.dynamic_rotate %175 by %c16_i32_153 dim 1 : vector<8x512xf32>, i32 -> vector<8x512xf32>
    %c8_154 = arith.constant 8 : index
    %c0_155 = arith.constant 0 : index
    %179 = vector.load %arg20[%c8_154, %c0_155] : memref<128x512xf32, #tpu.memory_space<vmem>>, vector<8x512xf32>
    tpu.vector_store %arg20[%c8_154, %c0_155], %178 {strides = array<i32>} : memref<128x512xf32, #tpu.memory_space<vmem>>, vector<8x512xf32>,
    %c15_i32_156 = arith.constant 15 : i32
    %180 = tpu.dynamic_rotate %175 by %c15_i32_156 dim 1 : vector<8x512xf32>, i32 -> vector<8x512xf32>
    %c16_157 = arith.constant 16 : index
    %c0_158 = arith.constant 0 : index
    %181 = vector.load %arg20[%c16_157, %c0_158] : memref<128x512xf32, #tpu.memory_space<vmem>>, vector<8x512xf32>
    tpu.vector_store %arg20[%c16_157, %c0_158], %180 {strides = array<i32>} : memref<128x512xf32, #tpu.memory_space<vmem>>, vector<8x512xf32>,
    %c1_i32_159 = arith.constant 1 : i32
    %182 = tpu.dynamic_rotate %175 by %c1_i32_159 dim 1 : vector<8x512xf32>, i32 -> vector<8x512xf32>
    %c24_160 = arith.constant 24 : index
    %c0_161 = arith.constant 0 : index
    %183 = vector.load %arg20[%c24_160, %c0_161] : memref<128x512xf32, #tpu.memory_space<vmem>>, vector<8x512xf32>
    tpu.vector_store %arg20[%c24_160, %c0_161], %182 {strides = array<i32>} : memref<128x512xf32, #tpu.memory_space<vmem>>, vector<8x512xf32>,
    %c32_162 = arith.constant 32 : index
    %c0_163 = arith.constant 0 : index
    %184 = vector.load %arg20[%c32_162, %c0_163] : memref<128x512xf32, #tpu.memory_space<vmem>>, vector<8x512xf32>
    tpu.vector_store %arg20[%c32_162, %c0_163], %175 {strides = array<i32>} : memref<128x512xf32, #tpu.memory_space<vmem>>, vector<8x512xf32>,
    %c511_i32_164 = arith.constant 511 : i32
    %185 = tpu.dynamic_rotate %175 by %c511_i32_164 dim 1 : vector<8x512xf32>, i32 -> vector<8x512xf32>
    %c40_165 = arith.constant 40 : index
    %c0_166 = arith.constant 0 : index
    %186 = vector.load %arg20[%c40_165, %c0_166] : memref<128x512xf32, #tpu.memory_space<vmem>>, vector<8x512xf32>
    tpu.vector_store %arg20[%c40_165, %c0_166], %185 {strides = array<i32>} : memref<128x512xf32, #tpu.memory_space<vmem>>, vector<8x512xf32>,
    %c497_i32_167 = arith.constant 497 : i32
    %187 = tpu.dynamic_rotate %175 by %c497_i32_167 dim 1 : vector<8x512xf32>, i32 -> vector<8x512xf32>
    %c48_168 = arith.constant 48 : index
    %c0_169 = arith.constant 0 : index
    %188 = vector.load %arg20[%c48_168, %c0_169] : memref<128x512xf32, #tpu.memory_space<vmem>>, vector<8x512xf32>
    tpu.vector_store %arg20[%c48_168, %c0_169], %187 {strides = array<i32>} : memref<128x512xf32, #tpu.memory_space<vmem>>, vector<8x512xf32>,
    %c496_i32_170 = arith.constant 496 : i32
    %189 = tpu.dynamic_rotate %175 by %c496_i32_170 dim 1 : vector<8x512xf32>, i32 -> vector<8x512xf32>
    %c56_171 = arith.constant 56 : index
    %c0_172 = arith.constant 0 : index
    %190 = vector.load %arg20[%c56_171, %c0_172] : memref<128x512xf32, #tpu.memory_space<vmem>>, vector<8x512xf32>
    tpu.vector_store %arg20[%c56_171, %c0_172], %189 {strides = array<i32>} : memref<128x512xf32, #tpu.memory_space<vmem>>, vector<8x512xf32>,
    %c495_i32_173 = arith.constant 495 : i32
    %191 = tpu.dynamic_rotate %175 by %c495_i32_173 dim 1 : vector<8x512xf32>, i32 -> vector<8x512xf32>
    %c64_174 = arith.constant 64 : index
    %c0_175 = arith.constant 0 : index
    %192 = vector.load %arg20[%c64_174, %c0_175] : memref<128x512xf32, #tpu.memory_space<vmem>>, vector<8x512xf32>
    tpu.vector_store %arg20[%c64_174, %c0_175], %191 {strides = array<i32>} : memref<128x512xf32, #tpu.memory_space<vmem>>, vector<8x512xf32>,
    %c0_176 = arith.constant 0 : index
    %c0_177 = arith.constant 0 : index
    %193 = vector.load %arg20[%c0_176, %c0_177] : memref<128x512xf32, #tpu.memory_space<vmem>>, vector<72x512xf32>
    %c0_178 = arith.constant 0 : index
    %c0_179 = arith.constant 0 : index
    %194 = vector.load %arg1[%c0_178, %c0_179] : memref<72x512xf32, #tpu.memory_space<vmem>>, vector<72x512xf32>
    %195 = arith.mulf %193, %194 : vector<72x512xf32>
    %c0_180 = arith.constant 0 : index
    %c0_181 = arith.constant 0 : index
    %196 = vector.load %arg10[%c0_180, %c0_181] : memref<8x72xbf16, #tpu.memory_space<vmem>>, vector<8x72xbf16>
    %197 = arith.truncf %195 : vector<72x512xf32> to vector<72x512xbf16>
    %cst_182 = arith.constant dense<0.000000e+00> : vector<8x512xf32>
    %198 = tpu.matmul %196, %197, %cst_182 {dimension_numbers = #tpu.dot_dimension_numbers<[1], [0], [0], [1], [0, 0, 1, 1], [], []>} : vector<8x72xbf16>, vector<72x512xbf16>, vector<8x512xf32> -> vector<8x512xf32>
    %cst_183 = arith.constant dense<0.000000e+00> : vector<8xf32>
    %199 = vector.multi_reduction <add>, %198, %cst_183 [1] : vector<8x512xf32> to vector<8xf32>
    %200 = vector.shape_cast %199 : vector<8xf32> to vector<8x1xf32>
    %cst_184 = arith.constant 0.001953125 : f32
    %201 = vector.broadcast %cst_184 : f32 to vector<8x1xf32>
    %202 = arith.mulf %200, %201 : vector<8x1xf32>
    %203 = arith.mulf %198, %198 : vector<8x512xf32>
    %cst_185 = arith.constant dense<0.000000e+00> : vector<8xf32>
    %204 = vector.multi_reduction <add>, %203, %cst_185 [1] : vector<8x512xf32> to vector<8xf32>
    %205 = vector.shape_cast %204 : vector<8xf32> to vector<8x1xf32>
    %cst_186 = arith.constant 0.001953125 : f32
    %206 = vector.broadcast %cst_186 : f32 to vector<8x1xf32>
    %207 = arith.mulf %205, %206 : vector<8x1xf32>
    %208 = arith.mulf %202, %202 : vector<8x1xf32>
    %209 = arith.subf %207, %208 : vector<8x1xf32>
    %cst_187 = arith.constant 0.000000e+00 : f32
    %210 = vector.broadcast %cst_187 : f32 to vector<8x1xf32>
    %211 = arith.maximumf %209, %210 : vector<8x1xf32>
    %cst_188 = arith.constant 9.99999974E-6 : f32
    %212 = vector.broadcast %cst_188 : f32 to vector<8x1xf32>
    %213 = arith.addf %211, %212 : vector<8x1xf32>
    %214 = math.rsqrt %213 : vector<8x1xf32>
    %c0_189 = arith.constant 0 : index
    %c0_190 = arith.constant 0 : index
    %215 = vector.load %arg11[%c0_189, %c0_190] : memref<8x1xf32, #tpu.memory_space<vmem>>, vector<8x1xf32>
    %216 = arith.mulf %214, %215 : vector<8x1xf32>
    %217 = vector.broadcast %216 : vector<8x1xf32> to vector<8x512xf32>
    %218 = arith.mulf %198, %217 : vector<8x512xf32>
    %c0_191 = arith.constant 0 : index
    %c0_192 = arith.constant 0 : index
    %219 = vector.load %arg12[%c0_191, %c0_192] : memref<8x1xf32, #tpu.memory_space<vmem>>, vector<8x1xf32>
    %220 = arith.mulf %202, %216 : vector<8x1xf32>
    %221 = arith.subf %219, %220 : vector<8x1xf32>
    %222 = vector.broadcast %221 : vector<8x1xf32> to vector<8x512xf32>
    %223 = arith.addf %218, %222 : vector<8x512xf32>
    %224 = arith.addf %223, %125 : vector<8x512xf32>
    %c17_i32_193 = arith.constant 17 : i32
    %225 = tpu.dynamic_rotate %224 by %c17_i32_193 dim 1 : vector<8x512xf32>, i32 -> vector<8x512xf32>
    %c0_194 = arith.constant 0 : index
    %c0_195 = arith.constant 0 : index
    %226 = vector.load %arg20[%c0_194, %c0_195] : memref<128x512xf32, #tpu.memory_space<vmem>>, vector<8x512xf32>
    tpu.vector_store %arg20[%c0_194, %c0_195], %225 {strides = array<i32>} : memref<128x512xf32, #tpu.memory_space<vmem>>, vector<8x512xf32>,
    %c16_i32_196 = arith.constant 16 : i32
    %227 = tpu.dynamic_rotate %224 by %c16_i32_196 dim 1 : vector<8x512xf32>, i32 -> vector<8x512xf32>
    %c8_197 = arith.constant 8 : index
    %c0_198 = arith.constant 0 : index
    %228 = vector.load %arg20[%c8_197, %c0_198] : memref<128x512xf32, #tpu.memory_space<vmem>>, vector<8x512xf32>
    tpu.vector_store %arg20[%c8_197, %c0_198], %227 {strides = array<i32>} : memref<128x512xf32, #tpu.memory_space<vmem>>, vector<8x512xf32>,
    %c15_i32_199 = arith.constant 15 : i32
    %229 = tpu.dynamic_rotate %224 by %c15_i32_199 dim 1 : vector<8x512xf32>, i32 -> vector<8x512xf32>
    %c16_200 = arith.constant 16 : index
    %c0_201 = arith.constant 0 : index
    %230 = vector.load %arg20[%c16_200, %c0_201] : memref<128x512xf32, #tpu.memory_space<vmem>>, vector<8x512xf32>
    tpu.vector_store %arg20[%c16_200, %c0_201], %229 {strides = array<i32>} : memref<128x512xf32, #tpu.memory_space<vmem>>, vector<8x512xf32>,
    %c1_i32_202 = arith.constant 1 : i32
    %231 = tpu.dynamic_rotate %224 by %c1_i32_202 dim 1 : vector<8x512xf32>, i32 -> vector<8x512xf32>
    %c24_203 = arith.constant 24 : index
    %c0_204 = arith.constant 0 : index
    %232 = vector.load %arg20[%c24_203, %c0_204] : memref<128x512xf32, #tpu.memory_space<vmem>>, vector<8x512xf32>
    tpu.vector_store %arg20[%c24_203, %c0_204], %231 {strides = array<i32>} : memref<128x512xf32, #tpu.memory_space<vmem>>, vector<8x512xf32>,
    %c32_205 = arith.constant 32 : index
    %c0_206 = arith.constant 0 : index
    %233 = vector.load %arg20[%c32_205, %c0_206] : memref<128x512xf32, #tpu.memory_space<vmem>>, vector<8x512xf32>
    tpu.vector_store %arg20[%c32_205, %c0_206], %224 {strides = array<i32>} : memref<128x512xf32, #tpu.memory_space<vmem>>, vector<8x512xf32>,
    %c511_i32_207 = arith.constant 511 : i32
    %234 = tpu.dynamic_rotate %224 by %c511_i32_207 dim 1 : vector<8x512xf32>, i32 -> vector<8x512xf32>
    %c40_208 = arith.constant 40 : index
    %c0_209 = arith.constant 0 : index
    %235 = vector.load %arg20[%c40_208, %c0_209] : memref<128x512xf32, #tpu.memory_space<vmem>>, vector<8x512xf32>
    tpu.vector_store %arg20[%c40_208, %c0_209], %234 {strides = array<i32>} : memref<128x512xf32, #tpu.memory_space<vmem>>, vector<8x512xf32>,
    %c497_i32_210 = arith.constant 497 : i32
    %236 = tpu.dynamic_rotate %224 by %c497_i32_210 dim 1 : vector<8x512xf32>, i32 -> vector<8x512xf32>
    %c48_211 = arith.constant 48 : index
    %c0_212 = arith.constant 0 : index
    %237 = vector.load %arg20[%c48_211, %c0_212] : memref<128x512xf32, #tpu.memory_space<vmem>>, vector<8x512xf32>
    tpu.vector_store %arg20[%c48_211, %c0_212], %236 {strides = array<i32>} : memref<128x512xf32, #tpu.memory_space<vmem>>, vector<8x512xf32>,
    %c496_i32_213 = arith.constant 496 : i32
    %238 = tpu.dynamic_rotate %224 by %c496_i32_213 dim 1 : vector<8x512xf32>, i32 -> vector<8x512xf32>
    %c56_214 = arith.constant 56 : index
    %c0_215 = arith.constant 0 : index
    %239 = vector.load %arg20[%c56_214, %c0_215] : memref<128x512xf32, #tpu.memory_space<vmem>>, vector<8x512xf32>
    tpu.vector_store %arg20[%c56_214, %c0_215], %238 {strides = array<i32>} : memref<128x512xf32, #tpu.memory_space<vmem>>, vector<8x512xf32>,
    %c495_i32_216 = arith.constant 495 : i32
    %240 = tpu.dynamic_rotate %224 by %c495_i32_216 dim 1 : vector<8x512xf32>, i32 -> vector<8x512xf32>
    %c64_217 = arith.constant 64 : index
    %c0_218 = arith.constant 0 : index
    %241 = vector.load %arg20[%c64_217, %c0_218] : memref<128x512xf32, #tpu.memory_space<vmem>>, vector<8x512xf32>
    tpu.vector_store %arg20[%c64_217, %c0_218], %240 {strides = array<i32>} : memref<128x512xf32, #tpu.memory_space<vmem>>, vector<8x512xf32>,
    %c0_219 = arith.constant 0 : index
    %c0_220 = arith.constant 0 : index
    %242 = vector.load %arg20[%c0_219, %c0_220] : memref<128x512xf32, #tpu.memory_space<vmem>>, vector<72x512xf32>
    %c0_221 = arith.constant 0 : index
    %c0_222 = arith.constant 0 : index
    %243 = vector.load %arg1[%c0_221, %c0_222] : memref<72x512xf32, #tpu.memory_space<vmem>>, vector<72x512xf32>
    %244 = arith.mulf %242, %243 : vector<72x512xf32>
    %c0_223 = arith.constant 0 : index
    %c0_224 = arith.constant 0 : index
    %245 = vector.load %arg13[%c0_223, %c0_224] : memref<8x72xbf16, #tpu.memory_space<vmem>>, vector<8x72xbf16>
    %246 = arith.truncf %244 : vector<72x512xf32> to vector<72x512xbf16>
    %cst_225 = arith.constant dense<0.000000e+00> : vector<8x512xf32>
    %247 = tpu.matmul %245, %246, %cst_225 {dimension_numbers = #tpu.dot_dimension_numbers<[1], [0], [0], [1], [0, 0, 1, 1], [], []>} : vector<8x72xbf16>, vector<72x512xbf16>, vector<8x512xf32> -> vector<8x512xf32>
    %c0_226 = arith.constant 0 : index
    %c0_227 = arith.constant 0 : index
    %248 = vector.load %arg14[%c0_226, %c0_227] : memref<8x1xf32, #tpu.memory_space<vmem>>, vector<8x1xf32>
    %249 = vector.broadcast %248 : vector<8x1xf32> to vector<8x512xf32>
    %250 = arith.addf %247, %249 : vector<8x512xf32>
    %251 = arith.addf %250, %26 : vector<8x512xf32>
    %c17_i32_228 = arith.constant 17 : i32
    %252 = tpu.dynamic_rotate %251 by %c17_i32_228 dim 1 : vector<8x512xf32>, i32 -> vector<8x512xf32>
    %c0_229 = arith.constant 0 : index
    %c0_230 = arith.constant 0 : index
    %253 = vector.load %arg20[%c0_229, %c0_230] : memref<128x512xf32, #tpu.memory_space<vmem>>, vector<8x512xf32>
    tpu.vector_store %arg20[%c0_229, %c0_230], %252 {strides = array<i32>} : memref<128x512xf32, #tpu.memory_space<vmem>>, vector<8x512xf32>,
    %c16_i32_231 = arith.constant 16 : i32
    %254 = tpu.dynamic_rotate %251 by %c16_i32_231 dim 1 : vector<8x512xf32>, i32 -> vector<8x512xf32>
    %c8_232 = arith.constant 8 : index
    %c0_233 = arith.constant 0 : index
    %255 = vector.load %arg20[%c8_232, %c0_233] : memref<128x512xf32, #tpu.memory_space<vmem>>, vector<8x512xf32>
    tpu.vector_store %arg20[%c8_232, %c0_233], %254 {strides = array<i32>} : memref<128x512xf32, #tpu.memory_space<vmem>>, vector<8x512xf32>,
    %c15_i32_234 = arith.constant 15 : i32
    %256 = tpu.dynamic_rotate %251 by %c15_i32_234 dim 1 : vector<8x512xf32>, i32 -> vector<8x512xf32>
    %c16_235 = arith.constant 16 : index
    %c0_236 = arith.constant 0 : index
    %257 = vector.load %arg20[%c16_235, %c0_236] : memref<128x512xf32, #tpu.memory_space<vmem>>, vector<8x512xf32>
    tpu.vector_store %arg20[%c16_235, %c0_236], %256 {strides = array<i32>} : memref<128x512xf32, #tpu.memory_space<vmem>>, vector<8x512xf32>,
    %c1_i32_237 = arith.constant 1 : i32
    %258 = tpu.dynamic_rotate %251 by %c1_i32_237 dim 1 : vector<8x512xf32>, i32 -> vector<8x512xf32>
    %c24_238 = arith.constant 24 : index
    %c0_239 = arith.constant 0 : index
    %259 = vector.load %arg20[%c24_238, %c0_239] : memref<128x512xf32, #tpu.memory_space<vmem>>, vector<8x512xf32>
    tpu.vector_store %arg20[%c24_238, %c0_239], %258 {strides = array<i32>} : memref<128x512xf32, #tpu.memory_space<vmem>>, vector<8x512xf32>,
    %c32_240 = arith.constant 32 : index
    %c0_241 = arith.constant 0 : index
    %260 = vector.load %arg20[%c32_240, %c0_241] : memref<128x512xf32, #tpu.memory_space<vmem>>, vector<8x512xf32>
    tpu.vector_store %arg20[%c32_240, %c0_241], %251 {strides = array<i32>} : memref<128x512xf32, #tpu.memory_space<vmem>>, vector<8x512xf32>,
    %c511_i32_242 = arith.constant 511 : i32
    %261 = tpu.dynamic_rotate %251 by %c511_i32_242 dim 1 : vector<8x512xf32>, i32 -> vector<8x512xf32>
    %c40_243 = arith.constant 40 : index
    %c0_244 = arith.constant 0 : index
    %262 = vector.load %arg20[%c40_243, %c0_244] : memref<128x512xf32, #tpu.memory_space<vmem>>, vector<8x512xf32>
    tpu.vector_store %arg20[%c40_243, %c0_244], %261 {strides = array<i32>} : memref<128x512xf32, #tpu.memory_space<vmem>>, vector<8x512xf32>,
    %c497_i32_245 = arith.constant 497 : i32
    %263 = tpu.dynamic_rotate %251 by %c497_i32_245 dim 1 : vector<8x512xf32>, i32 -> vector<8x512xf32>
    %c48_246 = arith.constant 48 : index
    %c0_247 = arith.constant 0 : index
    %264 = vector.load %arg20[%c48_246, %c0_247] : memref<128x512xf32, #tpu.memory_space<vmem>>, vector<8x512xf32>
    tpu.vector_store %arg20[%c48_246, %c0_247], %263 {strides = array<i32>} : memref<128x512xf32, #tpu.memory_space<vmem>>, vector<8x512xf32>,
    %c496_i32_248 = arith.constant 496 : i32
    %265 = tpu.dynamic_rotate %251 by %c496_i32_248 dim 1 : vector<8x512xf32>, i32 -> vector<8x512xf32>
    %c56_249 = arith.constant 56 : index
    %c0_250 = arith.constant 0 : index
    %266 = vector.load %arg20[%c56_249, %c0_250] : memref<128x512xf32, #tpu.memory_space<vmem>>, vector<8x512xf32>
    tpu.vector_store %arg20[%c56_249, %c0_250], %265 {strides = array<i32>} : memref<128x512xf32, #tpu.memory_space<vmem>>, vector<8x512xf32>,
    %c495_i32_251 = arith.constant 495 : i32
    %267 = tpu.dynamic_rotate %251 by %c495_i32_251 dim 1 : vector<8x512xf32>, i32 -> vector<8x512xf32>
    %c64_252 = arith.constant 64 : index
    %c0_253 = arith.constant 0 : index
    %268 = vector.load %arg20[%c64_252, %c0_253] : memref<128x512xf32, #tpu.memory_space<vmem>>, vector<8x512xf32>
    tpu.vector_store %arg20[%c64_252, %c0_253], %267 {strides = array<i32>} : memref<128x512xf32, #tpu.memory_space<vmem>>, vector<8x512xf32>,
    %c0_254 = arith.constant 0 : index
    %c0_255 = arith.constant 0 : index
    %269 = vector.load %arg20[%c0_254, %c0_255] : memref<128x512xf32, #tpu.memory_space<vmem>>, vector<72x512xf32>
    %c0_256 = arith.constant 0 : index
    %c0_257 = arith.constant 0 : index
    %270 = vector.load %arg1[%c0_256, %c0_257] : memref<72x512xf32, #tpu.memory_space<vmem>>, vector<72x512xf32>
    %271 = arith.mulf %269, %270 : vector<72x512xf32>
    %c0_258 = arith.constant 0 : index
    %c0_259 = arith.constant 0 : index
    %272 = vector.load %arg15[%c0_258, %c0_259] : memref<32x72xbf16, #tpu.memory_space<vmem>>, vector<32x72xbf16>
    %273 = arith.truncf %271 : vector<72x512xf32> to vector<72x512xbf16>
    %cst_260 = arith.constant dense<0.000000e+00> : vector<32x512xf32>
    %274 = tpu.matmul %272, %273, %cst_260 {dimension_numbers = #tpu.dot_dimension_numbers<[1], [0], [0], [1], [0, 0, 1, 1], [], []>} : vector<32x72xbf16>, vector<72x512xbf16>, vector<32x512xf32> -> vector<32x512xf32>
    %c0_261 = arith.constant 0 : index
    %c0_262 = arith.constant 0 : index
    %275 = vector.load %arg16[%c0_261, %c0_262] : memref<32x1xf32, #tpu.memory_space<vmem>>, vector<32x1xf32>
    %276 = vector.broadcast %275 : vector<32x1xf32> to vector<32x512xf32>
    %277 = arith.addf %274, %276 : vector<32x512xf32>
    %278 = vector.extract_strided_slice %277 {offsets = [24, 0], sizes = [8, 512], strides = [1, 1]} : vector<32x512xf32> to vector<8x512xf32>
    %c17_i32_263 = arith.constant 17 : i32
    %279 = tpu.dynamic_rotate %278 by %c17_i32_263 dim 1 : vector<8x512xf32>, i32 -> vector<8x512xf32>
    %c0_264 = arith.constant 0 : index
    %c0_265 = arith.constant 0 : index
    %280 = vector.load %arg20[%c0_264, %c0_265] : memref<128x512xf32, #tpu.memory_space<vmem>>, vector<8x512xf32>
    tpu.vector_store %arg20[%c0_264, %c0_265], %279 {strides = array<i32>} : memref<128x512xf32, #tpu.memory_space<vmem>>, vector<8x512xf32>,
    %281 = vector.extract_strided_slice %277 {offsets = [16, 0], sizes = [8, 512], strides = [1, 1]} : vector<32x512xf32> to vector<8x512xf32>
    %c16_i32_266 = arith.constant 16 : i32
    %282 = tpu.dynamic_rotate %281 by %c16_i32_266 dim 1 : vector<8x512xf32>, i32 -> vector<8x512xf32>
    %c8_267 = arith.constant 8 : index
    %c0_268 = arith.constant 0 : index
    %283 = vector.load %arg20[%c8_267, %c0_268] : memref<128x512xf32, #tpu.memory_space<vmem>>, vector<8x512xf32>
    tpu.vector_store %arg20[%c8_267, %c0_268], %282 {strides = array<i32>} : memref<128x512xf32, #tpu.memory_space<vmem>>, vector<8x512xf32>,
    %284 = vector.extract_strided_slice %277 {offsets = [24, 0], sizes = [8, 512], strides = [1, 1]} : vector<32x512xf32> to vector<8x512xf32>
    %c16_i32_269 = arith.constant 16 : i32
    %285 = tpu.dynamic_rotate %284 by %c16_i32_269 dim 1 : vector<8x512xf32>, i32 -> vector<8x512xf32>
    %c16_270 = arith.constant 16 : index
    %c0_271 = arith.constant 0 : index
    %286 = vector.load %arg20[%c16_270, %c0_271] : memref<128x512xf32, #tpu.memory_space<vmem>>, vector<8x512xf32>
    tpu.vector_store %arg20[%c16_270, %c0_271], %285 {strides = array<i32>} : memref<128x512xf32, #tpu.memory_space<vmem>>, vector<8x512xf32>,
    %287 = vector.extract_strided_slice %277 {offsets = [16, 0], sizes = [8, 512], strides = [1, 1]} : vector<32x512xf32> to vector<8x512xf32>
    %c15_i32_272 = arith.constant 15 : i32
    %288 = tpu.dynamic_rotate %287 by %c15_i32_272 dim 1 : vector<8x512xf32>, i32 -> vector<8x512xf32>
    %c24_273 = arith.constant 24 : index
    %c0_274 = arith.constant 0 : index
    %289 = vector.load %arg20[%c24_273, %c0_274] : memref<128x512xf32, #tpu.memory_space<vmem>>, vector<8x512xf32>
    tpu.vector_store %arg20[%c24_273, %c0_274], %288 {strides = array<i32>} : memref<128x512xf32, #tpu.memory_space<vmem>>, vector<8x512xf32>,
    %290 = vector.extract_strided_slice %277 {offsets = [8, 0], sizes = [8, 512], strides = [1, 1]} : vector<32x512xf32> to vector<8x512xf32>
    %c1_i32_275 = arith.constant 1 : i32
    %291 = tpu.dynamic_rotate %290 by %c1_i32_275 dim 1 : vector<8x512xf32>, i32 -> vector<8x512xf32>
    %c32_276 = arith.constant 32 : index
    %c0_277 = arith.constant 0 : index
    %292 = vector.load %arg20[%c32_276, %c0_277] : memref<128x512xf32, #tpu.memory_space<vmem>>, vector<8x512xf32>
    tpu.vector_store %arg20[%c32_276, %c0_277], %291 {strides = array<i32>} : memref<128x512xf32, #tpu.memory_space<vmem>>, vector<8x512xf32>,
    %293 = vector.extract_strided_slice %277 {offsets = [0, 0], sizes = [8, 512], strides = [1, 1]} : vector<32x512xf32> to vector<8x512xf32>
    %c40_278 = arith.constant 40 : index
    %c0_279 = arith.constant 0 : index
    %294 = vector.load %arg20[%c40_278, %c0_279] : memref<128x512xf32, #tpu.memory_space<vmem>>, vector<8x512xf32>
    tpu.vector_store %arg20[%c40_278, %c0_279], %293 {strides = array<i32>} : memref<128x512xf32, #tpu.memory_space<vmem>>, vector<8x512xf32>,
    %295 = vector.extract_strided_slice %277 {offsets = [8, 0], sizes = [8, 512], strides = [1, 1]} : vector<32x512xf32> to vector<8x512xf32>
    %c48_280 = arith.constant 48 : index
    %c0_281 = arith.constant 0 : index
    %296 = vector.load %arg20[%c48_280, %c0_281] : memref<128x512xf32, #tpu.memory_space<vmem>>, vector<8x512xf32>
    tpu.vector_store %arg20[%c48_280, %c0_281], %295 {strides = array<i32>} : memref<128x512xf32, #tpu.memory_space<vmem>>, vector<8x512xf32>,
    %297 = vector.extract_strided_slice %277 {offsets = [0, 0], sizes = [8, 512], strides = [1, 1]} : vector<32x512xf32> to vector<8x512xf32>
    %c511_i32_282 = arith.constant 511 : i32
    %298 = tpu.dynamic_rotate %297 by %c511_i32_282 dim 1 : vector<8x512xf32>, i32 -> vector<8x512xf32>
    %c56_283 = arith.constant 56 : index
    %c0_284 = arith.constant 0 : index
    %299 = vector.load %arg20[%c56_283, %c0_284] : memref<128x512xf32, #tpu.memory_space<vmem>>, vector<8x512xf32>
    tpu.vector_store %arg20[%c56_283, %c0_284], %298 {strides = array<i32>} : memref<128x512xf32, #tpu.memory_space<vmem>>, vector<8x512xf32>,
    %300 = vector.extract_strided_slice %277 {offsets = [24, 0], sizes = [8, 512], strides = [1, 1]} : vector<32x512xf32> to vector<8x512xf32>
    %c1_i32_285 = arith.constant 1 : i32
    %301 = tpu.dynamic_rotate %300 by %c1_i32_285 dim 1 : vector<8x512xf32>, i32 -> vector<8x512xf32>
    %c64_286 = arith.constant 64 : index
    %c0_287 = arith.constant 0 : index
    %302 = vector.load %arg20[%c64_286, %c0_287] : memref<128x512xf32, #tpu.memory_space<vmem>>, vector<8x512xf32>
    tpu.vector_store %arg20[%c64_286, %c0_287], %301 {strides = array<i32>} : memref<128x512xf32, #tpu.memory_space<vmem>>, vector<8x512xf32>,
    %303 = vector.extract_strided_slice %277 {offsets = [16, 0], sizes = [8, 512], strides = [1, 1]} : vector<32x512xf32> to vector<8x512xf32>
    %c72 = arith.constant 72 : index
    %c0_288 = arith.constant 0 : index
    %304 = vector.load %arg20[%c72, %c0_288] : memref<128x512xf32, #tpu.memory_space<vmem>>, vector<8x512xf32>
    tpu.vector_store %arg20[%c72, %c0_288], %303 {strides = array<i32>} : memref<128x512xf32, #tpu.memory_space<vmem>>, vector<8x512xf32>,
    %305 = vector.extract_strided_slice %277 {offsets = [24, 0], sizes = [8, 512], strides = [1, 1]} : vector<32x512xf32> to vector<8x512xf32>
    %c80 = arith.constant 80 : index
    %c0_289 = arith.constant 0 : index
    %306 = vector.load %arg20[%c80, %c0_289] : memref<128x512xf32, #tpu.memory_space<vmem>>, vector<8x512xf32>
    tpu.vector_store %arg20[%c80, %c0_289], %305 {strides = array<i32>} : memref<128x512xf32, #tpu.memory_space<vmem>>, vector<8x512xf32>,
    %307 = vector.extract_strided_slice %277 {offsets = [16, 0], sizes = [8, 512], strides = [1, 1]} : vector<32x512xf32> to vector<8x512xf32>
    %c511_i32_290 = arith.constant 511 : i32
    %308 = tpu.dynamic_rotate %307 by %c511_i32_290 dim 1 : vector<8x512xf32>, i32 -> vector<8x512xf32>
    %c88 = arith.constant 88 : index
    %c0_291 = arith.constant 0 : index
    %309 = vector.load %arg20[%c88, %c0_291] : memref<128x512xf32, #tpu.memory_space<vmem>>, vector<8x512xf32>
    tpu.vector_store %arg20[%c88, %c0_291], %308 {strides = array<i32>} : memref<128x512xf32, #tpu.memory_space<vmem>>, vector<8x512xf32>,
    %310 = vector.extract_strided_slice %277 {offsets = [8, 0], sizes = [8, 512], strides = [1, 1]} : vector<32x512xf32> to vector<8x512xf32>
    %c497_i32_292 = arith.constant 497 : i32
    %311 = tpu.dynamic_rotate %310 by %c497_i32_292 dim 1 : vector<8x512xf32>, i32 -> vector<8x512xf32>
    %c96 = arith.constant 96 : index
    %c0_293 = arith.constant 0 : index
    %312 = vector.load %arg20[%c96, %c0_293] : memref<128x512xf32, #tpu.memory_space<vmem>>, vector<8x512xf32>
    tpu.vector_store %arg20[%c96, %c0_293], %311 {strides = array<i32>} : memref<128x512xf32, #tpu.memory_space<vmem>>, vector<8x512xf32>,
    %313 = vector.extract_strided_slice %277 {offsets = [0, 0], sizes = [8, 512], strides = [1, 1]} : vector<32x512xf32> to vector<8x512xf32>
    %c496_i32_294 = arith.constant 496 : i32
    %314 = tpu.dynamic_rotate %313 by %c496_i32_294 dim 1 : vector<8x512xf32>, i32 -> vector<8x512xf32>
    %c104 = arith.constant 104 : index
    %c0_295 = arith.constant 0 : index
    %315 = vector.load %arg20[%c104, %c0_295] : memref<128x512xf32, #tpu.memory_space<vmem>>, vector<8x512xf32>
    tpu.vector_store %arg20[%c104, %c0_295], %314 {strides = array<i32>} : memref<128x512xf32, #tpu.memory_space<vmem>>, vector<8x512xf32>,
    %316 = vector.extract_strided_slice %277 {offsets = [8, 0], sizes = [8, 512], strides = [1, 1]} : vector<32x512xf32> to vector<8x512xf32>
    %c496_i32_296 = arith.constant 496 : i32
    %317 = tpu.dynamic_rotate %316 by %c496_i32_296 dim 1 : vector<8x512xf32>, i32 -> vector<8x512xf32>
    %c112 = arith.constant 112 : index
    %c0_297 = arith.constant 0 : index
    %318 = vector.load %arg20[%c112, %c0_297] : memref<128x512xf32, #tpu.memory_space<vmem>>, vector<8x512xf32>
    tpu.vector_store %arg20[%c112, %c0_297], %317 {strides = array<i32>} : memref<128x512xf32, #tpu.memory_space<vmem>>, vector<8x512xf32>,
    %319 = vector.extract_strided_slice %277 {offsets = [0, 0], sizes = [8, 512], strides = [1, 1]} : vector<32x512xf32> to vector<8x512xf32>
    %c495_i32_298 = arith.constant 495 : i32
    %320 = tpu.dynamic_rotate %319 by %c495_i32_298 dim 1 : vector<8x512xf32>, i32 -> vector<8x512xf32>
    %c120 = arith.constant 120 : index
    %c0_299 = arith.constant 0 : index
    %321 = vector.load %arg20[%c120, %c0_299] : memref<128x512xf32, #tpu.memory_space<vmem>>, vector<8x512xf32>
    tpu.vector_store %arg20[%c120, %c0_299], %320 {strides = array<i32>} : memref<128x512xf32, #tpu.memory_space<vmem>>, vector<8x512xf32>,
    %c0_300 = arith.constant 0 : index
    %c0_301 = arith.constant 0 : index
    %322 = vector.load %arg20[%c0_300, %c0_301] : memref<128x512xf32, #tpu.memory_space<vmem>>, vector<128x512xf32>
    %c0_302 = arith.constant 0 : index
    %c0_303 = arith.constant 0 : index
    %323 = vector.load %arg2[%c0_302, %c0_303] : memref<128x512xf32, #tpu.memory_space<vmem>>, vector<128x512xf32>
    %324 = arith.mulf %322, %323 : vector<128x512xf32>
    %c0_304 = arith.constant 0 : index
    %c0_305 = arith.constant 0 : index
    %325 = vector.load %arg17[%c0_304, %c0_305] : memref<12x128xbf16, #tpu.memory_space<vmem>>, vector<12x128xbf16>
    %326 = arith.truncf %324 : vector<128x512xf32> to vector<128x512xbf16>
    %cst_306 = arith.constant dense<0.000000e+00> : vector<12x512xf32>
    %327 = tpu.matmul %325, %326, %cst_306 {dimension_numbers = #tpu.dot_dimension_numbers<[1], [0], [0], [1], [0, 0, 1, 1], [], []>} : vector<12x128xbf16>, vector<128x512xbf16>, vector<12x512xf32> -> vector<12x512xf32>
    %c0_307 = arith.constant 0 : index
    %c0_308 = arith.constant 0 : index
    %328 = vector.load %arg18[%c0_307, %c0_308] : memref<12x1xf32, #tpu.memory_space<vmem>>, vector<12x1xf32>
    %329 = vector.broadcast %328 : vector<12x1xf32> to vector<12x512xf32>
    %330 = arith.addf %327, %329 : vector<12x512xf32>
    %c0_309 = arith.constant 0 : index
    %c0_310 = arith.constant 0 : index
    %331 = vector.load %arg19[%c0_309, %c0_310] : memref<12x512xf32, #tpu.memory_space<vmem>>, vector<12x512xf32>
    tpu.vector_store %arg19[%c0_309, %c0_310], %330 {strides = array<i32>} : memref<12x512xf32, #tpu.memory_space<vmem>>, vector<12x512xf32>,
    return
  }
}

</mosaic_0001>

<bundles_post_ra>
// kernel: net_forward.1
= control target key start
LH: loop header
LB: loop body
LE: loop exit
PB: predicated region body
PF: predicated region fallthrough
CT: control target
= control target key end

     0   :  { %s3462_s21 = smov 16   ;;  %s3464_s26 = smov 15   ;;  %v6161_v4 = vmov 0   ;;  %v75_v6 = vlaneseq  ;;  %vm348_vm8 = vcmask 1043456   ;;  %vm344_vm9 = vcmask 588800   ;;  %s6135_s0 = inlined_call_operand.vmem [shape: f32[8,512], index: 0, kind: input, shape index: {}]   ;;  %s6136_s4 = inlined_call_operand.vmem [shape: f32[8,1], index: 4, kind: input, shape index: {}]   ;;  %s6137_s1 = inlined_call_operand.vmem [shape: f32[72,512], index: 1, kind: input, shape index: {}]   ;;  %s6138_s3 = inlined_call_operand.vmem [shape: bf16[8,72], index: 3, kind: input, shape index: {}]   ;;  %s6139_s5 = inlined_call_operand.vmem [shape: bf16[8,72], index: 5, kind: input, shape index: {}]   ;;  %s6140_s7 = inlined_call_operand.vmem [shape: f32[8,1], index: 7, kind: input, shape index: {}]   ;;  %s6141_s8 = inlined_call_operand.vmem [shape: f32[8,1], index: 8, kind: input, shape index: {}]   ;;  %s6142_s6 = inlined_call_operand.vmem [shape: bf16[8,72], index: 6, kind: input, shape index: {}]   ;;  %s6143_s9 = inlined_call_operand.vmem [shape: bf16[8,72], index: 9, kind: input, shape index: {}]   ;;  %s6144_s11 = inlined_call_operand.vmem [shape: f32[8,1], index: 11, kind: input, shape index: {}]   ;;  %s6145_s12 = inlined_call_operand.vmem [shape: f32[8,1], index: 12, kind: input, shape index: {}]   ;;  %s6146_s10 = inlined_call_operand.vmem [shape: bf16[8,72], index: 10, kind: input, shape index: {}]   ;;  %s6147_s14 = inlined_call_operand.vmem [shape: f32[8,1], index: 14, kind: input, shape index: {}]   ;;  %s6148_s13 = inlined_call_operand.vmem [shape: bf16[8,72], index: 13, kind: input, shape index: {}]   ;;  %s6149_s15 = inlined_call_operand.vmem [shape: bf16[32,72], index: 15, kind: input, shape index: {}]   ;;  %s6150_s16 = inlined_call_operand.vmem [shape: f32[32,1], index: 16, kind: input, shape index: {}]   ;;  %s6151_s17 = inlined_call_operand.vmem [shape: bf16[12,128], index: 17, kind: input, shape index: {}]   ;;  %s6152_s18 = inlined_call_operand.vmem [shape: f32[12,1], index: 18, kind: input, shape index: {}]   ;;  %s6153_s2 = inlined_call_operand.vmem [shape: f32[128,512], index: 2, kind: input, shape index: {}]   ;;  %s6154_s19 = inlined_call_operand.vmem [shape: f32[12,512], index: 19, kind: output, shape index: {}]  }
   0x1   :  { %6180 = sst [smem:[#allocation12_spill]] %s6135_s0  ;;  %s3465_s27 = smov 1   ;;  %393 = vmatprep.mubr.bf16.mxu0 %v6161_v4  ;;  %434 = vmatprep.mubr.bf16.mxu1 %v6161_v4 }
   0x2   :  { %6181 = sst [smem:[#allocation13_spill]] %s6136_s4  ;;  %s6184_s20 = sld [smem:[#allocation12_spill]]  ;;  %3449 = vset.pattern.permute.xlu0 %v6161_v4  ;;  %3450 = vset.pattern.permute.xlu1 %v6161_v4  ;;  %v3662_v7 = vand.u32 127, %v75_v6 }
   0x3   :  { %6182 = sst [smem:[#allocation14_spill]] %s6137_s1  ;;  %s3463_s4 = smov 17  }
   0x4   :  { %6183 = sst [smem:[#allocation15_spill]] %s6138_s3  ;;  %s3466_s28 = smov 127   ;;  %vm77_vm0 = vcmp.lt.s32.totalorder %v3662_v7, 17  ;;  %vm94_vm1 = vcmp.lt.s32.totalorder %v3662_v7, 16  ;;  %vm111_vm2 = vcmp.lt.s32.totalorder %v3662_v7, 15  ;;  %vm128_vm3 = vcmp.lt.s32.totalorder %v3662_v7, 1 }
   0x5   :  { %s3467_s29 = smov 113   ;;  %s6159_s0 = smov 112   ;;  %vm149_vm4 = vcmp.lt.s32.totalorder %v3662_v7, 127  ;;  %vm166_vm5 = vcmp.lt.s32.totalorder %v3662_v7, 113  ;;  %vm183_vm6 = vcmp.lt.s32.totalorder %v3662_v7, 112  ;;  %vm200_vm7 = vcmp.lt.s32.totalorder %v3662_v7, 111 }
   0x6   :  { %s6157_s30 = smov 111   ;;  %s6185_s1 = sld [smem:[#allocation13_spill]] }
   0x7   :  { %s6186_s25 = sld [smem:[#allocation14_spill]]  ;;  %s6195_s24 = sld [smem:[#allocation15_spill]] }
   0x8   :  { %v3574_v0 = vld [vmem:[%s6184_s20] sm:$0xff]  ;;  %v3583_v1 = vld [vmem:[%s6184_s20 + $0x8] sm:$0xff]  ;;  %v3592_v2 = vld [vmem:[%s6184_s20 + $0x18] sm:$0xff]  ;;  %s6196_s3 = smov 112  }
   0x9   :  { %86 = vrot.lane.b32.xlu1 %v3574_v0, %s3462_s21  ;;  %67 = vrot.lane.b32.xlu0 %v3574_v0, %s3463_s4  ;;  %v3597_v3 = vld [vmem:[%s6184_s20 + $0x10] sm:$0xff] }
   0xc   :  { %v338_v5 = vld [vmem:[%s6185_s1] sm:$0xff] }
   0xd   :  { %88 = vrot.lane.b32.xlu1 %v3583_v1, %s3462_s21  ;;  %69 = vrot.lane.b32.xlu0 %v3583_v1, %s3463_s4  ;;  %v3669_v10 = vld [vmem:[%s6186_s25 + $0x8] sm:$0xff]  ;;  %v3687_v22 = vld [vmem:[%s6186_s25] sm:$0xff] }
   0xe   :  { %v3674_v11 = vld [vmem:[%s6186_s25 + $0x28] sm:$0xff]  ;;  %6188 = vst [vmem:[#allocation4_spill] sm:$0xff] %v3687_v22  ;;  %v3692_v23 = vld [vmem:[%s6186_s25 + $0x20] sm:$0xff]  ;;  %v3699_v25 = vld [vmem:[%s6186_s25 + $0x18] sm:$0xff] }
   0xf   :  { %6187 = vst [vmem:[#allocation3_spill] sm:$0xff] %v3674_v11  ;;  %v3706_v27 = vld [vmem:[%s6186_s25 + $0x38] sm:$0xff]  ;;  %v3711_v28 = vld [vmem:[%s6186_s25 + $0x10] sm:$0xff]  ;;  %v3735_v46 = vld [vmem:[%s6186_s25 + $0x48] sm:$0xff] }
  0x10   :  { %v3716_v29 = vld [vmem:[%s6186_s25 + $0x30] sm:$0xff]  ;;  %v3742_v48 = vld [vmem:[%s6186_s25 + $0x68] sm:$0xff]  ;;  %v3751_v57 = vld [vmem:[%s6186_s25 + $0x40] sm:$0xff] }
  0x11   :  { %73 = vrot.lane.b32.xlu1 %v3592_v2, %s3463_s4  ;;  %71 = vrot.lane.b32.xlu0 %v3597_v3, %s3463_s4  ;;  %v3758_v59 = vld [vmem:[%s6186_s25 + $0x50] sm:$0xff]  ;;  %v3763_v60 = vld [vmem:[%s6186_s25 + $0x58] sm:$0xff] }
  0x12   :  { %v3772_v63 = vld [vmem:[%s6186_s25 + $0x60] sm:$0xff]  ;;  %v3782_v6 = vld [vmem:[%s6186_s25 + $0x78] sm:$0xff] }
  0x15   :  { %92 = vrot.lane.b32.xlu1 %v3592_v2, %s3462_s21  ;;  %90 = vrot.lane.b32.xlu0 %v3597_v3, %s3462_s21 }
  0x19   :  { %105 = vrot.lane.b32.xlu1 %v3583_v1, %s3464_s26  ;;  %103 = vrot.lane.b32.xlu0 %v3574_v0, %s3464_s26 }
  0x1d   :  { %122 = vrot.lane.b32.xlu1 %v3583_v1, %s3465_s27  ;;  %120 = vrot.lane.b32.xlu0 %v3574_v0, %s3465_s27 }
  0x21   :  { %109 = vrot.lane.b32.xlu1 %v3592_v2, %s3464_s26  ;;  %107 = vrot.lane.b32.xlu0 %v3597_v3, %s3464_s26 }
  0x25   :  { %126 = vrot.lane.b32.xlu1 %v3592_v2, %s3465_s27  ;;  %124 = vrot.lane.b32.xlu0 %v3597_v3, %s3465_s27 }
  0x29   :  { %145 = vrot.lane.b32.xlu1 %v3597_v3, %s3466_s28  ;;  %143 = vrot.lane.b32.xlu0 %v3583_v1, %s3466_s28 }
  0x2d   :  { %147 = vrot.lane.b32.xlu1 %v3592_v2, %s3466_s28  ;;  %141 = vrot.lane.b32.xlu0 %v3574_v0, %s3466_s28 }
  0x31   :  { %162 = vrot.lane.b32.xlu1 %v3597_v3, %s3467_s29  ;;  %160 = vrot.lane.b32.xlu0 %v3583_v1, %s3467_s29 }
  0x35   :  { %179 = vrot.lane.b32.xlu1 %v3597_v3, %s6159_s0  ;;  %177 = vrot.lane.b32.xlu0 %v3583_v1, %s6159_s0 }
  0x39   :  { %164 = vrot.lane.b32.xlu1 %v3592_v2, %s3467_s29  ;;  %158 = vrot.lane.b32.xlu0 %v3574_v0, %s3467_s29 }
  0x3d   :  { %181 = vrot.lane.b32.xlu1 %v3592_v2, %s6159_s0  ;;  %175 = vrot.lane.b32.xlu0 %v3574_v0, %s6159_s0 }
  0x41   :  { %194 = vrot.lane.b32.xlu1 %v3583_v1, %s6157_s30  ;;  %192 = vrot.lane.b32.xlu0 %v3574_v0, %s6157_s30 }
  0x45   :  { %198 = vrot.lane.b32.xlu1 %v3592_v2, %s6157_s30  ;;  %196 = vrot.lane.b32.xlu0 %v3597_v3, %s6157_s30  ;;  %s6197_s30 = smov 111  }
  0x49   :  { %341 = vperm.xlu0 %3449, %v338_v5   ;;  %v3777_v5 = vld [vmem:[%s6186_s25 + $0x70] sm:$0xff] }
  0x7b   :  { %v87_v8 = vpop.permute.xlu1 %86  ;;  %v68_v9 = vpop.permute.xlu0 %67 }
  0x7f   :  { %v89_v12 = vpop.permute.xlu1 %88  ;;  %v70_v13 = vpop.permute.xlu0 %69 }
  0x80   :  { %v80_v14 = vsel %vm77_vm0, %v68_v9, %v70_v13  ;;  %v97_v15 = vsel %vm94_vm1, %v87_v8, %v89_v12 }
  0x81   :  { %v282_v16 = vmul.f32 %v3669_v10, %v80_v14  ;;  %v286_v17 = vmul.f32 %v3674_v11, %v97_v15 }
  0x83   :  { %v74_v18 = vpop.permute.xlu1 %73  ;;  %v72_v19 = vpop.permute.xlu0 %71  ;;  %v319_v20 = vpack.c.bf16 %v286_v17, %v282_v16  ;;  %v3796_v17 = vld [vmem:[%s6186_s25 + $0x88] sm:$0xff] }
  0x84   :  { %v81_v21 = vsel %vm77_vm0, %v74_v18, %v68_v9  ;;  %v78_v24 = vsel %vm77_vm0, %v72_v19, %v74_v18  ;;  %v79_v26 = vsel %vm77_vm0, %v70_v13, %v72_v19 }
  0x85   :  { %361 = vmatprep.subr.bf16.mxu0 %v319_v20  ;;  %v281_v32 = vmul.f32 %v3687_v22, %v81_v21  ;;  %v284_v36 = vmul.f32 %v3699_v25, %v78_v24  ;;  %v283_v39 = vmul.f32 %v3711_v28, %v79_v26  ;;  %v3805_v24 = vld [vmem:[%s6186_s25 + $0xa8] sm:$0xff] }
  0x87   :  { %v93_v30 = vpop.permute.xlu1 %92  ;;  %v91_v31 = vpop.permute.xlu0 %90 }
  0x88   :  { %v98_v33 = vsel %vm94_vm1, %v93_v30, %v87_v8  ;;  %v96_v34 = vsel %vm94_vm1, %v89_v12, %v91_v31  ;;  %v95_v35 = vsel %vm94_vm1, %v91_v31, %v93_v30 }
  0x89   :  { %v285_v37 = vmul.f32 %v3692_v23, %v98_v33  ;;  %v288_v38 = vmul.f32 %v3706_v27, %v95_v35  ;;  %v287_v40 = vmul.f32 %v3716_v29, %v96_v34  ;;  %v298_v34 = vmul.f32 %v3796_v17, %v3583_v1 }
  0x8b   :  { %v106_v41 = vpop.permute.xlu1 %105  ;;  %v104_v42 = vpop.permute.xlu0 %103  ;;  %v318_v43 = vpack.c.bf16 %v285_v37, %v281_v32  ;;  %v321_v44 = vpack.c.bf16 %v288_v38, %v284_v36  ;;  %v320_v45 = vpack.c.bf16 %v287_v40, %v283_v39  ;;  %v3814_v36 = vld [vmem:[%s6186_s25 + $0x80] sm:$0xff]  ;;  %v3819_v37 = vld [vmem:[%s6186_s25 + $0x98] sm:$0xff]  ;;  %v3824_v38 = vld [vmem:[%s6186_s25 + $0x90] sm:$0xff] }
  0x8c   :  { %v114_v47 = vsel %vm111_vm2, %v104_v42, %v106_v41  ;;  %v3830_v39 = vld [vmem:[%s6186_s25 + $0xb0] sm:$0xff]  ;;  %v3835_v40 = vld [vmem:[%s6186_s25 + $0xa0] sm:$0xff] }
  0x8d   :  { %362 = vmatpush1.bf16.msra.mxu0 %v318_v43  ;;  %402 = vmatprep.subr.bf16.mxu1 %v321_v44  ;;  %v290_v52 = vmul.f32 %v3735_v46, %v114_v47  ;;  %v300_v47 = vmul.f32 %v3819_v37, %v3592_v2 }
  0x8e   :  { %403 = vmatpush1.bf16.msra.mxu1 %v320_v45  ;;  %v297_v45 = vmul.f32 %v3814_v36, %v3574_v0 }
  0x8f   :  { %v123_v49 = vpop.permute.xlu1 %122  ;;  %v121_v50 = vpop.permute.xlu0 %120 }
  0x90   :  { %v131_v51 = vsel %vm128_vm3, %v121_v50, %v123_v49 }
  0x91   :  { %v294_v53 = vmul.f32 %v3742_v48, %v131_v51 }
  0x93   :  { %v110_v54 = vpop.permute.xlu1 %109  ;;  %v108_v55 = vpop.permute.xlu0 %107  ;;  %v323_v56 = vpack.c.bf16 %v294_v53, %v290_v52 }
  0x94   :  { %v115_v58 = vsel %vm111_vm2, %v110_v54, %v104_v42  ;;  %v113_v61 = vsel %vm111_vm2, %v106_v41, %v108_v55  ;;  %v112_v62 = vsel %vm111_vm2, %v108_v55, %v110_v54  ;;  %v3840_v41 = vld [vmem:[%s6186_s25 + $0xb8] sm:$0xff] }
  0x95   :  { %363 = vmatprep.subr.bf16.mxu0 %v323_v56  ;;  %v289_v8 = vmul.f32 %v3751_v57, %v115_v58  ;;  %v291_v13 = vmul.f32 %v3758_v59, %v113_v61  ;;  %v292_v18 = vmul.f32 %v3763_v60, %v112_v62  ;;  %v3862_v61 = vld [vmem:[%s6186_s25 + $0xc8] sm:$0xff] }
  0x97   :  { %v127_v9 = vpop.permute.xlu1 %126  ;;  %v125_v12 = vpop.permute.xlu0 %124 }
  0x98   :  { %v132_v14 = vsel %vm128_vm3, %v127_v9, %v121_v50  ;;  %v129_v15 = vsel %vm128_vm3, %v125_v12, %v127_v9  ;;  %v130_v16 = vsel %vm128_vm3, %v123_v49, %v125_v12  ;;  %v299_v49 = vmul.f32 %v3824_v38, %v3597_v3 }
  0x99   :  { %v293_v19 = vmul.f32 %v3772_v63, %v132_v14  ;;  %v295_v20 = vmul.f32 %v3777_v5, %v130_v16  ;;  %v296_v21 = vmul.f32 %v3782_v6, %v129_v15 }
  0x9b   :  { %v146_v26 = vpop.permute.xlu1 %145  ;;  %v144_v30 = vpop.permute.xlu0 %143  ;;  %v322_v31 = vpack.c.bf16 %v293_v19, %v289_v8  ;;  %v325_v32 = vpack.c.bf16 %v296_v21, %v292_v18  ;;  %v324_v33 = vpack.c.bf16 %v295_v20, %v291_v13  ;;  %v3869_v8 = vld [vmem:[%s6186_s25 + $0xe8] sm:$0xff]  ;;  %v3878_v20 = vld [vmem:[%s6186_s25 + $0xd0] sm:$0xff] }
  0x9c   :  { %v151_v35 = vsel %vm149_vm4, %v144_v30, %v146_v26 }
  0x9d   :  { %v302_v1 = vmul.f32 %v3805_v24, %v151_v35  ;;  %364 = vmatpush1.bf16.msra.mxu0 %v322_v31  ;;  %404 = vmatprep.subr.bf16.mxu1 %v325_v32  ;;  %v3909_v35 = vld [vmem:[%s6186_s25 + $0xf8] sm:$0xff] }
  0x9e   :  { %405 = vmatpush1.bf16.msra.mxu1 %v324_v33  ;;  %v3899_v33 = vld [vmem:[%s6186_s25 + $0xf0] sm:$0xff]  ;;  %6190 = vst [vmem:[#allocation6_spill] sm:$0xff] %v3909_v35 }
  0x9f   :  { %v148_v42 = vpop.permute.xlu1 %147  ;;  %v142_v43 = vpop.permute.xlu0 %141  ;;  %v327_v44 = vpack.c.bf16 %v302_v1, %v298_v34  ;;  %6189 = vst [vmem:[#allocation5_spill] sm:$0xff] %v3899_v33  ;;  %v3904_v34 = vld [vmem:[%s6186_s25 + $0xe0] sm:$0xff] }
  0xa0   :  { %v150_v50 = vsel %vm149_vm4, %v146_v26, %v148_v42  ;;  %v152_v51 = vsel %vm149_vm4, %v142_v43, %v144_v30  ;;  %v153_v52 = vsel %vm149_vm4, %v148_v42, %v142_v43  ;;  %v3885_v26 = vld [vmem:[%s6186_s25 + $0xc0] sm:$0xff]  ;;  %v3890_v30 = vld [vmem:[%s6186_s25 + $0xd8] sm:$0xff] }
  0xa1   :  { %v303_v53 = vmul.f32 %v3830_v39, %v150_v50  ;;  %v301_v54 = vmul.f32 %v3835_v40, %v152_v51  ;;  %v304_v0 = vmul.f32 %v3840_v41, %v153_v52  ;;  %365 = vmatprep.subr.bf16.mxu0 %v327_v44 }
  0xa3   :  { %v163_v2 = vpop.permute.xlu1 %162  ;;  %v161_v3 = vpop.permute.xlu0 %160  ;;  %v326_v55 = vpack.c.bf16 %v301_v54, %v297_v45  ;;  %v329_v56 = vpack.c.bf16 %v304_v0, %v300_v47  ;;  %v328_v58 = vpack.c.bf16 %v303_v53, %v299_v49  ;;  %v3927_v54 = vld [vmem:[%s6186_s25 + $0x100] sm:$0xff] }
  0xa4   :  { %v168_v62 = vsel %vm166_vm5, %v161_v3, %v163_v2  ;;  %6191 = vst [vmem:[#allocation7_spill] sm:$0xff] %v3927_v54 }
  0xa5   :  { %366 = vmatpush1.bf16.msra.mxu0 %v326_v55  ;;  %406 = vmatprep.subr.bf16.mxu1 %v329_v56  ;;  %v306_v14 = vmul.f32 %v3862_v61, %v168_v62 }
  0xa6   :  { %407 = vmatpush1.bf16.msra.mxu1 %v328_v58 }
  0xa7   :  { %v180_v9 = vpop.permute.xlu1 %179  ;;  %v178_v12 = vpop.permute.xlu0 %177 }
  0xa8   :  { %v185_v13 = vsel %vm183_vm6, %v178_v12, %v180_v9 }
  0xa9   :  { %v310_v15 = vmul.f32 %v3869_v8, %v185_v13  ;;  %v3945_v13 = vld [vmem:[%s6186_s25 + $0x110] sm:$0xff] }
  0xaa   :  { %6194 = vst [vmem:[#allocation10_spill] sm:$0xff] %v3945_v13 }
  0xab   :  { %v165_v16 = vpop.permute.xlu1 %164  ;;  %v159_v18 = vpop.permute.xlu0 %158  ;;  %v331_v19 = vpack.c.bf16 %v310_v15, %v306_v14 }
  0xac   :  { %v167_v21 = vsel %vm166_vm5, %v163_v2, %v165_v16  ;;  %v169_v31 = vsel %vm166_vm5, %v159_v18, %v161_v3  ;;  %v170_v32 = vsel %vm166_vm5, %v165_v16, %v159_v18 }
  0xad   :  { %367 = vmatprep.subr.bf16.mxu0 %v331_v19  ;;  %v307_v1 = vmul.f32 %v3878_v20, %v167_v21  ;;  %v305_v44 = vmul.f32 %v3885_v26, %v169_v31  ;;  %v308_v50 = vmul.f32 %v3890_v30, %v170_v32 }
  0xaf   :  { %v182_v42 = vpop.permute.xlu1 %181  ;;  %v176_v43 = vpop.permute.xlu0 %175 }
  0xb0   :  { %v184_v45 = vsel %vm183_vm6, %v180_v9, %v182_v42  ;;  %v186_v47 = vsel %vm183_vm6, %v176_v43, %v178_v12  ;;  %v187_v49 = vsel %vm183_vm6, %v182_v42, %v176_v43  ;;  %v3935_v9 = vld [vmem:[%s6186_s25 + $0x118] sm:$0xff]  ;;  %v3940_v12 = vld [vmem:[%s6186_s25 + $0x108] sm:$0xff] }
  0xb1   :  { %v311_v51 = vmul.f32 %v3899_v33, %v184_v45  ;;  %v309_v52 = vmul.f32 %v3904_v34, %v186_v47  ;;  %v312_v53 = vmul.f32 %v3909_v35, %v187_v49  ;;  %6192 = vst [vmem:[#allocation8_spill] sm:$0xff] %v3935_v9  ;;  %6193 = vst [vmem:[#allocation9_spill] sm:$0xff] %v3940_v12  ;;  %v317_v49 = vld [vmem:[%s6195_s24] sm:$0xf] }
  0xb3   :  { %v195_v0 = vpop.permute.xlu1 %194  ;;  %v193_v2 = vpop.permute.xlu0 %192  ;;  %v330_v3 = vpack.c.bf16 %v309_v52, %v305_v44  ;;  %v333_v55 = vpack.c.bf16 %v312_v53, %v308_v50  ;;  %v332_v56 = vpack.c.bf16 %v311_v51, %v307_v1 }
  0xb4   :  { %v203_v58 = vsel %vm200_vm7, %v193_v2, %v195_v0 }
  0xb5   :  { %368 = vmatpush1.bf16.msra.mxu0 %v330_v3  ;;  %408 = vmatprep.subr.bf16.mxu1 %v333_v55  ;;  %v313_v62 = vmul.f32 %v3927_v54, %v203_v58 }
  0xb6   :  { %409 = vmatpush1.bf16.msra.mxu1 %v332_v56 }
  0xb7   :  { %v199_v14 = vpop.permute.xlu1 %198  ;;  %v197_v15 = vpop.permute.xlu0 %196  ;;  %v334_v32 = vpack.c.bf16 %v313_v62, %v313_v62 }
  0xb8   :  { %v204_v16 = vsel %vm200_vm7, %v199_v14, %v193_v2  ;;  %v201_v18 = vsel %vm200_vm7, %v197_v15, %v199_v14  ;;  %v202_v19 = vsel %vm200_vm7, %v195_v0, %v197_v15 }
  0xb9   :  { %v316_v21 = vmul.f32 %v3935_v9, %v204_v16  ;;  %v314_v31 = vmul.f32 %v3940_v12, %v202_v19  ;;  %v315_v1 = vmul.f32 %v3945_v13, %v201_v18  ;;  %v350_v45 = vsel %vm348_vm8, %v334_v32, 0 }
  0xbb   :  { %v337_v42 = vpack.c.bf16 %v316_v21, %v316_v21  ;;  %v335_v43 = vpack.c.bf16 %v314_v31, %v314_v31  ;;  %v336_v44 = vpack.c.bf16 %v315_v1, %v315_v1 }
  0xbd   :  { %3407 = vmatprep.subr.msk.bf16.mxu0 %vm348_vm8, %v335_v43  ;;  %3409 = vmatprep.subr.msk.bf16.mxu1 %vm348_vm8, %v337_v42  ;;  %v356_v47 = vsel %vm348_vm8, %v336_v44, 0 }
  0xbe   :  { %370 = vmatpush1.bf16.msra.mxu0 %v350_v45  ;;  %411 = vmatpush1.bf16.msra.mxu1 %v356_v47 }
  0xc1   :  { %3408 = vmatmul.mubr.msk.bf16.vlgmr.msra.gmra.mrb[0].mxu0 %vm344_vm9, %v317_v49  ;;  %3410 = vmatmul.mubr.msk.bf16.vlgmr.msra.gmra.mrb[0].mxu1 %vm344_vm9, %v317_v49 }
  0xc2   :  { %751 = vmatprep.mubr.bf16.mxu0 %v6161_v4  ;;  %792 = vmatprep.mubr.bf16.mxu1 %v6161_v4 }
  0xc8   :  { %v342_v50 = vpop.permute.xlu0 %341 }
 0x194   :  { %v436_v51 = vpop.f32.mrb[0].mxu1  ;;  %v395_v52 = vpop.f32.mrb[0].mxu0 }
 0x195   :  { %v3967_v53 = vadd.f32 %v395_v52, %v342_v50  ;;  %v397_v0 = vpop.f32.mrb[1].mxu0  ;;  %v438_v2 = vpop.f32.mrb[1].mxu1  ;;  %v3973_v62 = vadd.f32 %v436_v51, %v342_v50 }
 0x196   :  { %v399_v3 = vpop.f32.mrb[2].mxu0  ;;  %v440_v55 = vpop.f32.mrb[2].mxu1  ;;  %v3999_v14 = vadd.f32 %v397_v0, %v342_v50  ;;  %v4005_v15 = vadd.f32 %v438_v2, %v342_v50 }
 0x197   :  { %v400_v56 = vpop.f32.mrb[3].mxu0  ;;  %459 = vrot.lane.b32.xlu0 %v3967_v53, %s3462_s21  ;;  %443 = vrot.lane.b32.xlu1 %v3967_v53, %s3463_s4  ;;  %v441_v58 = vpop.f32.mrb[3].mxu1 }
 0x19b   :  { %447 = vrot.lane.b32.xlu0 %v3973_v62, %s3463_s4  ;;  %463 = vrot.lane.b32.xlu1 %v3973_v62, %s3462_s21 }
 0x19f   :  { %475 = vrot.lane.b32.xlu0 %v3967_v53, %s3464_s26  ;;  %495 = vrot.lane.b32.xlu1 %v3973_v62, %s3465_s27 }
 0x1a3   :  { %491 = vrot.lane.b32.xlu0 %v3967_v53, %s3465_s27  ;;  %515 = vrot.lane.b32.xlu1 %v3973_v62, %s3466_s28 }
 0x1a7   :  { %479 = vrot.lane.b32.xlu0 %v3973_v62, %s3464_s26  ;;  %531 = vrot.lane.b32.xlu1 %v3973_v62, %s3467_s29 }
 0x1ab   :  { %511 = vrot.lane.b32.xlu0 %v3967_v53, %s3466_s28  ;;  %547 = vrot.lane.b32.xlu1 %v3973_v62, %s6196_s3 }
 0x1af   :  { %527 = vrot.lane.b32.xlu0 %v3967_v53, %s3467_s29  ;;  %543 = vrot.lane.b32.xlu1 %v3967_v53, %s6196_s3 }
 0x1b3   :  { %559 = vrot.lane.b32.xlu0 %v3967_v53, %s6197_s30  ;;  %445 = vrot.lane.b32.xlu1 %v3999_v14, %s3463_s4 }
 0x1b7   :  { %449 = vrot.lane.b32.xlu0 %v4005_v15, %s3463_s4  ;;  %461 = vrot.lane.b32.xlu1 %v3999_v14, %s3462_s21 }
 0x1bb   :  { %481 = vrot.lane.b32.xlu0 %v4005_v15, %s3464_s26  ;;  %465 = vrot.lane.b32.xlu1 %v4005_v15, %s3462_s21 }
 0x1bf   :  { %513 = vrot.lane.b32.xlu0 %v3999_v14, %s3466_s28  ;;  %477 = vrot.lane.b32.xlu1 %v3999_v14, %s3464_s26 }
 0x1c3   :  { %529 = vrot.lane.b32.xlu0 %v3999_v14, %s3467_s29  ;;  %493 = vrot.lane.b32.xlu1 %v3999_v14, %s3465_s27 }
 0x1c7   :  { %545 = vrot.lane.b32.xlu0 %v3999_v14, %s6196_s3  ;;  %497 = vrot.lane.b32.xlu1 %v4005_v15, %s3465_s27 }
 0x1cb   :  { %533 = vrot.lane.b32.xlu0 %v4005_v15, %s3467_s29  ;;  %517 = vrot.lane.b32.xlu1 %v4005_v15, %s3466_s28 }
 0x1cf   :  { %563 = vrot.lane.b32.xlu0 %v3973_v62, %s6197_s30  ;;  %549 = vrot.lane.b32.xlu1 %v4005_v15, %s6196_s3 }
 0x1d3   :  { %561 = vrot.lane.b32.xlu1 %v3999_v14, %s6197_s30 }
 0x1d7   :  { %565 = vrot.lane.b32.xlu1 %v4005_v15, %s6197_s30 }
 0x209   :  { %v460_v16 = vpop.permute.xlu0 %459  ;;  %v444_v18 = vpop.permute.xlu1 %443 }
 0x20d   :  { %v448_v19 = vpop.permute.xlu0 %447  ;;  %v464_v21 = vpop.permute.xlu1 %463 }
 0x211   :  { %v476_v31 = vpop.permute.xlu0 %475  ;;  %v4039_v32 = vpop.permute.xlu1 %495 }
 0x215   :  { %v4041_v1 = vpop.permute.xlu0 %491  ;;  %v4043_v42 = vpop.permute.xlu1 %515 }
 0x219   :  { %v480_v43 = vpop.permute.xlu0 %479  ;;  %v4045_v44 = vpop.permute.xlu1 %531 }
 0x21d   :  { %v4047_v45 = vpop.permute.xlu0 %511  ;;  %v4049_v47 = vpop.permute.xlu1 %547 }
 0x221   :  { %v4051_v49 = vpop.permute.xlu0 %527  ;;  %v4053_v50 = vpop.permute.xlu1 %543 }
 0x225   :  { %v4055_v51 = vpop.permute.xlu0 %559  ;;  %v446_v52 = vpop.permute.xlu1 %445 }
 0x226   :  { %6198 = vst [vmem:[#allocation11_spill] sm:$0xff] %v4055_v51  ;;  %v453_v0 = vsel %vm77_vm0, %v444_v18, %v446_v52  ;;  %v452_v35 = vsel %vm77_vm0, %v446_v52, %v448_v19 }
 0x227   :  { %v648_v56 = vmul.f32 %v453_v0, %v3669_v10 }
 0x229   :  { %v450_v2 = vpop.permute.xlu0 %449  ;;  %v462_v3 = vpop.permute.xlu1 %461 }
 0x22a   :  { %v469_v55 = vsel %vm94_vm1, %v460_v16, %v462_v3  ;;  %v454_v58 = vsel %vm77_vm0, %v450_v2, %v444_v18  ;;  %v451_v9 = vsel %vm77_vm0, %v448_v19, %v450_v2  ;;  %v468_v13 = vsel %vm94_vm1, %v462_v3, %v464_v21 }
 0x22b   :  { %v652_v4 = vmul.f32 %v469_v55, %v3674_v11  ;;  %v647_v33 = vmul.f32 %v454_v58, %v3687_v22  ;;  %v650_v55 = vmul.f32 %v451_v9, %v3699_v25  ;;  %v653_v2 = vmul.f32 %v468_v13, %v3716_v29 }
 0x22d   :  { %v482_v12 = vpop.permute.xlu0 %481  ;;  %v466_v54 = vpop.permute.xlu1 %465  ;;  %v685_v51 = vpack.c.bf16 %v652_v4, %v648_v56  ;;  %v649_v4 = vmul.f32 %v452_v35, %v3711_v28 }
 0x22e   :  { %v467_v0 = vsel %vm94_vm1, %v464_v21, %v466_v54  ;;  %v470_v18 = vsel %vm94_vm1, %v466_v54, %v460_v16  ;;  %v486_v35 = vsel %vm111_vm2, %v482_v12, %v476_v31 }
 0x22f   :  { %v651_v3 = vmul.f32 %v470_v18, %v3692_v23  ;;  %v654_v11 = vmul.f32 %v467_v0, %v3706_v27  ;;  %719 = vmatprep.subr.bf16.mxu0 %v685_v51  ;;  %v686_v22 = vpack.c.bf16 %v653_v2, %v649_v4  ;;  %v663_v0 = vmul.f32 %v3967_v53, %v3814_v36 }
 0x230   :  { %v664_v4 = vmul.f32 %v3999_v14, %v3796_v17 }
 0x231   :  { %v684_v19 = vpack.c.bf16 %v651_v3, %v647_v33  ;;  %v514_v52 = vpop.permute.xlu0 %513  ;;  %v478_v56 = vpop.permute.xlu1 %477  ;;  %v687_v58 = vpack.c.bf16 %v654_v11, %v650_v55  ;;  %v483_v11 = vsel %vm111_vm2, %v480_v43, %v482_v12  ;;  %v665_v55 = vmul.f32 %v3973_v62, %v3824_v38 }
 0x232   :  { %v485_v54 = vsel %vm111_vm2, %v476_v31, %v478_v56  ;;  %v520_v9 = vsel %vm149_vm4, %v514_v52, %v4043_v42  ;;  %v521_v12 = vsel %vm149_vm4, %v4047_v45, %v514_v52 }
 0x233   :  { %720 = vmatpush1.bf16.msra.mxu0 %v684_v19  ;;  %760 = vmatprep.subr.bf16.mxu1 %v687_v58  ;;  %v656_v21 = vmul.f32 %v485_v54, %v3735_v46  ;;  %v484_v46 = vsel %vm111_vm2, %v478_v56, %v480_v43  ;;  %v655_v19 = vmul.f32 %v486_v35, %v3751_v57 }
 0x234   :  { %761 = vmatpush1.bf16.msra.mxu1 %v686_v22  ;;  %v668_v22 = vmul.f32 %v520_v9, %v3805_v24  ;;  %v658_v58 = vmul.f32 %v483_v11, %v3763_v60  ;;  %v667_v60 = vmul.f32 %v521_v12, %v3835_v40  ;;  %v657_v9 = vmul.f32 %v484_v46, %v3758_v59 }
 0x235   :  { %v530_v13 = vpop.permute.xlu0 %529  ;;  %v494_v16 = vpop.permute.xlu1 %493 }
 0x236   :  { %v501_v33 = vsel %vm128_vm3, %v4041_v1, %v494_v16  ;;  %v500_v18 = vsel %vm128_vm3, %v494_v16, %v4039_v32  ;;  %v666_v16 = vmul.f32 %v4005_v15, %v3819_v37 }
 0x237   :  { %v660_v51 = vmul.f32 %v501_v33, %v3742_v48  ;;  %v661_v43 = vmul.f32 %v500_v18, %v3777_v5  ;;  %v537_v33 = vsel %vm166_vm5, %v4051_v49, %v530_v13 }
 0x239   :  { %v546_v31 = vpop.permute.xlu0 %545  ;;  %v498_v2 = vpop.permute.xlu1 %497  ;;  %v689_v3 = vpack.c.bf16 %v660_v51, %v656_v21  ;;  %v690_v12 = vpack.c.bf16 %v661_v43, %v657_v9 }
 0x23a   :  { %v499_v54 = vsel %vm128_vm3, %v4039_v32, %v498_v2  ;;  %v502_v52 = vsel %vm128_vm3, %v498_v2, %v4041_v1  ;;  %v552_v56 = vsel %vm183_vm6, %v546_v31, %v4049_v47  ;;  %v693_v32 = vpack.c.bf16 %v668_v22, %v664_v4 }
 0x23b   :  { %v659_v17 = vmul.f32 %v502_v52, %v3772_v63  ;;  %v662_v57 = vmul.f32 %v499_v54, %v3782_v6  ;;  %721 = vmatprep.subr.bf16.mxu0 %v689_v3  ;;  %v536_v1 = vsel %vm166_vm5, %v530_v13, %v4045_v44  ;;  %v553_v59 = vsel %vm183_vm6, %v4053_v50, %v546_v31  ;;  %v6199_v52 = vld [vmem:[#allocation5_spill] sm:$0xff] }
 0x23c   :  { %v676_v40 = vmul.f32 %v552_v56, %v3869_v8  ;;  %v692_v31 = vpack.c.bf16 %v667_v60, %v663_v0  ;;  %v672_v3 = vmul.f32 %v536_v1, %v3862_v61  ;;  %v675_v4 = vmul.f32 %v553_v59, %v3904_v34  ;;  %v6200_v56 = vld [vmem:[#allocation6_spill] sm:$0xff]  ;;  %v6203_v1 = vld [vmem:[#allocation9_spill] sm:$0xff] }
 0x23d   :  { %v688_v11 = vpack.c.bf16 %v659_v17, %v655_v19  ;;  %v534_v35 = vpop.permute.xlu0 %533  ;;  %v518_v21 = vpop.permute.xlu1 %517  ;;  %v691_v51 = vpack.c.bf16 %v662_v57, %v658_v58 }
 0x23e   :  { %v519_v22 = vsel %vm149_vm4, %v4043_v42, %v518_v21  ;;  %v522_v18 = vsel %vm149_vm4, %v518_v21, %v4047_v45  ;;  %v535_v13 = vsel %vm166_vm5, %v4045_v44, %v534_v35  ;;  %v538_v42 = vsel %vm166_vm5, %v534_v35, %v4051_v49 }
 0x23f   :  { %v669_v46 = vmul.f32 %v519_v22, %v3830_v39  ;;  %v670_v2 = vmul.f32 %v522_v18, %v3840_v41  ;;  %722 = vmatpush1.bf16.msra.mxu0 %v688_v11  ;;  %762 = vmatprep.subr.bf16.mxu1 %v691_v51  ;;  %v671_v45 = vmul.f32 %v537_v33, %v3885_v26  ;;  %v6205_v18 = vld [vmem:[#allocation8_spill] sm:$0xff] }
 0x240   :  { %723 = vmatprep.subr.bf16.mxu0 %v693_v32  ;;  %763 = vmatpush1.bf16.msra.mxu1 %v690_v12  ;;  %v673_v41 = vmul.f32 %v535_v13, %v3878_v20  ;;  %v697_v0 = vpack.c.bf16 %v676_v40, %v672_v3  ;;  %v674_v54 = vmul.f32 %v538_v42, %v3890_v30  ;;  %v6202_v32 = vld [vmem:[#allocation7_spill] sm:$0xff]  ;;  %v6204_v40 = vld [vmem:[#allocation10_spill] sm:$0xff]  ;;  %v6206_v42 = vmov 0  }
 0x241   :  { %v694_v19 = vpack.c.bf16 %v669_v46, %v665_v55  ;;  %v550_v44 = vpop.permute.xlu1 %549  ;;  %v695_v58 = vpack.c.bf16 %v670_v2, %v666_v16  ;;  %v696_v17 = vpack.c.bf16 %v675_v4, %v671_v45  ;;  %v564_v20 = vpop.permute.xlu0 %563  ;;  %v683_v46 = vld [vmem:[%s6139_s5] sm:$0xf] }
 0x242   :  { %v551_v61 = vsel %vm183_vm6, %v4049_v47, %v550_v44  ;;  %v554_v49 = vsel %vm183_vm6, %v550_v44, %v4053_v50  ;;  %v6201_v50 = vld [vmem:[#allocation11_spill] sm:$0xff] }
 0x243   :  { %v677_v43 = vmul.f32 %v551_v61, %v6199_v52  ;;  %v678_v55 = vmul.f32 %v554_v49, %v6200_v56  ;;  %724 = vmatpush1.bf16.msra.mxu0 %v692_v31  ;;  %764 = vmatprep.subr.bf16.mxu1 %v695_v58 }
 0x244   :  { %725 = vmatprep.subr.bf16.mxu0 %v697_v0  ;;  %765 = vmatpush1.bf16.msra.mxu1 %v694_v19 }
 0x245   :  { %v698_v57 = vpack.c.bf16 %v677_v43, %v673_v41  ;;  %v562_v60 = vpop.permute.xlu1 %561  ;;  %v699_v47 = vpack.c.bf16 %v678_v55, %v674_v54 }
 0x246   :  { %v568_v9 = vsel %vm200_vm7, %v562_v60, %v564_v20  ;;  %v569_v30 = vsel %vm200_vm7, %v6201_v50, %v562_v60 }
 0x247   :  { %v679_v16 = vmul.f32 %v569_v30, %v6202_v32  ;;  %v680_v33 = vmul.f32 %v568_v9, %v6203_v1  ;;  %726 = vmatpush1.bf16.msra.mxu0 %v696_v17  ;;  %766 = vmatprep.subr.bf16.mxu1 %v699_v47 }
 0x248   :  { %767 = vmatpush1.bf16.msra.mxu1 %v698_v57 }
 0x249   :  { %v700_v11 = vpack.c.bf16 %v679_v16, %v679_v16  ;;  %v701_v35 = vpack.c.bf16 %v680_v33, %v680_v33  ;;  %v566_v21 = vpop.permute.xlu1 %565 }
 0x24a   :  { %v567_v51 = vsel %vm200_vm7, %v564_v20, %v566_v21  ;;  %v570_v59 = vsel %vm200_vm7, %v566_v21, %v6201_v50 }
 0x24b   :  { %v681_v22 = vmul.f32 %v567_v51, %v6204_v40  ;;  %v682_v12 = vmul.f32 %v570_v59, %v6205_v18  ;;  %3411 = vmatprep.subr.msk.bf16.mxu0 %vm348_vm8, %v701_v35  ;;  %v708_v13 = vsel %vm348_vm8, %v700_v11, 0  ;;  %v4193_v59 = vld [vmem:[%s6140_s7] sm:$0xff] }
 0x24c   :  { %728 = vmatpush1.bf16.msra.mxu0 %v708_v13  ;;  %v4199_v13 = vld [vmem:[%s6141_s8] sm:$0xff] }
 0x24d   :  { %v702_v2 = vpack.c.bf16 %v681_v22, %v681_v22  ;;  %v703_v31 = vpack.c.bf16 %v682_v12, %v682_v12 }
 0x24f   :  { %3412 = vmatmul.mubr.msk.bf16.vlgmr.msra.gmra.mrb[4].mxu0 %vm344_vm9, %v683_v46  ;;  %3413 = vmatprep.subr.msk.bf16.mxu1 %vm348_vm8, %v703_v31  ;;  %v714_v3 = vsel %vm348_vm8, %v702_v2, 0 }
 0x250   :  { %769 = vmatpush1.bf16.msra.mxu1 %v714_v3  ;;  %1157 = vmatprep.mubr.bf16.mxu0 %v6206_v42 }
 0x253   :  { %3414 = vmatmul.mubr.msk.bf16.vlgmr.msra.gmra.mrb[4].mxu1 %vm344_vm9, %v683_v46 }
 0x254   :  { %1198 = vmatprep.mubr.bf16.mxu1 %v6206_v42 }
 0x322   :  { %v753_v45 = vpop.f32.mrb[4].mxu0 }
 0x323   :  { %v807_v4 = vmul.f32 %v753_v45, %v753_v45  ;;  %v755_v19 = vpop.f32.mrb[5].mxu0 }
 0x324   :  { %v801_v44 = vadd.f32 %v755_v19, %v753_v45  ;;  %v808_v58 = vmul.f32 %v755_v19, %v755_v19  ;;  %v757_v41 = vpop.f32.mrb[6].mxu0 }
 0x325   :  { %v758_v61 = vpop.f32.mrb[7].mxu0 }
 0x326   :  { %v794_v49 = vpop.f32.mrb[4].mxu1  ;;  %v811_v0 = vadd.f32 %v808_v58, %v807_v4 }
 0x327   :  { %v809_v54 = vmul.f32 %v794_v49, %v794_v49  ;;  %v796_v43 = vpop.f32.mrb[5].mxu1  ;;  %v802_v55 = vadd.f32 %v801_v44, %v794_v49 }
 0x328   :  { %v798_v17 = vpop.f32.mrb[6].mxu1  ;;  %v810_v20 = vmul.f32 %v796_v43, %v796_v43 }
 0x329   :  { %v799_v57 = vpop.f32.mrb[7].mxu1  ;;  %v803_v60 = vadd.f32 %v802_v55, %v796_v43  ;;  %v812_v47 = vadd.f32 %v811_v0, %v809_v54 }
 0x32b   :  { %804 = vadd.xlane.f32.xlu0 %v803_v60  ;;  %v813_v9 = vadd.f32 %v812_v47, %v810_v20 }
 0x32d   :  { %814 = vadd.xlane.f32.xlu1 %v813_v9 }
 0x3b8   :  { %v805_v50 = vpop.xlane.xlu0 %804 }
 0x3b9   :  { %v806_v30 = vmul.f32 0.001953125, %v805_v50 }
 0x3ba   :  { %v815_v16 = vpop.xlane.xlu1 %814 }
 0x3bb   :  { %v817_v33 = vmul.f32 %v806_v30, %v806_v30  ;;  %v816_v11 = vmul.f32 0.001953125, %v815_v16 }
 0x3bd   :  { %v818_v35 = vsub.f32 %v816_v11, %v817_v33 }
 0x3bf   :  { %v819_v21 = vmax.f32 %v818_v35, 0.0 }
 0x3c1   :  { %v820_v51 = vadd.f32 1e-05, %v819_v21 }
 0x3c3   :  { %3454 = vrsqrt.f32 %v820_v51 }
 0x3cd   :  { %v3455_v22 = vpop.eup %3454 }
 0x3ce   :  { %v823_v12 = vmul.f32 %v3455_v22, %v4193_v59 }
 0x3d0   :  { %826 = vperm.xlu0 %3449, %v823_v12   ;;  %v834_v46 = vmul.f32 %v823_v12, %v806_v30  ;;  %v6207_v30 = vld [vmem:[#allocation3_spill] sm:$0xff]  ;;  %v6208_v12 = vld [vmem:[#allocation4_spill] sm:$0xff] }
 0x3d2   :  { %v835_v2 = vsub.f32 %v4199_v13, %v834_v46 }
 0x3d4   :  { %838 = vperm.xlu1 %3450, %v835_v2  }
 0x44f   :  { %v827_v31 = vpop.permute.xlu0 %826 }
 0x450   :  { %v829_v3 = vmul.f32 %v827_v31, %v753_v45  ;;  %v830_v4 = vmul.f32 %v827_v31, %v755_v19  ;;  %v832_v54 = vmul.f32 %v827_v31, %v796_v43  ;;  %v831_v17 = vmul.f32 %v827_v31, %v794_v49 }
 0x453   :  { %v839_v44 = vpop.permute.xlu1 %838 }
 0x454   :  { %v841_v58 = vadd.f32 %v839_v44, %v829_v3  ;;  %v842_v41 = vadd.f32 %v839_v44, %v830_v4  ;;  %v844_v55 = vadd.f32 %v839_v44, %v832_v54  ;;  %v843_v45 = vadd.f32 %v839_v44, %v831_v17 }
 0x456   :  { %v4202_v61 = vmax.f32 %v841_v58, 0.0  ;;  %v4204_v0 = vmax.f32 %v842_v41, 0.0  ;;  %v4214_v19 = vmax.f32 %v844_v55, 0.0  ;;  %v4220_v43 = vmax.f32 %v843_v45, 0.0 }
 0x458   :  { %851 = vrot.lane.b32.xlu1 %v4204_v0, %s3463_s4  ;;  %849 = vrot.lane.b32.xlu0 %v4202_v61, %s3463_s4 }
 0x45c   :  { %867 = vrot.lane.b32.xlu1 %v4204_v0, %s3462_s21  ;;  %865 = vrot.lane.b32.xlu0 %v4202_v61, %s3462_s21 }
 0x460   :  { %871 = vrot.lane.b32.xlu1 %v4214_v19, %s3462_s21  ;;  %855 = vrot.lane.b32.xlu0 %v4214_v19, %s3463_s4 }
 0x464   :  { %869 = vrot.lane.b32.xlu1 %v4220_v43, %s3462_s21  ;;  %853 = vrot.lane.b32.xlu0 %v4220_v43, %s3463_s4 }
 0x468   :  { %883 = vrot.lane.b32.xlu1 %v4204_v0, %s3464_s26  ;;  %881 = vrot.lane.b32.xlu0 %v4202_v61, %s3464_s26 }
 0x46c   :  { %899 = vrot.lane.b32.xlu1 %v4204_v0, %s3465_s27  ;;  %897 = vrot.lane.b32.xlu0 %v4202_v61, %s3465_s27 }
 0x470   :  { %903 = vrot.lane.b32.xlu1 %v4214_v19, %s3465_s27  ;;  %887 = vrot.lane.b32.xlu0 %v4214_v19, %s3464_s26 }
 0x474   :  { %901 = vrot.lane.b32.xlu1 %v4220_v43, %s3465_s27  ;;  %885 = vrot.lane.b32.xlu0 %v4220_v43, %s3464_s26 }
 0x478   :  { %921 = vrot.lane.b32.xlu1 %v4220_v43, %s3466_s28  ;;  %919 = vrot.lane.b32.xlu0 %v4204_v0, %s3466_s28 }
 0x47c   :  { %923 = vrot.lane.b32.xlu1 %v4214_v19, %s3466_s28  ;;  %917 = vrot.lane.b32.xlu0 %v4202_v61, %s3466_s28 }
 0x480   :  { %937 = vrot.lane.b32.xlu1 %v4220_v43, %s3467_s29  ;;  %935 = vrot.lane.b32.xlu0 %v4204_v0, %s3467_s29 }
 0x484   :  { %953 = vrot.lane.b32.xlu1 %v4220_v43, %s6196_s3  ;;  %951 = vrot.lane.b32.xlu0 %v4204_v0, %s6196_s3 }
 0x488   :  { %949 = vrot.lane.b32.xlu1 %v4202_v61, %s6196_s3  ;;  %933 = vrot.lane.b32.xlu0 %v4202_v61, %s3467_s29 }
 0x48c   :  { %955 = vrot.lane.b32.xlu1 %v4214_v19, %s6196_s3  ;;  %939 = vrot.lane.b32.xlu0 %v4214_v19, %s3467_s29 }
 0x490   :  { %967 = vrot.lane.b32.xlu1 %v4204_v0, %s6197_s30  ;;  %965 = vrot.lane.b32.xlu0 %v4202_v61, %s6197_s30 }
 0x494   :  { %971 = vrot.lane.b32.xlu1 %v4214_v19, %s6197_s30  ;;  %969 = vrot.lane.b32.xlu0 %v4220_v43, %s6197_s30 }
 0x4ca   :  { %v852_v49 = vpop.permute.xlu1 %851  ;;  %v850_v20 = vpop.permute.xlu0 %849 }
 0x4cb   :  { %v859_v57 = vsel %vm77_vm0, %v850_v20, %v852_v49 }
 0x4cc   :  { %v1054_v50 = vmul.f32 %v859_v57, %v3669_v10 }
 0x4ce   :  { %v868_v60 = vpop.permute.xlu1 %867  ;;  %v866_v47 = vpop.permute.xlu0 %865 }
 0x4cf   :  { %v875_v9 = vsel %vm94_vm1, %v866_v47, %v868_v60 }
 0x4d0   :  { %v1058_v16 = vmul.f32 %v875_v9, %v6207_v30  ;;  %v4312_v9 = vld [vmem:[%s6186_s25 + $0x40] sm:$0xff] }
 0x4d2   :  { %v872_v33 = vpop.permute.xlu1 %871  ;;  %v856_v11 = vpop.permute.xlu0 %855  ;;  %v1091_v35 = vpack.c.bf16 %v1058_v16, %v1054_v50 }
 0x4d3   :  { %v876_v21 = vsel %vm94_vm1, %v872_v33, %v866_v47  ;;  %v860_v51 = vsel %vm77_vm0, %v856_v11, %v850_v20 }
 0x4d4   :  { %v1057_v22 = vmul.f32 %v876_v21, %v3692_v23  ;;  %v1053_v46 = vmul.f32 %v860_v51, %v6208_v12  ;;  %1125 = vmatprep.subr.bf16.mxu0 %v1091_v35  ;;  %v4328_v51 = vld [vmem:[%s6186_s25 + $0x58] sm:$0xff] }
 0x4d6   :  { %v1090_v2 = vpack.c.bf16 %v1057_v22, %v1053_v46  ;;  %v870_v31 = vpop.permute.xlu1 %869  ;;  %v854_v3 = vpop.permute.xlu0 %853 }
 0x4d7   :  { %v873_v10 = vsel %vm94_vm1, %v870_v31, %v872_v33  ;;  %v874_v4 = vsel %vm94_vm1, %v868_v60, %v870_v31  ;;  %v857_v44 = vsel %vm77_vm0, %v854_v3, %v856_v11  ;;  %v858_v58 = vsel %vm77_vm0, %v852_v49, %v854_v3  ;;  %v4301_v60 = vld [vmem:[%s6186_s25 + $0x48] sm:$0xff] }
 0x4d8   :  { %v1059_v23 = vmul.f32 %v874_v4, %v3716_v29  ;;  %v1060_v41 = vmul.f32 %v873_v10, %v3706_v27  ;;  %v1055_v54 = vmul.f32 %v858_v58, %v3711_v28  ;;  %v1056_v55 = vmul.f32 %v857_v44, %v3699_v25  ;;  %1126 = vmatpush1.bf16.msra.mxu0 %v1090_v2 }
 0x4da   :  { %v1092_v17 = vpack.c.bf16 %v1059_v23, %v1055_v54  ;;  %v884_v45 = vpop.permute.xlu1 %883  ;;  %v882_v20 = vpop.permute.xlu0 %881  ;;  %v1093_v57 = vpack.c.bf16 %v1060_v41, %v1056_v55  ;;  %v4345_v23 = vld [vmem:[%s6186_s25 + $0x88] sm:$0xff] }
 0x4db   :  { %v891_v29 = vsel %vm111_vm2, %v882_v20, %v884_v45 }
 0x4dc   :  { %1166 = vmatprep.subr.bf16.mxu1 %v1093_v57  ;;  %v1062_v28 = vmul.f32 %v4301_v60, %v891_v29  ;;  %v4360_v57 = vld [vmem:[%s6186_s25 + $0xb8] sm:$0xff]  ;;  %v1071_v29 = vmul.f32 %v4220_v43, %v3824_v38  ;;  %v1072_v43 = vmul.f32 %v4214_v19, %v3819_v37 }
 0x4dd   :  { %1167 = vmatpush1.bf16.msra.mxu1 %v1092_v17 }
 0x4de   :  { %v900_v27 = vpop.permute.xlu1 %899  ;;  %v898_v49 = vpop.permute.xlu0 %897 }
 0x4df   :  { %v907_v25 = vsel %vm128_vm3, %v898_v49, %v900_v27 }
 0x4e0   :  { %v1066_v47 = vmul.f32 %v907_v25, %v3742_v48  ;;  %v4323_v48 = vld [vmem:[%s6186_s25 + $0x50] sm:$0xff] }
 0x4e2   :  { %v904_v50 = vpop.permute.xlu1 %903  ;;  %v888_v30 = vpop.permute.xlu0 %887  ;;  %v1095_v16 = vpack.c.bf16 %v1066_v47, %v1062_v28  ;;  %v1069_v47 = vmul.f32 %v4202_v61, %v3814_v36  ;;  %v4380_v36 = vld [vmem:[%s6186_s25 + $0xc8] sm:$0xff] }
 0x4e3   :  { %v908_v33 = vsel %vm128_vm3, %v904_v50, %v898_v49  ;;  %v892_v11 = vsel %vm111_vm2, %v888_v30, %v882_v20  ;;  %v4355_v20 = vld [vmem:[%s6186_s25 + $0xa0] sm:$0xff] }
 0x4e4   :  { %v1065_v35 = vmul.f32 %v908_v33, %v3772_v63  ;;  %v1061_v21 = vmul.f32 %v4312_v9, %v892_v11  ;;  %1127 = vmatprep.subr.bf16.mxu0 %v1095_v16 }
 0x4e6   :  { %v1094_v22 = vpack.c.bf16 %v1065_v35, %v1061_v21  ;;  %v902_v12 = vpop.permute.xlu1 %901  ;;  %v886_v46 = vpop.permute.xlu0 %885 }
 0x4e7   :  { %v905_v2 = vsel %vm128_vm3, %v902_v12, %v904_v50  ;;  %v906_v63 = vsel %vm128_vm3, %v900_v27, %v902_v12  ;;  %v889_v31 = vsel %vm111_vm2, %v886_v46, %v888_v30  ;;  %v890_v3 = vsel %vm111_vm2, %v884_v45, %v886_v46 }
 0x4e8   :  { %v1067_v10 = vmul.f32 %v906_v63, %v3777_v5  ;;  %v1068_v4 = vmul.f32 %v905_v2, %v3782_v6  ;;  %v1063_v44 = vmul.f32 %v4323_v48, %v890_v3  ;;  %v1064_v58 = vmul.f32 %v4328_v51, %v889_v31  ;;  %1128 = vmatpush1.bf16.msra.mxu0 %v1094_v22 }
 0x4e9   :  { %v1070_v6 = vmul.f32 %v4345_v23, %v4204_v0 }
 0x4ea   :  { %v1096_v41 = vpack.c.bf16 %v1067_v10, %v1063_v44  ;;  %v922_v54 = vpop.permute.xlu1 %921  ;;  %v920_v55 = vpop.permute.xlu0 %919  ;;  %v1097_v17 = vpack.c.bf16 %v1068_v4, %v1064_v58  ;;  %v4397_v44 = vld [vmem:[%s6186_s25 + $0xd0] sm:$0xff] }
 0x4eb   :  { %v926_v45 = vsel %vm149_vm4, %v920_v55, %v922_v54 }
 0x4ec   :  { %v1074_v5 = vmul.f32 %v926_v45, %v3805_v24  ;;  %1168 = vmatprep.subr.bf16.mxu1 %v1097_v17 }
 0x4ed   :  { %1169 = vmatpush1.bf16.msra.mxu1 %v1096_v41 }
 0x4ee   :  { %v924_v27 = vpop.permute.xlu1 %923  ;;  %v918_v24 = vpop.permute.xlu0 %917  ;;  %v1099_v49 = vpack.c.bf16 %v1074_v5, %v1070_v6 }
 0x4ef   :  { %v925_v0 = vsel %vm149_vm4, %v922_v54, %v924_v27  ;;  %v927_v25 = vsel %vm149_vm4, %v918_v24, %v920_v55  ;;  %v928_v28 = vsel %vm149_vm4, %v924_v27, %v918_v24 }
 0x4f0   :  { %v1075_v50 = vmul.f32 %v925_v0, %v3830_v39  ;;  %v1073_v30 = vmul.f32 %v4355_v20, %v927_v25  ;;  %v1076_v38 = vmul.f32 %v4360_v57, %v928_v28  ;;  %1129 = vmatprep.subr.bf16.mxu0 %v1099_v49 }
 0x4f2   :  { %v1100_v16 = vpack.c.bf16 %v1075_v50, %v1071_v29  ;;  %v1098_v33 = vpack.c.bf16 %v1073_v30, %v1069_v47  ;;  %v938_v11 = vpop.permute.xlu1 %937  ;;  %v936_v35 = vpop.permute.xlu0 %935  ;;  %v1101_v21 = vpack.c.bf16 %v1076_v38, %v1072_v43 }
 0x4f3   :  { %v942_v39 = vsel %vm166_vm5, %v936_v35, %v938_v11 }
 0x4f4   :  { %1130 = vmatpush1.bf16.msra.mxu0 %v1098_v33  ;;  %1170 = vmatprep.subr.bf16.mxu1 %v1101_v21  ;;  %v1078_v19 = vmul.f32 %v4380_v36, %v942_v39 }
 0x4f5   :  { %1171 = vmatpush1.bf16.msra.mxu1 %v1100_v16 }
 0x4f6   :  { %v954_v61 = vpop.permute.xlu1 %953  ;;  %v952_v22 = vpop.permute.xlu0 %951 }
 0x4f7   :  { %v958_v37 = vsel %vm183_vm6, %v952_v22, %v954_v61 }
 0x4f8   :  { %v1082_v12 = vmul.f32 %v958_v37, %v3869_v8  ;;  %v4402_v8 = vld [vmem:[%s6186_s25 + $0xd8] sm:$0xff] }
 0x4fa   :  { %v950_v46 = vpop.permute.xlu1 %949  ;;  %v934_v2 = vpop.permute.xlu0 %933  ;;  %v1103_v63 = vpack.c.bf16 %v1082_v12, %v1078_v19 }
 0x4fb   :  { %v959_v31 = vsel %vm183_vm6, %v950_v46, %v952_v22  ;;  %v943_v3 = vsel %vm166_vm5, %v934_v2, %v936_v35 }
 0x4fc   :  { %v1081_v10 = vmul.f32 %v959_v31, %v3904_v34  ;;  %v1077_v4 = vmul.f32 %v943_v3, %v3885_v26  ;;  %1131 = vmatprep.subr.bf16.mxu0 %v1103_v63 }
 0x4fe   :  { %v1102_v58 = vpack.c.bf16 %v1081_v10, %v1077_v4  ;;  %v956_v41 = vpop.permute.xlu1 %955  ;;  %v940_v54 = vpop.permute.xlu0 %939 }
 0x4ff   :  { %v957_v55 = vsel %vm183_vm6, %v954_v61, %v956_v41  ;;  %v960_v26 = vsel %vm183_vm6, %v956_v41, %v950_v46  ;;  %v941_v34 = vsel %vm166_vm5, %v938_v11, %v940_v54  ;;  %v944_v17 = vsel %vm166_vm5, %v940_v54, %v934_v2 }
 0x500   :  { %v1083_v45 = vmul.f32 %v957_v55, %v6199_v52  ;;  %v1084_v5 = vmul.f32 %v960_v26, %v6200_v56  ;;  %v1079_v6 = vmul.f32 %v4397_v44, %v941_v34  ;;  %v1080_v29 = vmul.f32 %v4402_v8, %v944_v17  ;;  %1132 = vmatpush1.bf16.msra.mxu0 %v1102_v58 }
 0x502   :  { %v1104_v27 = vpack.c.bf16 %v1083_v45, %v1079_v6  ;;  %v968_v24 = vpop.permute.xlu1 %967  ;;  %v966_v49 = vpop.permute.xlu0 %965  ;;  %v1105_v0 = vpack.c.bf16 %v1084_v5, %v1080_v29 }
 0x503   :  { %v975_v25 = vsel %vm200_vm7, %v966_v49, %v968_v24 }
 0x504   :  { %v1085_v28 = vmul.f32 %v975_v25, %v6202_v32  ;;  %1172 = vmatprep.subr.bf16.mxu1 %v1105_v0 }
 0x505   :  { %1173 = vmatpush1.bf16.msra.mxu1 %v1104_v27 }
 0x506   :  { %v972_v47 = vpop.permute.xlu1 %971  ;;  %v970_v52 = vpop.permute.xlu0 %969  ;;  %v1106_v38 = vpack.c.bf16 %v1085_v28, %v1085_v28 }
 0x507   :  { %v976_v56 = vsel %vm200_vm7, %v972_v47, %v966_v49  ;;  %v973_v50 = vsel %vm200_vm7, %v970_v52, %v972_v47  ;;  %v974_v30 = vsel %vm200_vm7, %v968_v24, %v970_v52 }
 0x508   :  { %v1088_v43 = vmul.f32 %v976_v56, %v6205_v18  ;;  %v1086_v16 = vmul.f32 %v974_v30, %v6203_v1  ;;  %v1087_v32 = vmul.f32 %v973_v50, %v6204_v40  ;;  %v1114_v21 = vsel %vm348_vm8, %v1106_v38, 0  ;;  %v1089_v18 = vld [vmem:[%s6142_s6] sm:$0xf] }
 0x50a   :  { %v1109_v33 = vpack.c.bf16 %v1088_v43, %v1088_v43  ;;  %v1107_v11 = vpack.c.bf16 %v1086_v16, %v1086_v16  ;;  %v1108_v35 = vpack.c.bf16 %v1087_v32, %v1087_v32 }
 0x50c   :  { %3415 = vmatprep.subr.msk.bf16.mxu0 %vm348_vm8, %v1107_v11  ;;  %3417 = vmatprep.subr.msk.bf16.mxu1 %vm348_vm8, %v1109_v33  ;;  %v1120_v39 = vsel %vm348_vm8, %v1108_v35, 0 }
 0x50d   :  { %1134 = vmatpush1.bf16.msra.mxu0 %v1114_v21  ;;  %1175 = vmatpush1.bf16.msra.mxu1 %v1120_v39  ;;  %v4520_v39 = vld [vmem:[%s6186_s25 + $0x8] sm:$0xff] }
 0x510   :  { %3416 = vmatmul.mubr.msk.bf16.vlgmr.msra.gmra.mrb[8].mxu0 %vm344_vm9, %v1089_v18  ;;  %3418 = vmatmul.mubr.msk.bf16.vlgmr.msra.gmra.mrb[8].mxu1 %vm344_vm9, %v1089_v18 }
 0x511   :  { %1563 = vmatprep.mubr.bf16.mxu0 %v6206_v42  ;;  %1604 = vmatprep.mubr.bf16.mxu1 %v6206_v42 }
 0x5e3   :  { %v1159_v1 = vpop.f32.mrb[8].mxu0  ;;  %v1200_v40 = vpop.f32.mrb[8].mxu1 }
 0x5e4   :  { %v1213_v61 = vmul.f32 %v1159_v1, %v1159_v1  ;;  %v1161_v22 = vpop.f32.mrb[9].mxu0  ;;  %v1202_v37 = vpop.f32.mrb[9].mxu1  ;;  %v1215_v19 = vmul.f32 %v1200_v40, %v1200_v40 }
 0x5e5   :  { %v1207_v12 = vadd.f32 %v1161_v22, %v1159_v1  ;;  %v1214_v46 = vmul.f32 %v1161_v22, %v1161_v22  ;;  %v1163_v2 = vpop.f32.mrb[10].mxu0  ;;  %v1204_v63 = vpop.f32.mrb[10].mxu1  ;;  %v1216_v41 = vmul.f32 %v1202_v37, %v1202_v37 }
 0x5e6   :  { %v1164_v31 = vpop.f32.mrb[11].mxu0  ;;  %v1205_v3 = vpop.f32.mrb[11].mxu1 }
 0x5e7   :  { %v1217_v10 = vadd.f32 %v1214_v46, %v1213_v61  ;;  %v1208_v4 = vadd.f32 %v1207_v12, %v1200_v40  ;;  %v4536_v12 = vld [vmem:[%s6186_s25 + $0x20] sm:$0xff] }
 0x5e8   :  { %v4541_v46 = vld [vmem:[%s6186_s25] sm:$0xff] }
 0x5e9   :  { %v1209_v58 = vadd.f32 %v1208_v4, %v1202_v37  ;;  %v1218_v54 = vadd.f32 %v1217_v10, %v1215_v19 }
 0x5eb   :  { %1210 = vadd.xlane.f32.xlu0 %v1209_v58  ;;  %v1219_v55 = vadd.f32 %v1218_v54, %v1216_v41  ;;  %v4552_v41 = vld [vmem:[%s6186_s25 + $0x30] sm:$0xff]  ;;  %v4557_v54 = vld [vmem:[%s6186_s25 + $0x38] sm:$0xff] }
 0x5ed   :  { %1220 = vadd.xlane.f32.xlu1 %v1219_v55  ;;  %v4562_v55 = vld [vmem:[%s6186_s25 + $0x10] sm:$0xff] }
 0x678   :  { %v1211_v26 = vpop.xlane.xlu0 %1210 }
 0x679   :  { %v1212_v34 = vmul.f32 0.001953125, %v1211_v26  ;;  %v4567_v26 = vld [vmem:[%s6186_s25 + $0x18] sm:$0xff] }
 0x67a   :  { %v1221_v17 = vpop.xlane.xlu1 %1220 }
 0x67b   :  { %v1223_v45 = vmul.f32 %v1212_v34, %v1212_v34  ;;  %v1222_v5 = vmul.f32 0.001953125, %v1221_v17 }
 0x67d   :  { %v1224_v6 = vsub.f32 %v1222_v5, %v1223_v45 }
 0x67f   :  { %v1225_v29 = vmax.f32 %v1224_v6, 0.0 }
 0x681   :  { %v1226_v27 = vadd.f32 1e-05, %v1225_v29 }
 0x683   :  { %3456 = vrsqrt.f32 %v1226_v27 }
 0x68d   :  { %v3457_v24 = vpop.eup %3456 }
 0x68e   :  { %v1229_v49 = vmul.f32 %v3457_v24, %v4193_v59 }
 0x690   :  { %1232 = vperm.xlu0 %3449, %v1229_v49   ;;  %v1240_v0 = vmul.f32 %v1229_v49, %v1212_v34 }
 0x692   :  { %v1241_v25 = vsub.f32 %v4199_v13, %v1240_v0 }
 0x694   :  { %1244 = vperm.xlu1 %3450, %v1241_v25  }
 0x70f   :  { %v1233_v28 = vpop.permute.xlu0 %1232 }
 0x710   :  { %v1235_v47 = vmul.f32 %v1233_v28, %v1159_v1  ;;  %v1236_v52 = vmul.f32 %v1233_v28, %v1161_v22  ;;  %v1238_v16 = vmul.f32 %v1233_v28, %v1202_v37  ;;  %v1237_v13 = vmul.f32 %v1233_v28, %v1200_v40  ;;  %v4527_v1 = vld [vmem:[%s6186_s25 + $0x28] sm:$0xff] }
 0x713   :  { %v1245_v56 = vpop.permute.xlu1 %1244 }
 0x714   :  { %v1247_v50 = vadd.f32 %v1245_v56, %v1235_v47  ;;  %v1248_v30 = vadd.f32 %v1245_v56, %v1236_v52  ;;  %v1250_v59 = vadd.f32 %v1245_v56, %v1238_v16  ;;  %v1249_v32 = vadd.f32 %v1245_v56, %v1237_v13 }
 0x716   :  { %v4442_v38 = vadd.f32 %v1247_v50, %v3967_v53  ;;  %v4445_v43 = vadd.f32 %v1248_v30, %v3999_v14  ;;  %v4456_v33 = vadd.f32 %v1250_v59, %v4005_v15  ;;  %v4463_v11 = vadd.f32 %v1249_v32, %v3973_v62  ;;  %v4586_v30 = vld [vmem:[%s6186_s25 + $0x68] sm:$0xff] }
 0x718   :  { %1257 = vrot.lane.b32.xlu1 %v4445_v43, %s3463_s4  ;;  %1255 = vrot.lane.b32.xlu0 %v4442_v38, %s3463_s4 }
 0x71c   :  { %1273 = vrot.lane.b32.xlu1 %v4445_v43, %s3462_s21  ;;  %1271 = vrot.lane.b32.xlu0 %v4442_v38, %s3462_s21 }
 0x720   :  { %1277 = vrot.lane.b32.xlu1 %v4456_v33, %s3462_s21  ;;  %1261 = vrot.lane.b32.xlu0 %v4456_v33, %s3463_s4 }
 0x724   :  { %1275 = vrot.lane.b32.xlu1 %v4463_v11, %s3462_s21  ;;  %1259 = vrot.lane.b32.xlu0 %v4463_v11, %s3463_s4 }
 0x728   :  { %1289 = vrot.lane.b32.xlu1 %v4445_v43, %s3464_s26  ;;  %1287 = vrot.lane.b32.xlu0 %v4442_v38, %s3464_s26 }
 0x72c   :  { %1305 = vrot.lane.b32.xlu1 %v4445_v43, %s3465_s27  ;;  %1303 = vrot.lane.b32.xlu0 %v4442_v38, %s3465_s27 }
 0x730   :  { %1309 = vrot.lane.b32.xlu1 %v4456_v33, %s3465_s27  ;;  %1293 = vrot.lane.b32.xlu0 %v4456_v33, %s3464_s26 }
 0x734   :  { %1307 = vrot.lane.b32.xlu1 %v4463_v11, %s3465_s27  ;;  %1291 = vrot.lane.b32.xlu0 %v4463_v11, %s3464_s26 }
 0x738   :  { %1327 = vrot.lane.b32.xlu1 %v4463_v11, %s3466_s28  ;;  %1325 = vrot.lane.b32.xlu0 %v4445_v43, %s3466_s28 }
 0x73c   :  { %1329 = vrot.lane.b32.xlu1 %v4456_v33, %s3466_s28  ;;  %1323 = vrot.lane.b32.xlu0 %v4442_v38, %s3466_s28 }
 0x740   :  { %1343 = vrot.lane.b32.xlu1 %v4463_v11, %s3467_s29  ;;  %1341 = vrot.lane.b32.xlu0 %v4445_v43, %s3467_s29 }
 0x744   :  { %1359 = vrot.lane.b32.xlu1 %v4463_v11, %s6196_s3  ;;  %1357 = vrot.lane.b32.xlu0 %v4445_v43, %s6196_s3 }
 0x748   :  { %1355 = vrot.lane.b32.xlu1 %v4442_v38, %s6196_s3  ;;  %1339 = vrot.lane.b32.xlu0 %v4442_v38, %s3467_s29 }
 0x74c   :  { %1361 = vrot.lane.b32.xlu1 %v4456_v33, %s6196_s3  ;;  %1345 = vrot.lane.b32.xlu0 %v4456_v33, %s3467_s29 }
 0x750   :  { %1373 = vrot.lane.b32.xlu1 %v4445_v43, %s6197_s30  ;;  %1371 = vrot.lane.b32.xlu0 %v4442_v38, %s6197_s30 }
 0x754   :  { %1377 = vrot.lane.b32.xlu1 %v4456_v33, %s6197_s30  ;;  %1375 = vrot.lane.b32.xlu0 %v4463_v11, %s6197_s30 }
 0x78a   :  { %v1258_v35 = vpop.permute.xlu1 %1257  ;;  %v1256_v21 = vpop.permute.xlu0 %1255 }
 0x78b   :  { %v1265_v18 = vsel %vm77_vm0, %v1256_v21, %v1258_v35 }
 0x78c   :  { %v1460_v37 = vmul.f32 %v4520_v39, %v1265_v18 }
 0x78e   :  { %v1274_v40 = vpop.permute.xlu1 %1273  ;;  %v1272_v61 = vpop.permute.xlu0 %1271 }
 0x78f   :  { %v1281_v22 = vsel %vm94_vm1, %v1272_v61, %v1274_v40 }
 0x790   :  { %v1464_v19 = vmul.f32 %v4527_v1, %v1281_v22 }
 0x792   :  { %v1278_v2 = vpop.permute.xlu1 %1277  ;;  %v1262_v63 = vpop.permute.xlu0 %1261  ;;  %v1497_v31 = vpack.c.bf16 %v1464_v19, %v1460_v37 }
 0x793   :  { %v1282_v3 = vsel %vm94_vm1, %v1278_v2, %v1272_v61  ;;  %v1266_v10 = vsel %vm77_vm0, %v1262_v63, %v1256_v21  ;;  %v4595_v21 = vld [vmem:[%s6186_s25 + $0x60] sm:$0xff] }
 0x794   :  { %v1463_v4 = vmul.f32 %v4536_v12, %v1282_v3  ;;  %v1459_v58 = vmul.f32 %v4541_v46, %v1266_v10  ;;  %1531 = vmatprep.subr.bf16.mxu0 %v1497_v31 }
 0x796   :  { %v1496_v34 = vpack.c.bf16 %v1463_v4, %v1459_v58  ;;  %v1276_v17 = vpop.permute.xlu1 %1275  ;;  %v1260_v45 = vpop.permute.xlu0 %1259 }
 0x797   :  { %v1279_v5 = vsel %vm94_vm1, %v1276_v17, %v1278_v2  ;;  %v1280_v6 = vsel %vm94_vm1, %v1274_v40, %v1276_v17  ;;  %v1263_v29 = vsel %vm77_vm0, %v1260_v45, %v1262_v63  ;;  %v1264_v27 = vsel %vm77_vm0, %v1258_v35, %v1260_v45  ;;  %v4606_v2 = vld [vmem:[%s6186_s25 + $0x70] sm:$0xff]  ;;  %v4611_v63 = vld [vmem:[%s6186_s25 + $0x78] sm:$0xff] }
 0x798   :  { %v1465_v24 = vmul.f32 %v4552_v41, %v1280_v6  ;;  %v1466_v49 = vmul.f32 %v4557_v54, %v1279_v5  ;;  %v1461_v0 = vmul.f32 %v4562_v55, %v1264_v27  ;;  %v1462_v25 = vmul.f32 %v4567_v26, %v1263_v29  ;;  %1532 = vmatpush1.bf16.msra.mxu0 %v1496_v34  ;;  %v4628_v29 = vld [vmem:[%s6186_s25 + $0xa8] sm:$0xff] }
 0x79a   :  { %v1498_v28 = vpack.c.bf16 %v1465_v24, %v1461_v0  ;;  %v1290_v47 = vpop.permute.xlu1 %1289  ;;  %v1288_v52 = vpop.permute.xlu0 %1287  ;;  %v1499_v56 = vpack.c.bf16 %v1466_v49, %v1462_v25 }
 0x79b   :  { %v1297_v50 = vsel %vm111_vm2, %v1288_v52, %v1290_v47 }
 0x79c   :  { %1572 = vmatprep.subr.bf16.mxu1 %v1499_v56  ;;  %v1468_v32 = vmul.f32 %v1297_v50, %v4301_v60  ;;  %v4653_v56 = vld [vmem:[%s6186_s25 + $0x98] sm:$0xff] }
 0x79d   :  { %1573 = vmatpush1.bf16.msra.mxu1 %v1498_v28  ;;  %v4635_v28 = vld [vmem:[%s6186_s25 + $0x90] sm:$0xff] }
 0x79e   :  { %v1306_v16 = vpop.permute.xlu1 %1305  ;;  %v1304_v59 = vpop.permute.xlu0 %1303  ;;  %v1477_v50 = vmul.f32 %v4635_v28, %v4463_v11 }
 0x79f   :  { %v1313_v13 = vsel %vm128_vm3, %v1304_v59, %v1306_v16 }
 0x7a0   :  { %v1472_v35 = vmul.f32 %v4586_v30, %v1313_v13 }
 0x7a2   :  { %v1310_v18 = vpop.permute.xlu1 %1309  ;;  %v1294_v40 = vpop.permute.xlu0 %1293  ;;  %v1501_v61 = vpack.c.bf16 %v1472_v35, %v1468_v32 }
 0x7a3   :  { %v1314_v22 = vsel %vm128_vm3, %v1310_v18, %v1304_v59  ;;  %v1298_v37 = vsel %vm111_vm2, %v1294_v40, %v1288_v52  ;;  %v4648_v52 = vld [vmem:[%s6186_s25 + $0xb0] sm:$0xff] }
 0x7a4   :  { %v1471_v19 = vmul.f32 %v4595_v21, %v1314_v22  ;;  %v1467_v60 = vmul.f32 %v1298_v37, %v4312_v9  ;;  %1533 = vmatprep.subr.bf16.mxu0 %v1501_v61  ;;  %v1478_v37 = vmul.f32 %v4653_v56, %v4456_v33 }
 0x7a6   :  { %v1500_v31 = vpack.c.bf16 %v1471_v19, %v1467_v60  ;;  %v1308_v3 = vpop.permute.xlu1 %1307  ;;  %v1292_v10 = vpop.permute.xlu0 %1291 }
 0x7a7   :  { %v1311_v4 = vsel %vm128_vm3, %v1308_v3, %v1310_v18  ;;  %v1312_v9 = vsel %vm128_vm3, %v1306_v16, %v1308_v3  ;;  %v1295_v58 = vsel %vm111_vm2, %v1292_v10, %v1294_v40  ;;  %v1296_v34 = vsel %vm111_vm2, %v1290_v47, %v1292_v10 }
 0x7a8   :  { %v1473_v17 = vmul.f32 %v4606_v2, %v1312_v9  ;;  %v1474_v45 = vmul.f32 %v4611_v63, %v1311_v4  ;;  %v1469_v5 = vmul.f32 %v1296_v34, %v4323_v48  ;;  %v1470_v6 = vmul.f32 %v1295_v58, %v4328_v51  ;;  %1534 = vmatpush1.bf16.msra.mxu0 %v1500_v31  ;;  %v4641_v51 = vld [vmem:[%s6186_s25 + $0x80] sm:$0xff] }
 0x7a9   :  { %v1476_v47 = vmul.f32 %v4445_v43, %v4345_v23  ;;  %v1475_v18 = vmul.f32 %v4641_v51, %v4442_v38 }
 0x7aa   :  { %v1502_v27 = vpack.c.bf16 %v1473_v17, %v1469_v5  ;;  %v1328_v24 = vpop.permute.xlu1 %1327  ;;  %v1326_v49 = vpop.permute.xlu0 %1325  ;;  %v1503_v0 = vpack.c.bf16 %v1474_v45, %v1470_v6  ;;  %v4684_v45 = vld [vmem:[%s6186_s25 + $0xe0] sm:$0xff] }
 0x7ab   :  { %v1332_v25 = vsel %vm149_vm4, %v1326_v49, %v1328_v24  ;;  %v4689_v5 = vld [vmem:[%s6186_s25 + $0xc0] sm:$0xff] }
 0x7ac   :  { %v1480_v48 = vmul.f32 %v4628_v29, %v1332_v25  ;;  %1574 = vmatprep.subr.bf16.mxu1 %v1503_v0 }
 0x7ad   :  { %1575 = vmatpush1.bf16.msra.mxu1 %v1502_v27 }
 0x7ae   :  { %v1330_v16 = vpop.permute.xlu1 %1329  ;;  %v1324_v59 = vpop.permute.xlu0 %1323  ;;  %v1505_v13 = vpack.c.bf16 %v1480_v48, %v1476_v47  ;;  %v4700_v48 = vld [vmem:[%s6186_s25 + $0xf0] sm:$0xff]  ;;  %v4705_v47 = vld [vmem:[%s6186_s25 + $0xf8] sm:$0xff] }
 0x7af   :  { %v1331_v23 = vsel %vm149_vm4, %v1328_v24, %v1330_v16  ;;  %v1333_v32 = vsel %vm149_vm4, %v1324_v59, %v1326_v49  ;;  %v1334_v35 = vsel %vm149_vm4, %v1330_v16, %v1324_v59 }
 0x7b0   :  { %v1481_v40 = vmul.f32 %v4648_v52, %v1331_v23  ;;  %v1479_v61 = vmul.f32 %v1333_v32, %v4355_v20  ;;  %v1482_v22 = vmul.f32 %v1334_v35, %v4360_v57  ;;  %1535 = vmatprep.subr.bf16.mxu0 %v1505_v13  ;;  %v4675_v20 = vld [vmem:[%s6186_s25 + $0xe8] sm:$0xff] }
 0x7b2   :  { %v1506_v19 = vpack.c.bf16 %v1481_v40, %v1477_v50  ;;  %v1504_v60 = vpack.c.bf16 %v1479_v61, %v1475_v18  ;;  %v1344_v31 = vpop.permute.xlu1 %1343  ;;  %v1342_v3 = vpop.permute.xlu0 %1341  ;;  %v1507_v10 = vpack.c.bf16 %v1482_v22, %v1478_v37  ;;  %v4722_v37 = vld [vmem:[%s6186_s25 + $0x100] sm:$0xff] }
 0x7b3   :  { %v1348_v4 = vsel %vm166_vm5, %v1342_v3, %v1344_v31 }
 0x7b4   :  { %1536 = vmatpush1.bf16.msra.mxu0 %v1504_v60  ;;  %1576 = vmatprep.subr.bf16.mxu1 %v1507_v10  ;;  %v1484_v34 = vmul.f32 %v1348_v4, %v4380_v36 }
 0x7b5   :  { %1577 = vmatpush1.bf16.msra.mxu1 %v1506_v19 }
 0x7b6   :  { %v1360_v57 = vpop.permute.xlu1 %1359  ;;  %v1358_v9 = vpop.permute.xlu0 %1357 }
 0x7b7   :  { %v1364_v58 = vsel %vm183_vm6, %v1358_v9, %v1360_v57 }
 0x7b8   :  { %v1488_v17 = vmul.f32 %v4675_v20, %v1364_v58 }
 0x7ba   :  { %v1356_v6 = vpop.permute.xlu1 %1355  ;;  %v1340_v27 = vpop.permute.xlu0 %1339  ;;  %v1509_v24 = vpack.c.bf16 %v1488_v17, %v1484_v34 }
 0x7bb   :  { %v1365_v49 = vsel %vm183_vm6, %v1356_v6, %v1358_v9  ;;  %v1349_v36 = vsel %vm166_vm5, %v1340_v27, %v1342_v3 }
 0x7bc   :  { %v1487_v0 = vmul.f32 %v4684_v45, %v1365_v49  ;;  %v1483_v25 = vmul.f32 %v4689_v5, %v1349_v36  ;;  %1537 = vmatprep.subr.bf16.mxu0 %v1509_v24 }
 0x7be   :  { %v1508_v50 = vpack.c.bf16 %v1487_v0, %v1483_v25  ;;  %v1362_v16 = vpop.permute.xlu1 %1361  ;;  %v1346_v59 = vpop.permute.xlu0 %1345 }
 0x7bf   :  { %v1363_v13 = vsel %vm183_vm6, %v1360_v57, %v1362_v16  ;;  %v1366_v23 = vsel %vm183_vm6, %v1362_v16, %v1356_v6  ;;  %v1347_v32 = vsel %vm166_vm5, %v1344_v31, %v1346_v59  ;;  %v1350_v35 = vsel %vm166_vm5, %v1346_v59, %v1340_v27  ;;  %v4740_v57 = vld [vmem:[%s6186_s25 + $0x110] sm:$0xff] }
 0x7c0   :  { %v1489_v18 = vmul.f32 %v4700_v48, %v1363_v13  ;;  %v1490_v40 = vmul.f32 %v4705_v47, %v1366_v23  ;;  %v1485_v61 = vmul.f32 %v1347_v32, %v4397_v44  ;;  %v1486_v22 = vmul.f32 %v1350_v35, %v4402_v8  ;;  %1538 = vmatpush1.bf16.msra.mxu0 %v1508_v50  ;;  %v4730_v44 = vld [vmem:[%s6186_s25 + $0x118] sm:$0xff]  ;;  %v4735_v8 = vld [vmem:[%s6186_s25 + $0x108] sm:$0xff]  ;;  %v1495_v13 = vld [vmem:[%s6143_s9] sm:$0xf] }
 0x7c2   :  { %v1510_v19 = vpack.c.bf16 %v1489_v18, %v1485_v61  ;;  %v1374_v60 = vpop.permute.xlu1 %1373  ;;  %v1372_v31 = vpop.permute.xlu0 %1371  ;;  %v1511_v3 = vpack.c.bf16 %v1490_v40, %v1486_v22 }
 0x7c3   :  { %v1381_v10 = vsel %vm200_vm7, %v1372_v31, %v1374_v60 }
 0x7c4   :  { %v1491_v4 = vmul.f32 %v4722_v37, %v1381_v10  ;;  %1578 = vmatprep.subr.bf16.mxu1 %v1511_v3 }
 0x7c5   :  { %1579 = vmatpush1.bf16.msra.mxu1 %v1510_v19 }
 0x7c6   :  { %v1378_v9 = vpop.permute.xlu1 %1377  ;;  %v1376_v58 = vpop.permute.xlu0 %1375  ;;  %v1512_v27 = vpack.c.bf16 %v1491_v4, %v1491_v4 }
 0x7c7   :  { %v1382_v34 = vsel %vm200_vm7, %v1378_v9, %v1372_v31  ;;  %v1379_v17 = vsel %vm200_vm7, %v1376_v58, %v1378_v9  ;;  %v1380_v6 = vsel %vm200_vm7, %v1374_v60, %v1376_v58 }
 0x7c8   :  { %v1494_v24 = vmul.f32 %v4730_v44, %v1382_v34  ;;  %v1492_v49 = vmul.f32 %v4735_v8, %v1380_v6  ;;  %v1493_v36 = vmul.f32 %v4740_v57, %v1379_v17  ;;  %v1520_v16 = vsel %vm348_vm8, %v1512_v27, 0 }
 0x7ca   :  { %v1515_v0 = vpack.c.bf16 %v1494_v24, %v1494_v24  ;;  %v1513_v25 = vpack.c.bf16 %v1492_v49, %v1492_v49  ;;  %v1514_v50 = vpack.c.bf16 %v1493_v36, %v1493_v36 }
 0x7cc   :  { %3419 = vmatprep.subr.msk.bf16.mxu0 %vm348_vm8, %v1513_v25  ;;  %3421 = vmatprep.subr.msk.bf16.mxu1 %vm348_vm8, %v1515_v0  ;;  %v1526_v59 = vsel %vm348_vm8, %v1514_v50, 0 }
 0x7cd   :  { %1540 = vmatpush1.bf16.msra.mxu0 %v1520_v16  ;;  %1581 = vmatpush1.bf16.msra.mxu1 %v1526_v59  ;;  %v4765_v59 = vld [vmem:[%s6144_s11] sm:$0xff] }
 0x7d0   :  { %3420 = vmatmul.mubr.msk.bf16.vlgmr.msra.gmra.mrb[12].mxu0 %vm344_vm9, %v1495_v13  ;;  %3422 = vmatmul.mubr.msk.bf16.vlgmr.msra.gmra.mrb[12].mxu1 %vm344_vm9, %v1495_v13 }
 0x7d1   :  { %1969 = vmatprep.mubr.bf16.mxu0 %v6206_v42  ;;  %2010 = vmatprep.mubr.bf16.mxu1 %v6206_v42 }
 0x8a3   :  { %v1565_v23 = vpop.f32.mrb[12].mxu0  ;;  %v1606_v32 = vpop.f32.mrb[12].mxu1 }
 0x8a4   :  { %v1619_v35 = vmul.f32 %v1565_v23, %v1565_v23  ;;  %v1567_v18 = vpop.f32.mrb[13].mxu0  ;;  %v1608_v40 = vpop.f32.mrb[13].mxu1  ;;  %v1621_v61 = vmul.f32 %v1606_v32, %v1606_v32 }
 0x8a5   :  { %v1613_v22 = vadd.f32 %v1567_v18, %v1565_v23  ;;  %v1620_v19 = vmul.f32 %v1567_v18, %v1567_v18  ;;  %v1569_v60 = vpop.f32.mrb[14].mxu0  ;;  %v1610_v31 = vpop.f32.mrb[14].mxu1  ;;  %v1622_v34 = vmul.f32 %v1608_v40, %v1608_v40 }
 0x8a6   :  { %v1570_v3 = vpop.f32.mrb[15].mxu0  ;;  %v1611_v10 = vpop.f32.mrb[15].mxu1 }
 0x8a7   :  { %v1623_v4 = vadd.f32 %v1620_v19, %v1619_v35  ;;  %v1614_v9 = vadd.f32 %v1613_v22, %v1606_v32 }
 0x8a9   :  { %v1615_v58 = vadd.f32 %v1614_v9, %v1608_v40  ;;  %v1624_v17 = vadd.f32 %v1623_v4, %v1621_v61  ;;  %v4771_v61 = vld [vmem:[%s6145_s12] sm:$0xff] }
 0x8ab   :  { %1616 = vadd.xlane.f32.xlu0 %v1615_v58  ;;  %v1625_v6 = vadd.f32 %v1624_v17, %v1622_v34 }
 0x8ad   :  { %1626 = vadd.xlane.f32.xlu1 %v1625_v6 }
 0x938   :  { %v1617_v27 = vpop.xlane.xlu0 %1616 }
 0x939   :  { %v1618_v24 = vmul.f32 0.001953125, %v1617_v27 }
 0x93a   :  { %v1627_v49 = vpop.xlane.xlu1 %1626 }
 0x93b   :  { %v1629_v36 = vmul.f32 %v1618_v24, %v1618_v24  ;;  %v1628_v0 = vmul.f32 0.001953125, %v1627_v49 }
 0x93d   :  { %v1630_v25 = vsub.f32 %v1628_v0, %v1629_v36 }
 0x93f   :  { %v1631_v50 = vmax.f32 %v1630_v25, 0.0 }
 0x941   :  { %v1632_v16 = vadd.f32 1e-05, %v1631_v50 }
 0x943   :  { %3458 = vrsqrt.f32 %v1632_v16 }
 0x94d   :  { %v3459_v13 = vpop.eup %3458 }
 0x94e   :  { %v1635_v35 = vmul.f32 %v3459_v13, %v4765_v59 }
 0x950   :  { %1638 = vperm.xlu0 %3449, %v1635_v35   ;;  %v1646_v22 = vmul.f32 %v1635_v35, %v1618_v24 }
 0x952   :  { %v1647_v19 = vsub.f32 %v4771_v61, %v1646_v22 }
 0x954   :  { %1650 = vperm.xlu1 %3450, %v1647_v19  }
 0x9cf   :  { %v1639_v60 = vpop.permute.xlu0 %1638 }
 0x9d0   :  { %v1641_v31 = vmul.f32 %v1639_v60, %v1565_v23  ;;  %v1642_v3 = vmul.f32 %v1639_v60, %v1567_v18  ;;  %v1644_v17 = vmul.f32 %v1639_v60, %v1608_v40  ;;  %v1643_v27 = vmul.f32 %v1639_v60, %v1606_v32 }
 0x9d3   :  { %v1651_v10 = vpop.permute.xlu1 %1650 }
 0x9d4   :  { %v1653_v4 = vadd.f32 %v1651_v10, %v1641_v31  ;;  %v1654_v9 = vadd.f32 %v1651_v10, %v1642_v3  ;;  %v1656_v6 = vadd.f32 %v1651_v10, %v1644_v17  ;;  %v1655_v23 = vadd.f32 %v1651_v10, %v1643_v27 }
 0x9d6   :  { %v4774_v58 = vmax.f32 %v1653_v4, 0.0  ;;  %v4776_v34 = vmax.f32 %v1654_v9, 0.0  ;;  %v4786_v18 = vmax.f32 %v1656_v6, 0.0  ;;  %v4792_v40 = vmax.f32 %v1655_v23, 0.0 }
 0x9d8   :  { %1663 = vrot.lane.b32.xlu1 %v4776_v34, %s3463_s4  ;;  %1661 = vrot.lane.b32.xlu0 %v4774_v58, %s3463_s4 }
 0x9dc   :  { %1679 = vrot.lane.b32.xlu1 %v4776_v34, %s3462_s21  ;;  %1677 = vrot.lane.b32.xlu0 %v4774_v58, %s3462_s21 }
 0x9e0   :  { %1683 = vrot.lane.b32.xlu1 %v4786_v18, %s3462_s21  ;;  %1667 = vrot.lane.b32.xlu0 %v4786_v18, %s3463_s4 }
 0x9e4   :  { %1681 = vrot.lane.b32.xlu1 %v4792_v40, %s3462_s21  ;;  %1665 = vrot.lane.b32.xlu0 %v4792_v40, %s3463_s4 }
 0x9e8   :  { %1695 = vrot.lane.b32.xlu1 %v4776_v34, %s3464_s26  ;;  %1693 = vrot.lane.b32.xlu0 %v4774_v58, %s3464_s26 }
 0x9ec   :  { %1711 = vrot.lane.b32.xlu1 %v4776_v34, %s3465_s27  ;;  %1709 = vrot.lane.b32.xlu0 %v4774_v58, %s3465_s27 }
 0x9f0   :  { %1715 = vrot.lane.b32.xlu1 %v4786_v18, %s3465_s27  ;;  %1699 = vrot.lane.b32.xlu0 %v4786_v18, %s3464_s26 }
 0x9f4   :  { %1713 = vrot.lane.b32.xlu1 %v4792_v40, %s3465_s27  ;;  %1697 = vrot.lane.b32.xlu0 %v4792_v40, %s3464_s26 }
 0x9f8   :  { %1733 = vrot.lane.b32.xlu1 %v4792_v40, %s3466_s28  ;;  %1731 = vrot.lane.b32.xlu0 %v4776_v34, %s3466_s28 }
 0x9fc   :  { %1735 = vrot.lane.b32.xlu1 %v4786_v18, %s3466_s28  ;;  %1729 = vrot.lane.b32.xlu0 %v4774_v58, %s3466_s28 }
 0xa00   :  { %1749 = vrot.lane.b32.xlu1 %v4792_v40, %s3467_s29  ;;  %1747 = vrot.lane.b32.xlu0 %v4776_v34, %s3467_s29 }
 0xa04   :  { %1765 = vrot.lane.b32.xlu1 %v4792_v40, %s6196_s3  ;;  %1763 = vrot.lane.b32.xlu0 %v4776_v34, %s6196_s3 }
 0xa08   :  { %1761 = vrot.lane.b32.xlu1 %v4774_v58, %s6196_s3  ;;  %1745 = vrot.lane.b32.xlu0 %v4774_v58, %s3467_s29 }
 0xa0c   :  { %1767 = vrot.lane.b32.xlu1 %v4786_v18, %s6196_s3  ;;  %1751 = vrot.lane.b32.xlu0 %v4786_v18, %s3467_s29 }
 0xa10   :  { %1779 = vrot.lane.b32.xlu1 %v4776_v34, %s6197_s30  ;;  %1777 = vrot.lane.b32.xlu0 %v4774_v58, %s6197_s30 }
 0xa14   :  { %1783 = vrot.lane.b32.xlu1 %v4786_v18, %s6197_s30  ;;  %1781 = vrot.lane.b32.xlu0 %v4792_v40, %s6197_s30 }
 0xa4a   :  { %v1664_v32 = vpop.permute.xlu1 %1663  ;;  %v1662_v24 = vpop.permute.xlu0 %1661 }
 0xa4b   :  { %v1671_v49 = vsel %vm77_vm0, %v1662_v24, %v1664_v32 }
 0xa4c   :  { %v1866_v50 = vmul.f32 %v1671_v49, %v4520_v39 }
 0xa4e   :  { %v1680_v36 = vpop.permute.xlu1 %1679  ;;  %v1678_v0 = vpop.permute.xlu0 %1677 }
 0xa4f   :  { %v1687_v25 = vsel %vm94_vm1, %v1678_v0, %v1680_v36 }
 0xa50   :  { %v1870_v16 = vmul.f32 %v1687_v25, %v4527_v1 }
 0xa52   :  { %v1684_v13 = vpop.permute.xlu1 %1683  ;;  %v1668_v35 = vpop.permute.xlu0 %1667  ;;  %v1903_v22 = vpack.c.bf16 %v1870_v16, %v1866_v50  ;;  %v4884_v16 = vld [vmem:[%s6186_s25 + $0x40] sm:$0xff] }
 0xa53   :  { %v1688_v19 = vsel %vm94_vm1, %v1684_v13, %v1678_v0  ;;  %v1672_v60 = vsel %vm77_vm0, %v1668_v35, %v1662_v24 }
 0xa54   :  { %v1869_v31 = vmul.f32 %v1688_v19, %v4536_v12  ;;  %v1865_v3 = vmul.f32 %v1672_v60, %v4541_v46  ;;  %1937 = vmatprep.subr.bf16.mxu0 %v1903_v22 }
 0xa56   :  { %v1902_v10 = vpack.c.bf16 %v1869_v31, %v1865_v3  ;;  %v1682_v4 = vpop.permute.xlu1 %1681  ;;  %v1666_v9 = vpop.permute.xlu0 %1665 }
 0xa57   :  { %v1685_v39 = vsel %vm94_vm1, %v1682_v4, %v1684_v13  ;;  %v1686_v1 = vsel %vm94_vm1, %v1680_v36, %v1682_v4  ;;  %v1669_v17 = vsel %vm77_vm0, %v1666_v9, %v1668_v35  ;;  %v1670_v6 = vsel %vm77_vm0, %v1664_v32, %v1666_v9  ;;  %v4873_v36 = vld [vmem:[%s6186_s25 + $0x48] sm:$0xff] }
 0xa58   :  { %v1871_v12 = vmul.f32 %v1686_v1, %v4552_v41  ;;  %v1872_v46 = vmul.f32 %v1685_v39, %v4557_v54  ;;  %v1867_v27 = vmul.f32 %v1670_v6, %v4562_v55  ;;  %v1868_v23 = vmul.f32 %v1669_v17, %v4567_v26  ;;  %1938 = vmatpush1.bf16.msra.mxu0 %v1902_v10  ;;  %v4900_v10 = vld [vmem:[%s6186_s25 + $0x58] sm:$0xff] }
 0xa5a   :  { %v1904_v24 = vpack.c.bf16 %v1871_v12, %v1867_v27  ;;  %v1696_v49 = vpop.permute.xlu1 %1695  ;;  %v1694_v0 = vpop.permute.xlu0 %1693  ;;  %v1905_v25 = vpack.c.bf16 %v1872_v46, %v1868_v23 }
 0xa5b   :  { %v1703_v41 = vsel %vm111_vm2, %v1694_v0, %v1696_v49 }
 0xa5c   :  { %1978 = vmatprep.subr.bf16.mxu1 %v1905_v25  ;;  %v1874_v26 = vmul.f32 %v4873_v36, %v1703_v41 }
 0xa5d   :  { %1979 = vmatpush1.bf16.msra.mxu1 %v1904_v24  ;;  %v4917_v24 = vld [vmem:[%s6186_s25 + $0x88] sm:$0xff] }
 0xa5e   :  { %v1712_v54 = vpop.permute.xlu1 %1711  ;;  %v1710_v32 = vpop.permute.xlu0 %1709 }
 0xa5f   :  { %v1719_v55 = vsel %vm128_vm3, %v1710_v32, %v1712_v54 }
 0xa60   :  { %v1878_v50 = vmul.f32 %v1719_v55, %v4586_v30  ;;  %v4895_v30 = vld [vmem:[%s6186_s25 + $0x50] sm:$0xff]  ;;  %v4932_v55 = vld [vmem:[%s6186_s25 + $0xb8] sm:$0xff] }
 0xa62   :  { %v1716_v13 = vpop.permute.xlu1 %1715  ;;  %v1700_v35 = vpop.permute.xlu0 %1699  ;;  %v1907_v22 = vpack.c.bf16 %v1878_v50, %v1874_v26  ;;  %v1883_v26 = vmul.f32 %v4792_v40, %v4635_v28  ;;  %v1884_v40 = vmul.f32 %v4786_v18, %v4653_v56 }
 0xa63   :  { %v1720_v19 = vsel %vm128_vm3, %v1716_v13, %v1710_v32  ;;  %v1704_v60 = vsel %vm111_vm2, %v1700_v35, %v1694_v0  ;;  %v4927_v32 = vld [vmem:[%s6186_s25 + $0xa0] sm:$0xff] }
 0xa64   :  { %v1877_v31 = vmul.f32 %v1720_v19, %v4595_v21  ;;  %v1873_v3 = vmul.f32 %v4884_v16, %v1704_v60  ;;  %1939 = vmatprep.subr.bf16.mxu0 %v1907_v22  ;;  %v1881_v19 = vmul.f32 %v4774_v58, %v4641_v51  ;;  %v4952_v51 = vld [vmem:[%s6186_s25 + $0xc8] sm:$0xff] }
 0xa66   :  { %v1906_v4 = vpack.c.bf16 %v1877_v31, %v1873_v3  ;;  %v1714_v9 = vpop.permute.xlu1 %1713  ;;  %v1698_v39 = vpop.permute.xlu0 %1697 }
 0xa67   :  { %v1717_v1 = vsel %vm128_vm3, %v1714_v9, %v1716_v13  ;;  %v1718_v21 = vsel %vm128_vm3, %v1712_v54, %v1714_v9  ;;  %v1701_v17 = vsel %vm111_vm2, %v1698_v39, %v1700_v35  ;;  %v1702_v6 = vsel %vm111_vm2, %v1696_v49, %v1698_v39 }
 0xa68   :  { %v1879_v12 = vmul.f32 %v1718_v21, %v4606_v2  ;;  %v1880_v46 = vmul.f32 %v1717_v1, %v4611_v63  ;;  %v1875_v27 = vmul.f32 %v4895_v30, %v1702_v6  ;;  %v1876_v23 = vmul.f32 %v4900_v10, %v1701_v17  ;;  %1940 = vmatpush1.bf16.msra.mxu0 %v1906_v4 }
 0xa69   :  { %v1882_v63 = vmul.f32 %v4917_v24, %v4776_v34 }
 0xa6a   :  { %v1908_v0 = vpack.c.bf16 %v1879_v12, %v1875_v27  ;;  %v1734_v25 = vpop.permute.xlu1 %1733  ;;  %v1732_v41 = vpop.permute.xlu0 %1731  ;;  %v1909_v54 = vpack.c.bf16 %v1880_v46, %v1876_v23 }
 0xa6b   :  { %v1738_v49 = vsel %vm149_vm4, %v1732_v41, %v1734_v25 }
 0xa6c   :  { %v1886_v2 = vmul.f32 %v1738_v49, %v4628_v29  ;;  %1980 = vmatprep.subr.bf16.mxu1 %v1909_v54 }
 0xa6d   :  { %1981 = vmatpush1.bf16.msra.mxu1 %v1908_v0 }
 0xa6e   :  { %v1736_v50 = vpop.permute.xlu1 %1735  ;;  %v1730_v29 = vpop.permute.xlu0 %1729  ;;  %v1911_v13 = vpack.c.bf16 %v1886_v2, %v1882_v63 }
 0xa6f   :  { %v1737_v34 = vsel %vm149_vm4, %v1734_v25, %v1736_v50  ;;  %v1739_v35 = vsel %vm149_vm4, %v1730_v29, %v1732_v41  ;;  %v1740_v22 = vsel %vm149_vm4, %v1736_v50, %v1730_v29  ;;  %v4969_v41 = vld [vmem:[%s6186_s25 + $0xd0] sm:$0xff] }
 0xa70   :  { %v1887_v60 = vmul.f32 %v1737_v34, %v4648_v52  ;;  %v1885_v31 = vmul.f32 %v4927_v32, %v1739_v35  ;;  %v1888_v28 = vmul.f32 %v4932_v55, %v1740_v22  ;;  %1941 = vmatprep.subr.bf16.mxu0 %v1911_v13 }
 0xa72   :  { %v1912_v3 = vpack.c.bf16 %v1887_v60, %v1883_v26  ;;  %v1910_v4 = vpack.c.bf16 %v1885_v31, %v1881_v19  ;;  %v1750_v9 = vpop.permute.xlu1 %1749  ;;  %v1748_v39 = vpop.permute.xlu0 %1747  ;;  %v1913_v1 = vpack.c.bf16 %v1888_v28, %v1884_v40 }
 0xa73   :  { %v1754_v52 = vsel %vm166_vm5, %v1748_v39, %v1750_v9 }
 0xa74   :  { %1942 = vmatpush1.bf16.msra.mxu0 %v1910_v4  ;;  %1982 = vmatprep.subr.bf16.mxu1 %v1913_v1  ;;  %v1890_v18 = vmul.f32 %v4952_v51, %v1754_v52 }
 0xa75   :  { %1983 = vmatpush1.bf16.msra.mxu1 %v1912_v3 }
 0xa76   :  { %v1766_v58 = vpop.permute.xlu1 %1765  ;;  %v1764_v21 = vpop.permute.xlu0 %1763 }
 0xa77   :  { %v1770_v56 = vsel %vm183_vm6, %v1764_v21, %v1766_v58 }
 0xa78   :  { %v1894_v17 = vmul.f32 %v1770_v56, %v4675_v20  ;;  %v4974_v20 = vld [vmem:[%s6186_s25 + $0xd8] sm:$0xff] }
 0xa7a   :  { %v1762_v6 = vpop.permute.xlu1 %1761  ;;  %v1746_v12 = vpop.permute.xlu0 %1745  ;;  %v1915_v46 = vpack.c.bf16 %v1894_v17, %v1890_v18 }
 0xa7b   :  { %v1771_v27 = vsel %vm183_vm6, %v1762_v6, %v1764_v21  ;;  %v1755_v23 = vsel %vm166_vm5, %v1746_v12, %v1748_v39 }
 0xa7c   :  { %v1893_v0 = vmul.f32 %v1771_v27, %v4684_v45  ;;  %v1889_v25 = vmul.f32 %v1755_v23, %v4689_v5  ;;  %1943 = vmatprep.subr.bf16.mxu0 %v1915_v46 }
 0xa7e   :  { %v1914_v54 = vpack.c.bf16 %v1893_v0, %v1889_v25  ;;  %v1768_v49 = vpop.permute.xlu1 %1767  ;;  %v1752_v2 = vpop.permute.xlu0 %1751 }
 0xa7f   :  { %v1769_v63 = vsel %vm183_vm6, %v1766_v58, %v1768_v49  ;;  %v1772_v45 = vsel %vm183_vm6, %v1768_v49, %v1762_v6  ;;  %v1753_v5 = vsel %vm166_vm5, %v1750_v9, %v1752_v2  ;;  %v1756_v26 = vsel %vm166_vm5, %v1752_v2, %v1746_v12 }
 0xa80   :  { %v1895_v50 = vmul.f32 %v1769_v63, %v4700_v48  ;;  %v1896_v29 = vmul.f32 %v1772_v45, %v4705_v47  ;;  %v1891_v13 = vmul.f32 %v4969_v41, %v1753_v5  ;;  %v1892_v34 = vmul.f32 %v4974_v20, %v1756_v26  ;;  %1944 = vmatpush1.bf16.msra.mxu0 %v1914_v54 }
 0xa82   :  { %v1916_v35 = vpack.c.bf16 %v1895_v50, %v1891_v13  ;;  %v1780_v22 = vpop.permute.xlu1 %1779  ;;  %v1778_v19 = vpop.permute.xlu0 %1777  ;;  %v1917_v60 = vpack.c.bf16 %v1896_v29, %v1892_v34 }
 0xa83   :  { %v1787_v31 = vsel %vm200_vm7, %v1778_v19, %v1780_v22 }
 0xa84   :  { %v1897_v28 = vmul.f32 %v1787_v31, %v4722_v37  ;;  %1984 = vmatprep.subr.bf16.mxu1 %v1917_v60 }
 0xa85   :  { %1985 = vmatpush1.bf16.msra.mxu1 %v1916_v35 }
 0xa86   :  { %v1784_v40 = vpop.permute.xlu1 %1783  ;;  %v1782_v48 = vpop.permute.xlu0 %1781  ;;  %v1918_v9 = vpack.c.bf16 %v1897_v28, %v1897_v28 }
 0xa87   :  { %v1788_v47 = vsel %vm200_vm7, %v1784_v40, %v1778_v19  ;;  %v1785_v3 = vsel %vm200_vm7, %v1782_v48, %v1784_v40  ;;  %v1786_v4 = vsel %vm200_vm7, %v1780_v22, %v1782_v48 }
 0xa88   :  { %v1900_v39 = vmul.f32 %v1788_v47, %v4730_v44  ;;  %v1898_v1 = vmul.f32 %v1786_v4, %v4735_v8  ;;  %v1899_v37 = vmul.f32 %v1785_v3, %v4740_v57  ;;  %v1926_v56 = vsel %vm348_vm8, %v1918_v9, 0  ;;  %v1901_v44 = vld [vmem:[%s6146_s10] sm:$0xf] }
 0xa8a   :  { %v1921_v52 = vpack.c.bf16 %v1900_v39, %v1900_v39  ;;  %v1919_v58 = vpack.c.bf16 %v1898_v1, %v1898_v1  ;;  %v1920_v21 = vpack.c.bf16 %v1899_v37, %v1899_v37 }
 0xa8c   :  { %3423 = vmatprep.subr.msk.bf16.mxu0 %vm348_vm8, %v1919_v58  ;;  %3425 = vmatprep.subr.msk.bf16.mxu1 %vm348_vm8, %v1921_v52  ;;  %v1932_v18 = vsel %vm348_vm8, %v1920_v21, 0 }
 0xa8d   :  { %1946 = vmatpush1.bf16.msra.mxu0 %v1926_v56  ;;  %1987 = vmatpush1.bf16.msra.mxu1 %v1932_v18 }
 0xa90   :  { %3424 = vmatmul.mubr.msk.bf16.vlgmr.msra.gmra.mrb[16].mxu0 %vm344_vm9, %v1901_v44  ;;  %3426 = vmatmul.mubr.msk.bf16.vlgmr.msra.gmra.mrb[16].mxu1 %vm344_vm9, %v1901_v44 }
 0xa91   :  { %2381 = vmatprep.mubr.bf16.mxu0 %v6206_v42  ;;  %2422 = vmatprep.mubr.bf16.mxu1 %v6206_v42 }
 0xb63   :  { %v1971_v8 = vpop.f32.mrb[16].mxu0  ;;  %v2012_v57 = vpop.f32.mrb[16].mxu1 }
 0xb64   :  { %v2025_v17 = vmul.f32 %v1971_v8, %v1971_v8  ;;  %v1973_v6 = vpop.f32.mrb[17].mxu0  ;;  %v2014_v12 = vpop.f32.mrb[17].mxu1  ;;  %v2027_v46 = vmul.f32 %v2012_v57, %v2012_v57 }
 0xb65   :  { %v2019_v27 = vadd.f32 %v1973_v6, %v1971_v8  ;;  %v2026_v23 = vmul.f32 %v1973_v6, %v1973_v6  ;;  %v1975_v0 = vpop.f32.mrb[18].mxu0  ;;  %v2016_v25 = vpop.f32.mrb[18].mxu1  ;;  %v2028_v5 = vmul.f32 %v2014_v12, %v2014_v12 }
 0xb66   :  { %v1976_v54 = vpop.f32.mrb[19].mxu0  ;;  %v2017_v49 = vpop.f32.mrb[19].mxu1 }
 0xb67   :  { %v2029_v2 = vadd.f32 %v2026_v23, %v2025_v17  ;;  %v2020_v63 = vadd.f32 %v2019_v27, %v2012_v57  ;;  %v5107_v27 = vld [vmem:[%s6186_s25] sm:$0xff]  ;;  %v5117_v54 = vld [vmem:[%s6186_s25 + $0x10] sm:$0xff]  ;;  %v5122_v49 = vld [vmem:[%s6186_s25 + $0x18] sm:$0xff] }
 0xb69   :  { %v2021_v45 = vadd.f32 %v2020_v63, %v2014_v12  ;;  %v2030_v26 = vadd.f32 %v2029_v2, %v2027_v46 }
 0xb6b   :  { %2022 = vadd.xlane.f32.xlu0 %v2021_v45  ;;  %v2031_v50 = vadd.f32 %v2030_v26, %v2028_v5  ;;  %v5132_v5 = vld [vmem:[%s6186_s25 + $0x20] sm:$0xff]  ;;  %v5137_v26 = vld [vmem:[%s6186_s25 + $0x30] sm:$0xff] }
 0xb6d   :  { %2032 = vadd.xlane.f32.xlu1 %v2031_v50  ;;  %v5142_v50 = vld [vmem:[%s6186_s25 + $0x38] sm:$0xff] }
 0xbf8   :  { %v2023_v29 = vpop.xlane.xlu0 %2022 }
 0xbf9   :  { %v2024_v13 = vmul.f32 0.001953125, %v2023_v29 }
 0xbfa   :  { %v2033_v34 = vpop.xlane.xlu1 %2032 }
 0xbfb   :  { %v2035_v35 = vmul.f32 %v2024_v13, %v2024_v13  ;;  %v2034_v22 = vmul.f32 0.001953125, %v2033_v34 }
 0xbfd   :  { %v2036_v19 = vsub.f32 %v2034_v22, %v2035_v35 }
 0xbff   :  { %v2037_v60 = vmax.f32 %v2036_v19, 0.0 }
 0xc01   :  { %v2038_v31 = vadd.f32 1e-05, %v2037_v60 }
 0xc03   :  { %3460 = vrsqrt.f32 %v2038_v31 }
 0xc0d   :  { %v3461_v28 = vpop.eup %3460 }
 0xc0e   :  { %v2041_v40 = vmul.f32 %v3461_v28, %v4765_v59 }
 0xc10   :  { %2044 = vperm.xlu0 %3449, %v2041_v40   ;;  %v2052_v48 = vmul.f32 %v2041_v40, %v2024_v13 }
 0xc12   :  { %v2053_v47 = vsub.f32 %v4771_v61, %v2052_v48 }
 0xc14   :  { %2056 = vperm.xlu1 %3450, %v2053_v47  }
 0xc8f   :  { %v2045_v3 = vpop.permute.xlu0 %2044 }
 0xc90   :  { %v2047_v4 = vmul.f32 %v2045_v3, %v1971_v8  ;;  %v2048_v9 = vmul.f32 %v2045_v3, %v1973_v6  ;;  %v2049_v1 = vmul.f32 %v2045_v3, %v2012_v57  ;;  %v2050_v37 = vmul.f32 %v2045_v3, %v2014_v12  ;;  %v5095_v57 = vld [vmem:[%s6186_s25 + $0x8] sm:$0xff] }
 0xc91   :  { %v5102_v6 = vld [vmem:[%s6186_s25 + $0x28] sm:$0xff] }
 0xc93   :  { %v2057_v39 = vpop.permute.xlu1 %2056 }
 0xc94   :  { %v2059_v52 = vadd.f32 %v2057_v39, %v2047_v4  ;;  %v2060_v58 = vadd.f32 %v2057_v39, %v2048_v9  ;;  %v2061_v21 = vadd.f32 %v2057_v39, %v2049_v1  ;;  %v2062_v56 = vadd.f32 %v2057_v39, %v2050_v37 }
 0xc96   :  { %v5014_v18 = vadd.f32 %v2059_v52, %v4442_v38  ;;  %v5017_v59 = vadd.f32 %v2060_v58, %v4445_v43  ;;  %v5024_v61 = vadd.f32 %v2061_v21, %v4463_v11  ;;  %v5027_v44 = vadd.f32 %v2062_v56, %v4456_v33  ;;  %v2328_v38 = vld [vmem:[%s6147_s14] sm:$0xff]  ;;  %v5161_v21 = vld [vmem:[%s6186_s25 + $0x68] sm:$0xff] }
 0xc98   :  { %2069 = vrot.lane.b32.xlu1 %v5017_v59, %s3463_s4  ;;  %2067 = vrot.lane.b32.xlu0 %v5014_v18, %s3463_s4 }
 0xc9c   :  { %2073 = vrot.lane.b32.xlu1 %v5027_v44, %s3463_s4  ;;  %2071 = vrot.lane.b32.xlu0 %v5024_v61, %s3463_s4 }
 0xca0   :  { %2085 = vrot.lane.b32.xlu1 %v5017_v59, %s3462_s21  ;;  %2083 = vrot.lane.b32.xlu0 %v5014_v18, %s3462_s21 }
 0xca4   :  { %2089 = vrot.lane.b32.xlu1 %v5027_v44, %s3462_s21  ;;  %2087 = vrot.lane.b32.xlu0 %v5024_v61, %s3462_s21 }
 0xca8   :  { %2101 = vrot.lane.b32.xlu1 %v5017_v59, %s3464_s26  ;;  %2099 = vrot.lane.b32.xlu0 %v5014_v18, %s3464_s26 }
 0xcac   :  { %2105 = vrot.lane.b32.xlu1 %v5027_v44, %s3464_s26  ;;  %2103 = vrot.lane.b32.xlu0 %v5024_v61, %s3464_s26 }
 0xcb0   :  { %2117 = vrot.lane.b32.xlu1 %v5017_v59, %s3465_s27  ;;  %2115 = vrot.lane.b32.xlu0 %v5014_v18, %s3465_s27 }
 0xcb4   :  { %2121 = vrot.lane.b32.xlu1 %v5027_v44, %s3465_s27  ;;  %2119 = vrot.lane.b32.xlu0 %v5024_v61, %s3465_s27 }
 0xcb8   :  { %2137 = vrot.lane.b32.xlu1 %v5017_v59, %s3466_s28  ;;  %2135 = vrot.lane.b32.xlu0 %v5014_v18, %s3466_s28 }
 0xcbc   :  { %2141 = vrot.lane.b32.xlu1 %v5027_v44, %s3466_s28  ;;  %2139 = vrot.lane.b32.xlu0 %v5024_v61, %s3466_s28 }
 0xcc0   :  { %2153 = vrot.lane.b32.xlu1 %v5017_v59, %s3467_s29  ;;  %2151 = vrot.lane.b32.xlu0 %v5014_v18, %s3467_s29 }
 0xcc4   :  { %2157 = vrot.lane.b32.xlu1 %v5027_v44, %s3467_s29  ;;  %2155 = vrot.lane.b32.xlu0 %v5024_v61, %s3467_s29 }
 0xcc8   :  { %2169 = vrot.lane.b32.xlu1 %v5017_v59, %s6196_s3  ;;  %2167 = vrot.lane.b32.xlu0 %v5014_v18, %s6196_s3 }
 0xccc   :  { %2173 = vrot.lane.b32.xlu1 %v5027_v44, %s6196_s3  ;;  %2171 = vrot.lane.b32.xlu0 %v5024_v61, %s6196_s3 }
 0xcd0   :  { %2185 = vrot.lane.b32.xlu1 %v5017_v59, %s6197_s30  ;;  %2183 = vrot.lane.b32.xlu0 %v5014_v18, %s6197_s30 }
 0xcd4   :  { %2189 = vrot.lane.b32.xlu1 %v5027_v44, %s6197_s30  ;;  %2187 = vrot.lane.b32.xlu0 %v5024_v61, %s6197_s30 }
 0xcd8   :  { %2331 = vperm.xlu0 %3449, %v2328_v38  }
 0xd0a   :  { %v2070_v43 = vpop.permute.xlu1 %2069  ;;  %v2068_v33 = vpop.permute.xlu0 %2067 }
 0xd0b   :  { %v2077_v17 = vsel %vm77_vm0, %v2068_v33, %v2070_v43 }
 0xd0c   :  { %v2272_v25 = vmul.f32 %v5095_v57, %v2077_v17 }
 0xd0e   :  { %v2074_v11 = vpop.permute.xlu1 %2073  ;;  %v2072_v8 = vpop.permute.xlu0 %2071 }
 0xd0f   :  { %v2078_v23 = vsel %vm77_vm0, %v2074_v11, %v2068_v33  ;;  %v2076_v2 = vsel %vm77_vm0, %v2070_v43, %v2072_v8  ;;  %v2075_v45 = vsel %vm77_vm0, %v2072_v8, %v2074_v11 }
 0xd10   :  { %v2271_v29 = vmul.f32 %v5107_v27, %v2078_v23  ;;  %v2273_v22 = vmul.f32 %v5117_v54, %v2076_v2  ;;  %v2274_v28 = vmul.f32 %v5122_v49, %v2075_v45  ;;  %v5181_v23 = vld [vmem:[%s6186_s25 + $0x70] sm:$0xff] }
 0xd12   :  { %v2086_v12 = vpop.permute.xlu1 %2085  ;;  %v2084_v46 = vpop.permute.xlu0 %2083 }
 0xd13   :  { %v2093_v0 = vsel %vm94_vm1, %v2084_v46, %v2086_v12 }
 0xd14   :  { %v2276_v63 = vmul.f32 %v5102_v6, %v2093_v0  ;;  %v5186_v0 = vld [vmem:[%s6186_s25 + $0x78] sm:$0xff] }
 0xd16   :  { %v2090_v13 = vpop.permute.xlu1 %2089  ;;  %v2088_v34 = vpop.permute.xlu0 %2087  ;;  %v2309_v35 = vpack.c.bf16 %v2276_v63, %v2272_v25 }
 0xd17   :  { %v2094_v19 = vsel %vm94_vm1, %v2090_v13, %v2084_v46  ;;  %v2091_v60 = vsel %vm94_vm1, %v2088_v34, %v2090_v13  ;;  %v2092_v31 = vsel %vm94_vm1, %v2086_v12, %v2088_v34  ;;  %v5176_v46 = vld [vmem:[%s6186_s25 + $0x60] sm:$0xff] }
 0xd18   :  { %v2275_v40 = vmul.f32 %v5132_v5, %v2094_v19  ;;  %v2277_v48 = vmul.f32 %v5137_v26, %v2092_v31  ;;  %v2278_v47 = vmul.f32 %v5142_v50, %v2091_v60  ;;  %2349 = vmatprep.subr.bf16.mxu0 %v2309_v35 }
 0xd1a   :  { %v2308_v3 = vpack.c.bf16 %v2275_v40, %v2271_v29  ;;  %v2310_v4 = vpack.c.bf16 %v2277_v48, %v2273_v22  ;;  %v2102_v9 = vpop.permute.xlu1 %2101  ;;  %v2100_v39 = vpop.permute.xlu0 %2099  ;;  %v2311_v1 = vpack.c.bf16 %v2278_v47, %v2274_v28 }
 0xd1b   :  { %v2109_v58 = vsel %vm111_vm2, %v2100_v39, %v2102_v9 }
 0xd1c   :  { %2350 = vmatpush1.bf16.msra.mxu0 %v2308_v3  ;;  %2390 = vmatprep.subr.bf16.mxu1 %v2311_v1  ;;  %v2280_v11 = vmul.f32 %v2109_v58, %v4873_v36  ;;  %v5215_v1 = vld [vmem:[%s6186_s25 + $0xb0] sm:$0xff] }
 0xd1d   :  { %2391 = vmatpush1.bf16.msra.mxu1 %v2310_v4  ;;  %v5203_v4 = vld [vmem:[%s6186_s25 + $0x90] sm:$0xff] }
 0xd1e   :  { %v2106_v37 = vpop.permute.xlu1 %2105  ;;  %v2104_v52 = vpop.permute.xlu0 %2103 }
 0xd1f   :  { %v2110_v43 = vsel %vm111_vm2, %v2106_v37, %v2100_v39  ;;  %v2108_v8 = vsel %vm111_vm2, %v2102_v9, %v2104_v52  ;;  %v2107_v12 = vsel %vm111_vm2, %v2104_v52, %v2106_v37  ;;  %v5210_v39 = vld [vmem:[%s6186_s25 + $0xa8] sm:$0xff]  ;;  %v5220_v37 = vld [vmem:[%s6186_s25 + $0x98] sm:$0xff]  ;;  %v5225_v52 = vld [vmem:[%s6186_s25 + $0x80] sm:$0xff] }
 0xd20   :  { %v2279_v25 = vmul.f32 %v2110_v43, %v4884_v16  ;;  %v2281_v29 = vmul.f32 %v2108_v8, %v4895_v30  ;;  %v2282_v22 = vmul.f32 %v2107_v12, %v4900_v10  ;;  %v2288_v43 = vmul.f32 %v5017_v59, %v4917_v24 }
 0xd21   :  { %v2290_v24 = vmul.f32 %v5220_v37, %v5027_v44  ;;  %v2287_v59 = vmul.f32 %v5225_v52, %v5014_v18 }
 0xd22   :  { %v2118_v56 = vpop.permute.xlu1 %2117  ;;  %v2116_v38 = vpop.permute.xlu0 %2115 }
 0xd23   :  { %v2125_v33 = vsel %vm128_vm3, %v2116_v38, %v2118_v56 }
 0xd24   :  { %v2284_v17 = vmul.f32 %v5161_v21, %v2125_v33 }
 0xd26   :  { %v2122_v2 = vpop.permute.xlu1 %2121  ;;  %v2120_v63 = vpop.permute.xlu0 %2119  ;;  %v2313_v45 = vpack.c.bf16 %v2284_v17, %v2280_v11 }
 0xd27   :  { %v2126_v13 = vsel %vm128_vm3, %v2122_v2, %v2116_v38  ;;  %v2123_v34 = vsel %vm128_vm3, %v2120_v63, %v2122_v2  ;;  %v2124_v35 = vsel %vm128_vm3, %v2118_v56, %v2120_v63  ;;  %v2289_v56 = vmul.f32 %v5203_v4, %v5024_v61 }
 0xd28   :  { %v2283_v19 = vmul.f32 %v5176_v46, %v2126_v13  ;;  %v2285_v60 = vmul.f32 %v5181_v23, %v2124_v35  ;;  %v2286_v31 = vmul.f32 %v5186_v0, %v2123_v34  ;;  %2351 = vmatprep.subr.bf16.mxu0 %v2313_v45 }
 0xd2a   :  { %v2312_v28 = vpack.c.bf16 %v2283_v19, %v2279_v25  ;;  %v2314_v40 = vpack.c.bf16 %v2285_v60, %v2281_v29  ;;  %v2138_v48 = vpop.permute.xlu1 %2137  ;;  %v2136_v47 = vpop.permute.xlu0 %2135  ;;  %v2315_v3 = vpack.c.bf16 %v2286_v31, %v2282_v22  ;;  %v5252_v31 = vld [vmem:[%s6186_s25 + $0xe0] sm:$0xff] }
 0xd2b   :  { %v2145_v9 = vsel %vm149_vm4, %v2136_v47, %v2138_v48 }
 0xd2c   :  { %2352 = vmatpush1.bf16.msra.mxu0 %v2312_v28  ;;  %2392 = vmatprep.subr.bf16.mxu1 %v2315_v3  ;;  %v2291_v33 = vmul.f32 %v2145_v9, %v4927_v32  ;;  %v5271_v3 = vld [vmem:[%s6186_s25 + $0xf0] sm:$0xff]  ;;  %v5276_v9 = vld [vmem:[%s6186_s25 + $0xc0] sm:$0xff] }
 0xd2d   :  { %2393 = vmatpush1.bf16.msra.mxu1 %v2314_v40 }
 0xd2e   :  { %v2142_v58 = vpop.permute.xlu1 %2141  ;;  %v2140_v38 = vpop.permute.xlu0 %2139  ;;  %v2316_v34 = vpack.c.bf16 %v2291_v33, %v2287_v59 }
 0xd2f   :  { %v2146_v11 = vsel %vm149_vm4, %v2142_v58, %v2136_v47  ;;  %v2143_v8 = vsel %vm149_vm4, %v2140_v38, %v2142_v58  ;;  %v2144_v17 = vsel %vm149_vm4, %v2138_v48, %v2140_v38  ;;  %v5261_v48 = vld [vmem:[%s6186_s25 + $0xf8] sm:$0xff]  ;;  %v5266_v47 = vld [vmem:[%s6186_s25 + $0xe8] sm:$0xff] }
 0xd30   :  { %v2294_v12 = vmul.f32 %v2146_v11, %v4932_v55  ;;  %v2292_v25 = vmul.f32 %v5210_v39, %v2144_v17  ;;  %v2293_v61 = vmul.f32 %v5215_v1, %v2143_v8 }
 0xd32   :  { %v2318_v2 = vpack.c.bf16 %v2293_v61, %v2289_v56  ;;  %v2154_v63 = vpop.permute.xlu1 %2153  ;;  %v2152_v45 = vpop.permute.xlu0 %2151  ;;  %v2317_v29 = vpack.c.bf16 %v2292_v25, %v2288_v43  ;;  %v2319_v13 = vpack.c.bf16 %v2294_v12, %v2290_v24 }
 0xd33   :  { %v2161_v58 = vsel %vm166_vm5, %v2152_v45, %v2154_v63 }
 0xd34   :  { %2353 = vmatprep.subr.bf16.mxu0 %v2317_v29  ;;  %2394 = vmatprep.subr.bf16.mxu1 %v2319_v13  ;;  %v2295_v59 = vmul.f32 %v5276_v9, %v2161_v58 }
 0xd35   :  { %2354 = vmatpush1.bf16.msra.mxu0 %v2316_v34  ;;  %2395 = vmatpush1.bf16.msra.mxu1 %v2318_v2  ;;  %v5297_v2 = vld [vmem:[%s6186_s25 + $0x100] sm:$0xff] }
 0xd36   :  { %v2158_v35 = vpop.permute.xlu1 %2157  ;;  %v2156_v22 = vpop.permute.xlu0 %2155 }
 0xd37   :  { %v2162_v44 = vsel %vm166_vm5, %v2158_v35, %v2152_v45  ;;  %v2160_v18 = vsel %vm166_vm5, %v2154_v63, %v2156_v22  ;;  %v2159_v40 = vsel %vm166_vm5, %v2156_v22, %v2158_v35 }
 0xd38   :  { %v2298_v56 = vmul.f32 %v2162_v44, %v4974_v20  ;;  %v2296_v38 = vmul.f32 %v2160_v18, %v4952_v51  ;;  %v2297_v25 = vmul.f32 %v2159_v40, %v4969_v41  ;;  %v5310_v44 = vld [vmem:[%s6186_s25 + $0x108] sm:$0xff]  ;;  %v5315_v18 = vld [vmem:[%s6186_s25 + $0x110] sm:$0xff] }
 0xd3a   :  { %v2170_v19 = vpop.permute.xlu1 %2169  ;;  %v2168_v60 = vpop.permute.xlu0 %2167 }
 0xd3b   :  { %v2177_v28 = vsel %vm183_vm6, %v2168_v60, %v2170_v19 }
 0xd3c   :  { %v2299_v11 = vmul.f32 %v5252_v31, %v2177_v28 }
 0xd3e   :  { %v2174_v43 = vpop.permute.xlu1 %2173  ;;  %v2172_v33 = vpop.permute.xlu0 %2171  ;;  %v2320_v35 = vpack.c.bf16 %v2299_v11, %v2295_v59 }
 0xd3f   :  { %v2178_v8 = vsel %vm183_vm6, %v2174_v43, %v2168_v60  ;;  %v2175_v17 = vsel %vm183_vm6, %v2172_v33, %v2174_v43  ;;  %v2176_v12 = vsel %vm183_vm6, %v2170_v19, %v2172_v33  ;;  %v5305_v60 = vld [vmem:[%s6186_s25 + $0x118] sm:$0xff] }
 0xd40   :  { %v2302_v61 = vmul.f32 %v5261_v48, %v2178_v8  ;;  %v2300_v24 = vmul.f32 %v5266_v47, %v2176_v12  ;;  %v2301_v51 = vmul.f32 %v5271_v3, %v2175_v17 }
 0xd42   :  { %v2322_v63 = vpack.c.bf16 %v2301_v51, %v2297_v25  ;;  %v2186_v45 = vpop.permute.xlu1 %2185  ;;  %v2184_v29 = vpop.permute.xlu0 %2183  ;;  %v2321_v13 = vpack.c.bf16 %v2300_v24, %v2296_v38  ;;  %v2323_v34 = vpack.c.bf16 %v2302_v61, %v2298_v56  ;;  %v2307_v51 = vld [vmem:[%s6148_s13] sm:$0xf] }
 0xd43   :  { %v2193_v22 = vsel %vm200_vm7, %v2184_v29, %v2186_v45 }
 0xd44   :  { %v2303_v19 = vmul.f32 %v5297_v2, %v2193_v22  ;;  %2355 = vmatprep.subr.bf16.mxu0 %v2321_v13  ;;  %2396 = vmatprep.subr.bf16.mxu1 %v2323_v34 }
 0xd45   :  { %2356 = vmatpush1.bf16.msra.mxu0 %v2320_v35  ;;  %2397 = vmatpush1.bf16.msra.mxu1 %v2322_v63 }
 0xd46   :  { %v2190_v28 = vpop.permute.xlu1 %2189  ;;  %v2188_v40 = vpop.permute.xlu0 %2187  ;;  %v2324_v43 = vpack.c.bf16 %v2303_v19, %v2303_v19 }
 0xd47   :  { %v2194_v58 = vsel %vm200_vm7, %v2190_v28, %v2184_v29  ;;  %v2191_v56 = vsel %vm200_vm7, %v2188_v40, %v2190_v28  ;;  %v2192_v38 = vsel %vm200_vm7, %v2186_v45, %v2188_v40 }
 0xd48   :  { %v2306_v33 = vmul.f32 %v5305_v60, %v2194_v58  ;;  %v2304_v11 = vmul.f32 %v5310_v44, %v2192_v38  ;;  %v2305_v8 = vmul.f32 %v5315_v18, %v2191_v56  ;;  %v2338_v61 = vsel %vm348_vm8, %v2324_v43, 0 }
 0xd4a   :  { %v2327_v17 = vpack.c.bf16 %v2306_v33, %v2306_v33  ;;  %v2325_v12 = vpack.c.bf16 %v2304_v11, %v2304_v11  ;;  %v2326_v25 = vpack.c.bf16 %v2305_v8, %v2305_v8 }
 0xd4c   :  { %3427 = vmatprep.subr.msk.bf16.mxu0 %vm348_vm8, %v2325_v12  ;;  %3429 = vmatprep.subr.msk.bf16.mxu1 %vm348_vm8, %v2327_v17  ;;  %v2344_v24 = vsel %vm348_vm8, %v2326_v25, 0 }
 0xd4d   :  { %2358 = vmatpush1.bf16.msra.mxu0 %v2338_v61  ;;  %2399 = vmatpush1.bf16.msra.mxu1 %v2344_v24 }
 0xd50   :  { %3428 = vmatmul.mubr.msk.bf16.vlgmr.msra.gmra.mrb[20].mxu0 %vm344_vm9, %v2307_v51  ;;  %3430 = vmatmul.mubr.msk.bf16.vlgmr.msra.gmra.mrb[20].mxu1 %vm344_vm9, %v2307_v51 }
 0xd51   :  { %2783 = vmatprep.mubr.bf16.mxu0 %v6206_v42  ;;  %2836 = vmatprep.mubr.bf16.mxu1 %v6206_v42 }
 0xd57   :  { %v2332_v59 = vpop.permute.xlu0 %2331 }
 0xe23   :  { %v2383_v63 = vpop.f32.mrb[20].mxu0  ;;  %v2424_v45 = vpop.f32.mrb[20].mxu1 }
 0xe24   :  { %v2384_v29 = vadd.f32 %v2383_v63, %v2332_v59  ;;  %v2385_v13 = vpop.f32.mrb[21].mxu0  ;;  %v2426_v34 = vpop.f32.mrb[21].mxu1  ;;  %v2425_v40 = vadd.f32 %v2424_v45, %v2332_v59 }
 0xe25   :  { %v2386_v35 = vadd.f32 %v2385_v13, %v2332_v59  ;;  %v2387_v22 = vpop.f32.mrb[22].mxu0  ;;  %v2428_v19 = vpop.f32.mrb[22].mxu1  ;;  %v2427_v43 = vadd.f32 %v2426_v34, %v2332_v59 }
 0xe26   :  { %v5338_v28 = vadd.f32 %v2384_v29, %v3967_v53  ;;  %v2388_v58 = vpop.f32.mrb[23].mxu0  ;;  %v2429_v56 = vpop.f32.mrb[23].mxu1  ;;  %v5348_v33 = vadd.f32 %v2425_v40, %v3973_v62  ;;  %v2701_v53 = vld [vmem:[%s6150_s16 + $0x10] sm:$0xff]  ;;  %v2702_v62 = vld [vmem:[%s6150_s16 + $0x18] sm:$0xff] }
 0xe27   :  { %v5341_v38 = vadd.f32 %v2386_v35, %v3999_v14  ;;  %v5351_v11 = vadd.f32 %v2427_v43, %v4005_v15  ;;  %v2700_v14 = vld [vmem:[%s6150_s16 + $0x8] sm:$0xff]  ;;  %v2699_v15 = vld [vmem:[%s6150_s16] sm:$0xff] }
 0xe28   :  { %2435 = vrot.lane.b32.xlu1 %v5338_v28, %s3463_s4 }
 0xe29   :  { %2437 = vrot.lane.b32.xlu0 %v5341_v38, %s3463_s4 }
 0xe2c   :  { %2439 = vrot.lane.b32.xlu1 %v5348_v33, %s3463_s4 }
 0xe2d   :  { %2441 = vrot.lane.b32.xlu0 %v5351_v11, %s3463_s4 }
 0xe30   :  { %2451 = vrot.lane.b32.xlu1 %v5338_v28, %s3462_s21 }
 0xe31   :  { %2453 = vrot.lane.b32.xlu0 %v5341_v38, %s3462_s21 }
 0xe34   :  { %2455 = vrot.lane.b32.xlu1 %v5348_v33, %s3462_s21 }
 0xe35   :  { %2457 = vrot.lane.b32.xlu0 %v5351_v11, %s3462_s21 }
 0xe38   :  { %2467 = vrot.lane.b32.xlu1 %v5338_v28, %s3464_s26 }
 0xe39   :  { %2469 = vrot.lane.b32.xlu0 %v5341_v38, %s3464_s26 }
 0xe3c   :  { %2471 = vrot.lane.b32.xlu1 %v5348_v33, %s3464_s26 }
 0xe3d   :  { %2473 = vrot.lane.b32.xlu0 %v5351_v11, %s3464_s26 }
 0xe40   :  { %2483 = vrot.lane.b32.xlu1 %v5338_v28, %s3465_s27 }
 0xe41   :  { %2485 = vrot.lane.b32.xlu0 %v5341_v38, %s3465_s27 }
 0xe44   :  { %2487 = vrot.lane.b32.xlu1 %v5348_v33, %s3465_s27 }
 0xe45   :  { %2489 = vrot.lane.b32.xlu0 %v5351_v11, %s3465_s27 }
 0xe48   :  { %2503 = vrot.lane.b32.xlu1 %v5338_v28, %s3466_s28 }
 0xe49   :  { %2505 = vrot.lane.b32.xlu0 %v5341_v38, %s3466_s28 }
 0xe4c   :  { %2507 = vrot.lane.b32.xlu1 %v5348_v33, %s3466_s28 }
 0xe4d   :  { %2509 = vrot.lane.b32.xlu0 %v5351_v11, %s3466_s28 }
 0xe50   :  { %2519 = vrot.lane.b32.xlu1 %v5338_v28, %s3467_s29 }
 0xe51   :  { %2521 = vrot.lane.b32.xlu0 %v5341_v38, %s3467_s29 }
 0xe54   :  { %2523 = vrot.lane.b32.xlu1 %v5348_v33, %s3467_s29 }
 0xe55   :  { %2525 = vrot.lane.b32.xlu0 %v5351_v11, %s3467_s29 }
 0xe58   :  { %2535 = vrot.lane.b32.xlu1 %v5338_v28, %s6196_s3 }
 0xe59   :  { %2537 = vrot.lane.b32.xlu0 %v5341_v38, %s6196_s3 }
 0xe5c   :  { %2539 = vrot.lane.b32.xlu1 %v5348_v33, %s6196_s3 }
 0xe5d   :  { %2541 = vrot.lane.b32.xlu0 %v5351_v11, %s6196_s3 }
 0xe60   :  { %2551 = vrot.lane.b32.xlu1 %v5338_v28, %s6197_s30 }
 0xe61   :  { %2553 = vrot.lane.b32.xlu0 %v5341_v38, %s6197_s30 }
 0xe64   :  { %2555 = vrot.lane.b32.xlu1 %v5348_v33, %s6197_s30 }
 0xe65   :  { %2557 = vrot.lane.b32.xlu0 %v5351_v11, %s6197_s30 }
 0xe68   :  { %2715 = vperm.xlu1 %3450, %v2701_v53  }
 0xe69   :  { %2720 = vperm.xlu0 %3449, %v2702_v62  }
 0xe6c   :  { %2710 = vperm.xlu1 %3450, %v2700_v14  }
 0xe6d   :  { %2705 = vperm.xlu0 %3449, %v2699_v15  }
 0xe9a   :  { %v2436_v8 = vpop.permute.xlu1 %2435 }
 0xe9b   :  { %v2438_v17 = vpop.permute.xlu0 %2437 }
 0xe9c   :  { %v2445_v61 = vsel %vm77_vm0, %v2436_v8, %v2438_v17 }
 0xe9d   :  { %v2640_v63 = vmul.f32 %v2445_v61, %v5095_v57 }
 0xe9e   :  { %v2440_v12 = vpop.permute.xlu1 %2439 }
 0xe9f   :  { %v2442_v25 = vpop.permute.xlu0 %2441  ;;  %v2444_v35 = vsel %vm77_vm0, %v2438_v17, %v2440_v12 }
 0xea0   :  { %v2443_v29 = vsel %vm77_vm0, %v2440_v12, %v2442_v25  ;;  %v2446_v13 = vsel %vm77_vm0, %v2442_v25, %v2436_v8  ;;  %v2641_v14 = vmul.f32 %v2444_v35, %v5117_v54 }
 0xea1   :  { %v2639_v56 = vmul.f32 %v2446_v13, %v5107_v27  ;;  %v2642_v43 = vmul.f32 %v2443_v29, %v5122_v49 }
 0xea2   :  { %v2452_v24 = vpop.permute.xlu1 %2451 }
 0xea3   :  { %v2454_v51 = vpop.permute.xlu0 %2453 }
 0xea4   :  { %v2461_v59 = vsel %vm94_vm1, %v2452_v24, %v2454_v51 }
 0xea5   :  { %v2644_v45 = vmul.f32 %v2461_v59, %v5102_v6 }
 0xea6   :  { %v2456_v34 = vpop.permute.xlu1 %2455 }
 0xea7   :  { %v2460_v22 = vsel %vm94_vm1, %v2454_v51, %v2456_v34  ;;  %v2458_v19 = vpop.permute.xlu0 %2457  ;;  %v2680_v40 = vpack.c.bf16 %v2644_v45, %v2640_v63 }
 0xea8   :  { %v2645_v58 = vmul.f32 %v2460_v22, %v5137_v26  ;;  %v2459_v57 = vsel %vm94_vm1, %v2456_v34, %v2458_v19  ;;  %v2462_v6 = vsel %vm94_vm1, %v2458_v19, %v2452_v24 }
 0xea9   :  { %v2643_v53 = vmul.f32 %v2462_v6, %v5132_v5  ;;  %v2646_v62 = vmul.f32 %v2459_v57, %v5142_v50  ;;  %2751 = vmatprep.subr.bf16.mxu0 %v2680_v40 }
 0xeaa   :  { %v2468_v15 = vpop.permute.xlu1 %2467  ;;  %v2681_v12 = vpack.c.bf16 %v2645_v58, %v2641_v14 }
 0xeab   :  { %v2679_v8 = vpack.c.bf16 %v2643_v53, %v2639_v56  ;;  %v2470_v26 = vpop.permute.xlu0 %2469  ;;  %v2682_v17 = vpack.c.bf16 %v2646_v62, %v2642_v43 }
 0xeac   :  { %v2477_v27 = vsel %vm111_vm2, %v2468_v15, %v2470_v26 }
 0xead   :  { %2752 = vmatpush1.bf16.msra.mxu0 %v2679_v8  ;;  %2804 = vmatprep.subr.bf16.mxu1 %v2682_v17  ;;  %v2648_v54 = vmul.f32 %v2477_v27, %v4873_v36 }
 0xeae   :  { %2805 = vmatpush1.bf16.msra.mxu1 %v2681_v12  ;;  %v2472_v25 = vpop.permute.xlu1 %2471  ;;  %v2657_v12 = vmul.f32 %v5348_v33, %v5203_v4 }
 0xeaf   :  { %v2474_v61 = vpop.permute.xlu0 %2473  ;;  %v2476_v45 = vsel %vm111_vm2, %v2470_v26, %v2472_v25 }
 0xeb0   :  { %v2475_v51 = vsel %vm111_vm2, %v2472_v25, %v2474_v61  ;;  %v2478_v59 = vsel %vm111_vm2, %v2474_v61, %v2468_v15  ;;  %v2649_v57 = vmul.f32 %v2476_v45, %v4895_v30 }
 0xeb1   :  { %v2647_v22 = vmul.f32 %v2478_v59, %v4884_v16  ;;  %v2650_v19 = vmul.f32 %v2475_v51, %v4900_v10  ;;  %v2620_v16 = vld [vmem:[%s6186_s25 + $0x88] sm:$0xff] }
 0xeb2   :  { %v2484_v49 = vpop.permute.xlu1 %2483  ;;  %v2656_v17 = vmul.f32 %v2620_v16, %v5341_v38 }
 0xeb3   :  { %v2486_v5 = vpop.permute.xlu0 %2485 }
 0xeb4   :  { %v2493_v50 = vsel %vm128_vm3, %v2484_v49, %v2486_v5 }
 0xeb5   :  { %v2652_v24 = vmul.f32 %v2493_v50, %v5161_v21 }
 0xeb6   :  { %v2488_v63 = vpop.permute.xlu1 %2487 }
 0xeb7   :  { %v2492_v29 = vsel %vm128_vm3, %v2486_v5, %v2488_v63  ;;  %v2490_v13 = vpop.permute.xlu0 %2489  ;;  %v2684_v34 = vpack.c.bf16 %v2652_v24, %v2648_v54 }
 0xeb8   :  { %v2653_v35 = vmul.f32 %v2492_v29, %v5181_v23  ;;  %v2491_v36 = vsel %vm128_vm3, %v2488_v63, %v2490_v13  ;;  %v2494_v21 = vsel %vm128_vm3, %v2490_v13, %v2484_v49 }
 0xeb9   :  { %v2651_v40 = vmul.f32 %v2494_v21, %v5176_v46  ;;  %v2654_v58 = vmul.f32 %v2491_v36, %v5186_v0  ;;  %2753 = vmatprep.subr.bf16.mxu0 %v2684_v34  ;;  %v2655_v46 = vmul.f32 %v5338_v28, %v5225_v52  ;;  %v2658_v28 = vmul.f32 %v5351_v11, %v5220_v37  ;;  %v2628_v37 = vld [vmem:[%s6186_s25 + $0xc8] sm:$0xff] }
 0xeba   :  { %v2504_v6 = vpop.permute.xlu1 %2503  ;;  %v2685_v53 = vpack.c.bf16 %v2653_v35, %v2649_v57 }
 0xebb   :  { %v2683_v56 = vpack.c.bf16 %v2651_v40, %v2647_v22  ;;  %v2506_v23 = vpop.permute.xlu0 %2505  ;;  %v2686_v43 = vpack.c.bf16 %v2654_v58, %v2650_v19 }
 0xebc   :  { %v2513_v62 = vsel %vm149_vm4, %v2504_v6, %v2506_v23 }
 0xebd   :  { %2754 = vmatpush1.bf16.msra.mxu0 %v2683_v56  ;;  %2806 = vmatprep.subr.bf16.mxu1 %v2686_v43  ;;  %v2659_v30 = vmul.f32 %v2513_v62, %v4927_v32 }
 0xebe   :  { %2807 = vmatpush1.bf16.msra.mxu1 %v2685_v53  ;;  %v2508_v10 = vpop.permute.xlu1 %2507 }
 0xebf   :  { %v2512_v0 = vsel %vm149_vm4, %v2506_v23, %v2508_v10  ;;  %v2510_v14 = vpop.permute.xlu0 %2509  ;;  %v2687_v61 = vpack.c.bf16 %v2659_v30, %v2655_v46 }
 0xec0   :  { %v2660_v15 = vmul.f32 %v2512_v0, %v5210_v39  ;;  %v2511_v8 = vsel %vm149_vm4, %v2508_v10, %v2510_v14  ;;  %v2514_v26 = vsel %vm149_vm4, %v2510_v14, %v2504_v6 }
 0xec1   :  { %v2661_v52 = vmul.f32 %v2511_v8, %v5215_v1  ;;  %v2662_v32 = vmul.f32 %v2514_v26, %v4932_v55 }
 0xec2   :  { %v2520_v25 = vpop.permute.xlu1 %2519  ;;  %v2688_v39 = vpack.c.bf16 %v2660_v15, %v2656_v17 }
 0xec3   :  { %v2689_v27 = vpack.c.bf16 %v2661_v52, %v2657_v12  ;;  %v2522_v49 = vpop.permute.xlu0 %2521  ;;  %v2690_v5 = vpack.c.bf16 %v2662_v32, %v2658_v28 }
 0xec4   :  { %2755 = vmatprep.subr.bf16.mxu0 %v2688_v39  ;;  %v2529_v55 = vsel %vm166_vm5, %v2520_v25, %v2522_v49 }
 0xec5   :  { %2756 = vmatpush1.bf16.msra.mxu0 %v2687_v61  ;;  %2808 = vmatprep.subr.bf16.mxu1 %v2690_v5  ;;  %v2663_v59 = vmul.f32 %v2529_v55, %v5276_v9 }
 0xec6   :  { %2809 = vmatpush1.bf16.msra.mxu1 %v2689_v27  ;;  %v2524_v38 = vpop.permute.xlu1 %2523 }
 0xec7   :  { %v2526_v50 = vpop.permute.xlu0 %2525  ;;  %v2528_v11 = vsel %vm166_vm5, %v2522_v49, %v2524_v38 }
 0xec8   :  { %v2527_v54 = vsel %vm166_vm5, %v2524_v38, %v2526_v50  ;;  %v2530_v24 = vsel %vm166_vm5, %v2526_v50, %v2520_v25  ;;  %v2664_v13 = vmul.f32 %v2628_v37, %v2528_v11 }
 0xec9   :  { %v2665_v21 = vmul.f32 %v2527_v54, %v4969_v41  ;;  %v2666_v22 = vmul.f32 %v2530_v24, %v4974_v20 }
 0xeca   :  { %v2536_v4 = vpop.permute.xlu1 %2535 }
 0xecb   :  { %v2538_v33 = vpop.permute.xlu0 %2537 }
 0xecc   :  { %v2545_v1 = vsel %vm183_vm6, %v2536_v4, %v2538_v33 }
 0xecd   :  { %v2667_v63 = vmul.f32 %v2545_v1, %v5252_v31 }
 0xece   :  { %v2540_v51 = vpop.permute.xlu1 %2539 }
 0xecf   :  { %v2544_v45 = vsel %vm183_vm6, %v2538_v33, %v2540_v51  ;;  %v2542_v29 = vpop.permute.xlu0 %2541  ;;  %v2691_v58 = vpack.c.bf16 %v2667_v63, %v2663_v59 }
 0xed0   :  { %v2668_v34 = vmul.f32 %v2544_v45, %v5266_v47  ;;  %v2543_v35 = vsel %vm183_vm6, %v2540_v51, %v2542_v29  ;;  %v2546_v36 = vsel %vm183_vm6, %v2542_v29, %v2536_v4 }
 0xed1   :  { %v2669_v9 = vmul.f32 %v2543_v35, %v5271_v3  ;;  %v2670_v31 = vmul.f32 %v2546_v36, %v5261_v48 }
 0xed2   :  { %v2552_v19 = vpop.permute.xlu1 %2551  ;;  %v2692_v40 = vpack.c.bf16 %v2668_v34, %v2664_v13 }
 0xed3   :  { %v2693_v57 = vpack.c.bf16 %v2669_v9, %v2665_v21  ;;  %v2554_v6 = vpop.permute.xlu0 %2553  ;;  %v2694_v47 = vpack.c.bf16 %v2670_v31, %v2666_v22  ;;  %v3291_v22 = vld [vmem:[%s6152_s18] sm:$0xff]  ;;  %v3292_v9 = vld [vmem:[%s6152_s18 + $0x8] sm:$0xf] }
 0xed4   :  { %v2561_v56 = vsel %vm200_vm7, %v2552_v19, %v2554_v6  ;;  %2757 = vmatprep.subr.bf16.mxu0 %v2692_v40 }
 0xed5   :  { %v2671_v23 = vmul.f32 %v2561_v56, %v5297_v2  ;;  %2758 = vmatpush1.bf16.msra.mxu0 %v2691_v58  ;;  %2810 = vmatprep.subr.bf16.mxu1 %v2694_v47 }
 0xed6   :  { %2811 = vmatpush1.bf16.msra.mxu1 %v2693_v57  ;;  %v2556_v41 = vpop.permute.xlu1 %2555 }
 0xed7   :  { %v2560_v20 = vsel %vm200_vm7, %v2554_v6, %v2556_v41  ;;  %v2558_v48 = vpop.permute.xlu0 %2557  ;;  %v2695_v3 = vpack.c.bf16 %v2671_v23, %v2671_v23 }
 0xed8   :  { %v2672_v43 = vmul.f32 %v2560_v20, %v5310_v44  ;;  %v2559_v53 = vsel %vm200_vm7, %v2556_v41, %v2558_v48  ;;  %v2562_v62 = vsel %vm200_vm7, %v2558_v48, %v2552_v19  ;;  %v3451_v44 = vld [vmem:[%s6149_s15] sm:$0xff]  }
 0xed9   :  { %v2673_v16 = vmul.f32 %v2559_v53, %v5315_v18  ;;  %v2674_v2 = vmul.f32 %v2562_v62, %v5305_v60  ;;  %v2740_v0 = vsel %vm348_vm8, %v2695_v3, 0  ;;  %v3452_v60 = vld [vmem:[%s6149_s15 + $0x8] sm:$0xff]  }
 0xeda   :  { %v2696_v10 = vpack.c.bf16 %v2672_v43, %v2672_v43 }
 0xedb   :  { %v2697_v46 = vpack.c.bf16 %v2673_v16, %v2673_v16  ;;  %v2698_v30 = vpack.c.bf16 %v2674_v2, %v2674_v2 }
 0xedc   :  { %3433 = vmatprep.subr.msk.bf16.mxu0 %vm348_vm8, %v2696_v10 }
 0xedd   :  { %2760 = vmatpush1.bf16.msra.mxu0 %v2740_v0  ;;  %3436 = vmatprep.subr.msk.bf16.mxu1 %vm348_vm8, %v2698_v30  ;;  %v2746_v14 = vsel %vm348_vm8, %v2697_v46, 0  ;;  %v3181_v30 = vld [vmem:[%s6153_s2 + $0x1a0] sm:$0xff] }
 0xede   :  { %2813 = vmatpush1.bf16.msra.mxu1 %v2746_v14 }
 0xee0   :  { %3434 = vmatmul.mubr.msk.bf16.vlgmr.msra.gmra.mrb[24].mxu0 %vm344_vm9, %v3451_v44 }
 0xee1   :  { %3437 = vmatmul.mubr.msk.bf16.vlgmr.msra.gmra.mrb[24].mxu1 %vm344_vm9, %v3451_v44  ;;  %2793 = vmatprep.mubr.bf16.mxu0 %v6206_v42  ;;  %v3177_v44 = vld [vmem:[%s6153_s2 + $0x180] sm:$0xff] }
 0xee2   :  { %2846 = vmatprep.mubr.bf16.mxu1 %v6206_v42 }
 0xee7   :  { %v2716_v49 = vpop.permute.xlu1 %2715 }
 0xee8   :  { %3435 = vmatmul.mubr.msk.bf16.gmra.mrb[28].mxu0 %vm344_vm9, %v3452_v60  ;;  %v5551_v18 = vpop.permute.xlu0 %2720 }
 0xee9   :  { %3438 = vmatmul.mubr.msk.bf16.gmra.mrb[28].mxu1 %vm344_vm9, %v3452_v60  ;;  %3341 = vmatprep.mubr.bf16.mxu0 %v6206_v42 }
 0xeea   :  { %3384 = vmatprep.mubr.bf16.mxu1 %v6206_v42 }
 0xeeb   :  { %v2711_v24 = vpop.permute.xlu1 %2710 }
 0xeec   :  { %v2706_v15 = vpop.permute.xlu0 %2705 }
 0xfb3   :  { %v2785_v8 = vpop.f32.mrb[24].mxu0 }
 0xfb4   :  { %v5553_v26 = vadd.f32 %v2785_v8, %v2706_v15  ;;  %v2787_v17 = vpop.f32.mrb[25].mxu0  ;;  %v2838_v12 = vpop.f32.mrb[24].mxu1 }
 0xfb5   :  { %v5555_v52 = vadd.f32 %v2787_v17, %v2706_v15  ;;  %v2789_v32 = vpop.f32.mrb[26].mxu0  ;;  %v2840_v28 = vpop.f32.mrb[25].mxu1  ;;  %v5561_v42 = vadd.f32 %v2838_v12, %v2706_v15 }
 0xfb6   :  { %v2791_v25 = vpop.f32.mrb[27].mxu0  ;;  %v2842_v39 = vpop.f32.mrb[26].mxu1  ;;  %2945 = vrot.lane.b32.xlu1 %v5553_v26, %s3466_s28  ;;  %v5563_v27 = vadd.f32 %v2840_v28, %v2706_v15  ;;  %v5583_v51 = vadd.f32 %v2789_v32, %v2711_v24 }
 0xfb7   :  { %v2844_v61 = vpop.f32.mrb[27].mxu1  ;;  %2947 = vrot.lane.b32.xlu0 %v5555_v52, %s3466_s28  ;;  %v5585_v59 = vadd.f32 %v2791_v25, %v2711_v24  ;;  %v5591_v63 = vadd.f32 %v2842_v39, %v2711_v24 }
 0xfb8   :  { %v5593_v45 = vadd.f32 %v2844_v61, %v2711_v24 }
 0xfba   :  { %2949 = vrot.lane.b32.xlu1 %v5561_v42, %s3466_s28 }
 0xfbb   :  { %v2795_v5 = vpop.f32.mrb[28].mxu0  ;;  %2951 = vrot.lane.b32.xlu0 %v5563_v27, %s3466_s28 }
 0xfbc   :  { %v2797_v38 = vpop.f32.mrb[29].mxu0  ;;  %v2848_v50 = vpop.f32.mrb[28].mxu1  ;;  %v5607_v29 = vadd.f32 %v2795_v5, %v2716_v49 }
 0xfbd   :  { %v2799_v4 = vpop.f32.mrb[30].mxu0  ;;  %v2850_v33 = vpop.f32.mrb[29].mxu1  ;;  %v5609_v13 = vadd.f32 %v2797_v38, %v2716_v49  ;;  %v5615_v34 = vadd.f32 %v2848_v50, %v2716_v49 }
 0xfbe   :  { %v2801_v55 = vpop.f32.mrb[31].mxu0  ;;  %v2852_v1 = vpop.f32.mrb[30].mxu1  ;;  %3017 = vrot.lane.b32.xlu1 %v5553_v26, %s6196_s3  ;;  %v5617_v35 = vadd.f32 %v2850_v33, %v2716_v49  ;;  %v5640_v36 = vadd.f32 %v2799_v4, %v5551_v18 }
 0xfbf   :  { %v5572_v37 = vadd.f32 %v2852_v1, %v5551_v18  ;;  %v2854_v11 = vpop.f32.mrb[31].mxu1  ;;  %3019 = vrot.lane.b32.xlu0 %v5555_v52, %s6196_s3  ;;  %v5643_v21 = vadd.f32 %v2801_v55, %v5551_v18  ;;  %v3134_v1 = vld [vmem:[%s6153_s2 + $0x28] sm:$0xff] }
 0xfc0   :  { %v5577_v54 = vadd.f32 %v2854_v11, %v5551_v18 }
 0xfc2   :  { %3021 = vrot.lane.b32.xlu1 %v5561_v42, %s6196_s3 }
 0xfc3   :  { %3023 = vrot.lane.b32.xlu0 %v5563_v27, %s6196_s3 }
 0xfc6   :  { %2921 = vrot.lane.b32.xlu1 %v5583_v51, %s3465_s27 }
 0xfc7   :  { %2923 = vrot.lane.b32.xlu0 %v5585_v59, %s3465_s27 }
 0xfca   :  { %2925 = vrot.lane.b32.xlu1 %v5591_v63, %s3465_s27 }
 0xfcb   :  { %2927 = vrot.lane.b32.xlu0 %v5593_v45, %s3465_s27 }
 0xfce   :  { %3001 = vrot.lane.b32.xlu1 %v5583_v51, %s3467_s29 }
 0xfcf   :  { %3003 = vrot.lane.b32.xlu0 %v5585_v59, %s3467_s29 }
 0xfd2   :  { %3005 = vrot.lane.b32.xlu1 %v5591_v63, %s3467_s29 }
 0xfd3   :  { %3007 = vrot.lane.b32.xlu0 %v5593_v45, %s3467_s29 }
 0xfd6   :  { %2873 = vrot.lane.b32.xlu1 %v5607_v29, %s3462_s21 }
 0xfd7   :  { %2875 = vrot.lane.b32.xlu0 %v5609_v13, %s3462_s21 }
 0xfda   :  { %2877 = vrot.lane.b32.xlu1 %v5615_v34, %s3462_s21 }
 0xfdb   :  { %2879 = vrot.lane.b32.xlu0 %v5617_v35, %s3462_s21 }
 0xfde   :  { %2905 = vrot.lane.b32.xlu1 %v5607_v29, %s3464_s26 }
 0xfdf   :  { %2907 = vrot.lane.b32.xlu0 %v5609_v13, %s3464_s26 }
 0xfe2   :  { %2909 = vrot.lane.b32.xlu1 %v5615_v34, %s3464_s26 }
 0xfe3   :  { %2911 = vrot.lane.b32.xlu0 %v5617_v35, %s3464_s26 }
 0xfe6   :  { %2985 = vrot.lane.b32.xlu1 %v5607_v29, %s3466_s28 }
 0xfe7   :  { %2987 = vrot.lane.b32.xlu0 %v5609_v13, %s3466_s28 }
 0xfea   :  { %2989 = vrot.lane.b32.xlu1 %v5615_v34, %s3466_s28 }
 0xfeb   :  { %2991 = vrot.lane.b32.xlu0 %v5617_v35, %s3466_s28 }
 0xfee   :  { %2857 = vrot.lane.b32.xlu1 %v5640_v36, %s3463_s4 }
 0xfef   :  { %2859 = vrot.lane.b32.xlu0 %v5643_v21, %s3463_s4 }
 0xff2   :  { %2861 = vrot.lane.b32.xlu1 %v5572_v37, %s3463_s4 }
 0xff3   :  { %2863 = vrot.lane.b32.xlu0 %v5577_v54, %s3463_s4 }
 0xff6   :  { %2889 = vrot.lane.b32.xlu1 %v5640_v36, %s3462_s21 }
 0xff7   :  { %2891 = vrot.lane.b32.xlu0 %v5643_v21, %s3462_s21 }
 0xffa   :  { %2893 = vrot.lane.b32.xlu1 %v5572_v37, %s3462_s21 }
 0xffb   :  { %2895 = vrot.lane.b32.xlu0 %v5577_v54, %s3462_s21 }
 0xffe   :  { %3033 = vrot.lane.b32.xlu1 %v5583_v51, %s6196_s3 }
 0xfff   :  { %3035 = vrot.lane.b32.xlu0 %v5585_v59, %s6196_s3 }
0x1002   :  { %2961 = vrot.lane.b32.xlu1 %v5640_v36, %s3465_s27 }
0x1003   :  { %2963 = vrot.lane.b32.xlu0 %v5643_v21, %s3465_s27 }
0x1006   :  { %2965 = vrot.lane.b32.xlu1 %v5572_v37, %s3465_s27 }
0x1007   :  { %2967 = vrot.lane.b32.xlu0 %v5577_v54, %s3465_s27 }
0x100a   :  { %3037 = vrot.lane.b32.xlu1 %v5591_v63, %s6196_s3 }
0x100b   :  { %3039 = vrot.lane.b32.xlu0 %v5593_v45, %s6196_s3 }
0x100e   :  { %3049 = vrot.lane.b32.xlu1 %v5553_v26, %s6197_s30 }
0x100f   :  { %3051 = vrot.lane.b32.xlu0 %v5555_v52, %s6197_s30 }
0x1012   :  { %3053 = vrot.lane.b32.xlu1 %v5561_v42, %s6197_s30 }
0x1013   :  { %3055 = vrot.lane.b32.xlu0 %v5563_v27, %s6197_s30 }
0x1016   :  { %3295 = vperm.xlu1 %3450, %v3291_v22   ;;  %v3130_v22 = vld [vmem:[%s6153_s2 + $0x8] sm:$0xff] }
0x1017   :  { %3300 = vperm.xlu0 %3449, %v3292_v9  }
0x1028   :  { %v2946_v31 = vpop.permute.xlu1 %2945 }
0x1029   :  { %v2948_v19 = vpop.permute.xlu0 %2947 }
0x102a   :  { %v5693_v40 = vsel %vm149_vm4, %v2946_v31, %v2948_v19 }
0x102c   :  { %v2950_v58 = vpop.permute.xlu1 %2949 }
0x102d   :  { %v5697_v57 = vsel %vm149_vm4, %v2948_v19, %v2950_v58  ;;  %v2952_v6 = vpop.permute.xlu0 %2951 }
0x102e   :  { %v5701_v47 = vsel %vm149_vm4, %v2950_v58, %v2952_v6  ;;  %v5705_v56 = vsel %vm149_vm4, %v2952_v6, %v2946_v31  ;;  %v3133_v58 = vld [vmem:[%s6153_s2 + $0x20] sm:$0xff] }
0x1030   :  { %v3018_v23 = vpop.permute.xlu1 %3017 }
0x1031   :  { %v3020_v41 = vpop.permute.xlu0 %3019 }
0x1032   :  { %v3027_v20 = vsel %vm183_vm6, %v3018_v23, %v3020_v41 }
0x1033   :  { %v5743_v18 = vmul.f32 %v3181_v30, %v3027_v20  ;;  %v3129_v30 = vld [vmem:[%s6153_s2] sm:$0xff] }
0x1034   :  { %v3022_v48 = vpop.permute.xlu1 %3021 }
0x1035   :  { %v5711_v3 = vsel %vm183_vm6, %v3020_v41, %v3022_v48  ;;  %v3024_v43 = vpop.permute.xlu0 %3023  ;;  %6211 = vst [vmem:[#allocation11_spill] sm:$0xff] %v5743_v18  ;;  %v3136_v41 = vld [vmem:[%s6153_s2 + $0x38] sm:$0xff] }
0x1036   :  { %v5715_v53 = vsel %vm183_vm6, %v3022_v48, %v3024_v43  ;;  %v5719_v62 = vsel %vm183_vm6, %v3024_v43, %v3018_v23  ;;  %v3131_v23 = vld [vmem:[%s6153_s2 + $0x10] sm:$0xff] }
0x1037   :  { %6209 = vst [vmem:[#allocation5_spill] sm:$0xff] %v5715_v53  ;;  %6210 = vst [vmem:[#allocation6_spill] sm:$0xff] %v5719_v62 }
0x1038   :  { %v5721_v16 = vpop.permute.xlu1 %2921 }
0x1039   :  { %v5723_v2 = vpop.permute.xlu0 %2923 }
0x103c   :  { %v5725_v10 = vpop.permute.xlu1 %2925 }
0x103d   :  { %v5727_v46 = vpop.permute.xlu0 %2927 }
0x1040   :  { %v5732_v0 = vpop.permute.xlu1 %3001 }
0x1041   :  { %v5737_v14 = vpop.permute.xlu0 %3003 }
0x1042   :  { %v3011_v60 = vsel %vm166_vm5, %v5732_v0, %v5737_v14 }
0x1043   :  { %v5745_v15 = vmul.f32 %v3177_v44, %v3011_v60  ;;  %v3132_v44 = vld [vmem:[%s6153_s2 + $0x18] sm:$0xff]  ;;  %v3135_v60 = vld [vmem:[%s6153_s2 + $0x30] sm:$0xff] }
0x1044   :  { %v5747_v8 = vpop.permute.xlu1 %3005 }
0x1045   :  { %6212 = vst [vmem:[#allocation7_spill] sm:$0xff] %v5745_v15  ;;  %v5751_v12 = vpop.permute.xlu0 %3007  ;;  %v3149_v15 = vld [vmem:[%s6153_s2 + $0xa0] sm:$0xff] }
0x1048   :  { %v2874_v32 = vpop.permute.xlu1 %2873 }
0x1049   :  { %v2876_v28 = vpop.permute.xlu0 %2875 }
0x104a   :  { %v2883_v11 = vsel %vm94_vm1, %v2874_v32, %v2876_v28 }
0x104b   :  { %v3198_v19 = vmul.f32 %v3134_v1, %v2883_v11 }
0x104c   :  { %v2878_v25 = vpop.permute.xlu1 %2877 }
0x104d   :  { %v2880_v39 = vpop.permute.xlu0 %2879  ;;  %v2882_v1 = vsel %vm94_vm1, %v2876_v28, %v2878_v25 }
0x104e   :  { %v2881_v20 = vsel %vm94_vm1, %v2878_v25, %v2880_v39  ;;  %v2884_v48 = vsel %vm94_vm1, %v2880_v39, %v2874_v32  ;;  %v3199_v25 = vmul.f32 %v3135_v60, %v2882_v1  ;;  %v3148_v60 = vld [vmem:[%s6153_s2 + $0x98] sm:$0xff] }
0x104f   :  { %v3197_v18 = vmul.f32 %v3133_v58, %v2884_v48  ;;  %v3200_v53 = vmul.f32 %v3136_v41, %v2881_v20  ;;  %v2931_v58 = vsel %vm128_vm3, %v5721_v16, %v5723_v2  ;;  %v5828_v48 = vmul.f32 %v3149_v15, %v5553_v26  ;;  %v3141_v26 = vld [vmem:[%s6153_s2 + $0x60] sm:$0xff]  ;;  %v3139_v15 = vld [vmem:[%s6153_s2 + $0x50] sm:$0xff] }
0x1050   :  { %v5753_v61 = vpop.permute.xlu1 %2905 }
0x1051   :  { %v5755_v49 = vpop.permute.xlu0 %2907 }
0x1054   :  { %v5757_v5 = vpop.permute.xlu1 %2909 }
0x1055   :  { %v2912_v38 = vpop.permute.xlu0 %2911 }
0x1058   :  { %v5759_v50 = vpop.permute.xlu1 %2985 }
0x1059   :  { %v5761_v4 = vpop.permute.xlu0 %2987 }
0x105c   :  { %v5763_v33 = vpop.permute.xlu1 %2989 }
0x105d   :  { %v5765_v55 = vpop.permute.xlu0 %2991 }
0x1060   :  { %v2858_v24 = vpop.permute.xlu1 %2857 }
0x1061   :  { %v2860_v9 = vpop.permute.xlu0 %2859 }
0x1062   :  { %v2867_v31 = vsel %vm77_vm0, %v2858_v24, %v2860_v9 }
0x1063   :  { %v3194_v6 = vmul.f32 %v3130_v22, %v2867_v31 }
0x1064   :  { %v2862_v43 = vpop.permute.xlu1 %2861 }
0x1065   :  { %v2866_v11 = vsel %vm77_vm0, %v2860_v9, %v2862_v43  ;;  %v2864_v32 = vpop.permute.xlu0 %2863  ;;  %v3260_v39 = vpack.c.bf16 %v3198_v19, %v3194_v6  ;;  %v3142_v9 = vld [vmem:[%s6153_s2 + $0x68] sm:$0xff]  ;;  %v2915_v19 = vsel %vm111_vm2, %v5753_v61, %v5755_v49 }
0x1066   :  { %v3195_v22 = vmul.f32 %v3131_v23, %v2866_v11  ;;  %v2865_v31 = vsel %vm77_vm0, %v2862_v43, %v2864_v32  ;;  %v2868_v17 = vsel %vm77_vm0, %v2864_v32, %v2858_v24  ;;  %v3138_v6 = vld [vmem:[%s6153_s2 + $0x48] sm:$0xff]  ;;  %v2930_v11 = vsel %vm128_vm3, %v5723_v2, %v5725_v10  ;;  %v3144_v32 = vld [vmem:[%s6153_s2 + $0x78] sm:$0xff] }
0x1067   :  { %v3193_v62 = vmul.f32 %v3129_v30, %v2868_v17  ;;  %v3196_v28 = vmul.f32 %v3132_v44, %v2865_v31  ;;  %3309 = vmatprep.subr.bf16.mxu0 %v3260_v39  ;;  %v3146_v17 = vld [vmem:[%s6153_s2 + $0x88] sm:$0xff]  ;;  %v3151_v44 = vld [vmem:[%s6153_s2 + $0xb0] sm:$0xff]  ;;  %v2913_v39 = vsel %vm111_vm2, %v5757_v5, %v2912_v38  ;;  %v3140_v2 = vld [vmem:[%s6153_s2 + $0x58] sm:$0xff] }
0x1068   :  { %v2890_v24 = vpop.permute.xlu1 %2889  ;;  %v3261_v43 = vpack.c.bf16 %v3199_v25, %v3195_v22  ;;  %v3210_v1 = vmul.f32 %v3146_v17, %v2931_v58  ;;  %v2916_v22 = vsel %vm111_vm2, %v2912_v38, %v5753_v61  ;;  %v2932_v25 = vsel %vm128_vm3, %v5727_v46, %v5721_v16  ;;  %v3143_v61 = vld [vmem:[%s6153_s2 + $0x70] sm:$0xff]  ;;  %v3150_v17 = vld [vmem:[%s6153_s2 + $0xa8] sm:$0xff]  ;;  %v3145_v16 = vld [vmem:[%s6153_s2 + $0x80] sm:$0xff] }
0x1069   :  { %v3259_v23 = vpack.c.bf16 %v3197_v18, %v3193_v62  ;;  %v2892_v41 = vpop.permute.xlu0 %2891  ;;  %v3262_v20 = vpack.c.bf16 %v3200_v53, %v3196_v28  ;;  %v2929_v53 = vsel %vm128_vm3, %v5725_v10, %v5727_v46  ;;  %v3206_v62 = vmul.f32 %v3142_v9, %v2915_v19  ;;  %v3137_v28 = vld [vmem:[%s6153_s2 + $0x40] sm:$0xff] }
0x106a   :  { %v2899_v30 = vsel %vm94_vm1, %v2890_v24, %v2892_v41  ;;  %v3153_v10 = vld [vmem:[%s6153_s2 + $0xc0] sm:$0xff]  ;;  %v2914_v38 = vsel %vm111_vm2, %v5755_v49, %v5757_v5  ;;  %v3212_v46 = vmul.f32 %v3148_v60, %v2929_v53  ;;  %v3152_v5 = vld [vmem:[%s6153_s2 + $0xb8] sm:$0xff] }
0x106b   :  { %v3202_v18 = vmul.f32 %v3138_v6, %v2899_v30  ;;  %3310 = vmatpush1.bf16.msra.mxu0 %v3259_v23  ;;  %3352 = vmatprep.subr.bf16.mxu1 %v3262_v20  ;;  %v3147_v20 = vld [vmem:[%s6153_s2 + $0x90] sm:$0xff]  ;;  %v3208_v30 = vmul.f32 %v3144_v32, %v2913_v39  ;;  %v3209_v39 = vmul.f32 %v3145_v16, %v2932_v25  ;;  %v3165_v25 = vld [vmem:[%s6153_s2 + $0x120] sm:$0xff] }
0x106c   :  { %3353 = vmatpush1.bf16.msra.mxu1 %v3261_v43  ;;  %v2894_v31 = vpop.permute.xlu1 %2893  ;;  %v3205_v43 = vmul.f32 %v3141_v26, %v2916_v22  ;;  %v3214_v26 = vmul.f32 %v3150_v17, %v5555_v52  ;;  %v3159_v32 = vld [vmem:[%s6153_s2 + $0xf0] sm:$0xff] }
0x106d   :  { %v2898_v9 = vsel %vm94_vm1, %v2892_v41, %v2894_v31  ;;  %v2896_v19 = vpop.permute.xlu0 %2895  ;;  %v3264_v6 = vpack.c.bf16 %v3206_v62, %v3202_v18  ;;  %v3158_v41 = vld [vmem:[%s6153_s2 + $0xe8] sm:$0xff]  ;;  %v5903_v62 = vmul.f32 %v3153_v10, %v5583_v51  ;;  %v3160_v18 = vld [vmem:[%s6153_s2 + $0xf8] sm:$0xff]  ;;  %v3157_v51 = vld [vmem:[%s6153_s2 + $0xe0] sm:$0xff]  ;;  %v3211_v10 = vmul.f32 %v3147_v20, %v2930_v11 }
0x106e   :  { %v3203_v58 = vmul.f32 %v3139_v15, %v2898_v9  ;;  %v2897_v23 = vsel %vm94_vm1, %v2894_v31, %v2896_v19  ;;  %v2900_v49 = vsel %vm94_vm1, %v2896_v19, %v2890_v24  ;;  %v3155_v24 = vld [vmem:[%s6153_s2 + $0xd0] sm:$0xff]  ;;  %v3215_v15 = vmul.f32 %v3151_v44, %v5561_v42  ;;  %v3154_v44 = vld [vmem:[%s6153_s2 + $0xc8] sm:$0xff] }
0x106f   :  { %v3201_v60 = vmul.f32 %v3137_v28, %v2900_v49  ;;  %v3204_v53 = vmul.f32 %v3140_v2, %v2897_v23  ;;  %3311 = vmatprep.subr.bf16.mxu0 %v3264_v6  ;;  %v3207_v31 = vmul.f32 %v3143_v61, %v2914_v38  ;;  %v3216_v42 = vmul.f32 %v3152_v5, %v5563_v27  ;;  %v3167_v19 = vld [vmem:[%s6153_s2 + $0x130] sm:$0xff]  ;;  %v3156_v27 = vld [vmem:[%s6153_s2 + $0xd8] sm:$0xff]  ;;  %v3166_v11 = vld [vmem:[%s6153_s2 + $0x128] sm:$0xff] }
0x1070   :  { %v5912_v9 = vpop.permute.xlu1 %3033  ;;  %v3222_v52 = vmul.f32 %v3158_v41, %v5697_v57  ;;  %v3268_v38 = vpack.c.bf16 %v3214_v26, %v3210_v1  ;;  %v5938_v6 = vmul.f32 %v3155_v24, %v5591_v63  ;;  %v3224_v57 = vmul.f32 %v3160_v18, %v5705_v56  ;;  %v3162_v63 = vld [vmem:[%s6153_s2 + $0x108] sm:$0xff]  ;;  %v3176_v24 = vld [vmem:[%s6153_s2 + $0x178] sm:$0xff] }
0x1071   :  { %v3263_v22 = vpack.c.bf16 %v3205_v43, %v3201_v60  ;;  %v5921_v28 = vpop.permute.xlu0 %3035  ;;  %v3266_v2 = vpack.c.bf16 %v3208_v30, %v3204_v53  ;;  %v3265_v61 = vpack.c.bf16 %v3207_v31, %v3203_v58  ;;  %v3270_v1 = vpack.c.bf16 %v3216_v42, %v3212_v46  ;;  %v3168_v46 = vld [vmem:[%s6153_s2 + $0x138] sm:$0xff] }
0x1072   :  { %v3221_v17 = vmul.f32 %v3157_v51, %v5693_v40  ;;  %v3223_v16 = vmul.f32 %v3159_v32, %v5701_v47  ;;  %v3218_v56 = vmul.f32 %v3154_v44, %v5585_v59  ;;  %v3267_v23 = vpack.c.bf16 %v5828_v48, %v3209_v39  ;;  %v3174_v48 = vld [vmem:[%s6153_s2 + $0x168] sm:$0xff] }
0x1073   :  { %3312 = vmatpush1.bf16.msra.mxu0 %v3263_v22  ;;  %3354 = vmatprep.subr.bf16.mxu1 %v3266_v2  ;;  %v5955_v40 = vmul.f32 %v3167_v19, %v5615_v34  ;;  %v5958_v47 = vmul.f32 %v3165_v25, %v5607_v29  ;;  %v3220_v5 = vmul.f32 %v3156_v27, %v5593_v45  ;;  %v3163_v45 = vld [vmem:[%s6153_s2 + $0x110] sm:$0xff]  ;;  %v3170_v22 = vld [vmem:[%s6153_s2 + $0x148] sm:$0xff]  ;;  %v3172_v2 = vld [vmem:[%s6153_s2 + $0x158] sm:$0xff] }
0x1074   :  { %3313 = vmatprep.subr.bf16.mxu0 %v3268_v38  ;;  %3355 = vmatpush1.bf16.msra.mxu1 %v3265_v61  ;;  %v2962_v58 = vpop.permute.xlu1 %2961  ;;  %v3269_v41 = vpack.c.bf16 %v3215_v15, %v3211_v10  ;;  %v3272_v20 = vpack.c.bf16 %v3222_v52, %v3218_v56  ;;  %v3230_v43 = vmul.f32 %v3166_v11, %v5609_v13  ;;  %v3175_v10 = vld [vmem:[%s6153_s2 + $0x170] sm:$0xff]  ;;  %v3180_v27 = vld [vmem:[%s6153_s2 + $0x198] sm:$0xff]  ;;  %v3182_v11 = vld [vmem:[%s6153_s2 + $0x1a8] sm:$0xff] }
0x1075   :  { %v2964_v49 = vpop.permute.xlu0 %2963  ;;  %3356 = vmatprep.subr.bf16.mxu1 %v3270_v1  ;;  %v2994_v34 = vsel %vm149_vm4, %v5761_v4, %v5763_v33  ;;  %v3274_v30 = vpack.c.bf16 %v3224_v57, %v3220_v5  ;;  %v3232_v60 = vmul.f32 %v3168_v46, %v5617_v35  ;;  %v3271_v13 = vpack.c.bf16 %v3221_v17, %v5903_v62  ;;  %v3161_v35 = vld [vmem:[%s6153_s2 + $0x100] sm:$0xff]  ;;  %v3164_v62 = vld [vmem:[%s6153_s2 + $0x118] sm:$0xff] }
0x1076   :  { %v2971_v59 = vsel %vm128_vm3, %v2962_v58, %v2964_v49  ;;  %v3273_v53 = vpack.c.bf16 %v3223_v16, %v5938_v6  ;;  %v2996_v18 = vsel %vm149_vm4, %v5765_v55, %v5759_v50  ;;  %v3010_v31 = vsel %vm166_vm5, %v5737_v14, %v5747_v8  ;;  %v3178_v14 = vld [vmem:[%s6153_s2 + $0x188] sm:$0xff]  ;;  %v3169_v57 = vld [vmem:[%s6153_s2 + $0x140] sm:$0xff] }
0x1077   :  { %v3226_v29 = vmul.f32 %v3162_v63, %v2971_v59  ;;  %3314 = vmatpush1.bf16.msra.mxu0 %v3267_v23  ;;  %v2995_v26 = vsel %vm149_vm4, %v5759_v50, %v5761_v4  ;;  %v3173_v50 = vld [vmem:[%s6153_s2 + $0x160] sm:$0xff]  ;;  %v3238_v4 = vmul.f32 %v3174_v48, %v2994_v34  ;;  %v2993_v61 = vsel %vm149_vm4, %v5763_v33, %v5765_v55 }
0x1078   :  { %3357 = vmatpush1.bf16.msra.mxu1 %v3269_v41  ;;  %v2966_v15 = vpop.permute.xlu1 %2965  ;;  %3315 = vmatprep.subr.bf16.mxu0 %v3272_v20  ;;  %v3240_v38 = vmul.f32 %v3176_v24, %v2996_v18  ;;  %v3012_v6 = vsel %vm166_vm5, %v5751_v12, %v5732_v0  ;;  %v3234_v33 = vmul.f32 %v3170_v22, %v5643_v21  ;;  %v3171_v0 = vld [vmem:[%s6153_s2 + $0x150] sm:$0xff]  ;;  %v3184_v21 = vld [vmem:[%s6153_s2 + $0x1b8] sm:$0xff]  ;;  %v3186_v18 = vld [vmem:[%s6153_s2 + $0x1c8] sm:$0xff] }
0x1079   :  { %v2970_v51 = vsel %vm128_vm3, %v2964_v49, %v2966_v15  ;;  %v2968_v32 = vpop.permute.xlu0 %2967  ;;  %3358 = vmatprep.subr.bf16.mxu1 %v3274_v30  ;;  %v3276_v39 = vpack.c.bf16 %v3230_v43, %v3226_v29  ;;  %v3236_v55 = vmul.f32 %v3172_v2, %v5577_v54  ;;  %v3242_v17 = vmul.f32 %v3178_v14, %v3010_v31  ;;  %v3179_v54 = vld [vmem:[%s6153_s2 + $0x190] sm:$0xff]  ;;  %v3192_v22 = vld [vmem:[%s6153_s2 + $0x1f8] sm:$0xff] }
0x107a   :  { %v3227_v42 = vmul.f32 %v3163_v45, %v2970_v51  ;;  %v2969_v44 = vsel %vm128_vm3, %v2966_v15, %v2968_v32  ;;  %v2972_v52 = vsel %vm128_vm3, %v2968_v32, %v2962_v58  ;;  %v3237_v16 = vmul.f32 %v3173_v50, %v2995_v26  ;;  %v3183_v43 = vld [vmem:[%s6153_s2 + $0x1b0] sm:$0xff]  ;;  %v3188_v26 = vld [vmem:[%s6153_s2 + $0x1d8] sm:$0xff] }
0x107b   :  { %v3225_v19 = vmul.f32 %v3161_v35, %v2972_v52  ;;  %v3228_v25 = vmul.f32 %v3164_v62, %v2969_v44  ;;  %3316 = vmatpush1.bf16.msra.mxu0 %v3271_v13  ;;  %v3009_v46 = vsel %vm166_vm5, %v5747_v8, %v5751_v12  ;;  %v3239_v23 = vmul.f32 %v3175_v10, %v2993_v61  ;;  %v6213_v12 = vld [vmem:[#allocation6_spill] sm:$0xff]  ;;  %v3187_v35 = vld [vmem:[%s6153_s2 + $0x1d0] sm:$0xff]  ;;  %v3190_v62 = vld [vmem:[%s6153_s2 + $0x1e8] sm:$0xff] }
0x107c   :  { %3359 = vmatpush1.bf16.msra.mxu1 %v3273_v53  ;;  %v3038_v1 = vpop.permute.xlu1 %3037  ;;  %3317 = vmatprep.subr.bf16.mxu0 %v3276_v39  ;;  %v3277_v49 = vpack.c.bf16 %v5955_v40, %v3227_v42  ;;  %v3280_v5 = vpack.c.bf16 %v3238_v4, %v3234_v33  ;;  %v3233_v41 = vmul.f32 %v3169_v57, %v5640_v36  ;;  %v6214_v53 = vld [vmem:[#allocation5_spill] sm:$0xff] }
0x107d   :  { %v3275_v58 = vpack.c.bf16 %v5958_v47, %v3225_v19  ;;  %v3040_v63 = vpop.permute.xlu0 %3039  ;;  %v3278_v56 = vpack.c.bf16 %v3232_v60, %v3228_v25  ;;  %v3244_v47 = vmul.f32 %v3180_v27, %v3012_v6  ;;  %v3282_v59 = vpack.c.bf16 %v3240_v38, %v3236_v55  ;;  %v3191_v39 = vld [vmem:[%s6153_s2 + $0x1f0] sm:$0xff]  ;;  %v6215_v27 = vld [vmem:[#allocation11_spill] sm:$0xff] }
0x107e   :  { %v3246_v20 = vmul.f32 %v3182_v11, %v5711_v3  ;;  %v3235_v48 = vmul.f32 %v3171_v0, %v5572_v37  ;;  %v3248_v40 = vmul.f32 %v3184_v21, %v6213_v12  ;;  %v3243_v34 = vmul.f32 %v3179_v54, %v3009_v46  ;;  %v3185_v3 = vld [vmem:[%s6153_s2 + $0x1c0] sm:$0xff] }
0x107f   :  { %3318 = vmatpush1.bf16.msra.mxu0 %v3275_v58  ;;  %3360 = vmatprep.subr.bf16.mxu1 %v3278_v56  ;;  %v3279_v29 = vpack.c.bf16 %v3237_v16, %v3233_v41  ;;  %v3043_v30 = vsel %vm183_vm6, %v5912_v9, %v5921_v28  ;;  %v3189_v37 = vld [vmem:[%s6153_s2 + $0x1e0] sm:$0xff]  ;;  %v3247_v24 = vmul.f32 %v3183_v43, %v6214_v53 }
0x1080   :  { %3361 = vmatpush1.bf16.msra.mxu1 %v3277_v49  ;;  %v3050_v8 = vpop.permute.xlu1 %3049  ;;  %3319 = vmatprep.subr.bf16.mxu0 %v3280_v5  ;;  %v3281_v36 = vpack.c.bf16 %v3239_v23, %v3235_v48  ;;  %v3284_v13 = vpack.c.bf16 %v3246_v20, %v3242_v17  ;;  %v3042_v15 = vsel %vm183_vm6, %v5921_v28, %v3038_v1  ;;  %v6216_v6 = vld [vmem:[#allocation7_spill] sm:$0xff] }
0x1081   :  { %v3052_v45 = vpop.permute.xlu0 %3051  ;;  %3362 = vmatprep.subr.bf16.mxu1 %v3282_v59  ;;  %v3286_v31 = vpack.c.bf16 %v3248_v40, %v3244_v47  ;;  %v3041_v51 = vsel %vm183_vm6, %v3038_v1, %v3040_v63  ;;  %v3044_v28 = vsel %vm183_vm6, %v3040_v63, %v5912_v9  ;;  %v3285_v2 = vpack.c.bf16 %v3247_v24, %v3243_v34  ;;  %v3453_v17 = vld [vmem:[%s6151_s17] sm:$0x3f]  }
0x1082   :  { %v3059_v60 = vsel %vm200_vm7, %v3050_v8, %v3052_v45  ;;  %v3249_v14 = vmul.f32 %v3185_v3, %v3043_v30  ;;  %v3250_v9 = vmul.f32 %v3186_v18, %v3042_v15  ;;  %v3251_v61 = vmul.f32 %v3187_v35, %v3041_v51 }
0x1083   :  { %3320 = vmatpush1.bf16.msra.mxu0 %v3279_v29  ;;  %v3253_v50 = vmul.f32 %v3189_v37, %v3059_v60  ;;  %v3252_v38 = vmul.f32 %v3188_v26, %v3044_v28  ;;  %v6217_v57 = vpack.c.bf16 %v6215_v27, %v6216_v6 }
0x1084   :  { %3363 = vmatpush1.bf16.msra.mxu1 %v3281_v36  ;;  %v3054_v32 = vpop.permute.xlu1 %3053  ;;  %3321 = vmatprep.subr.bf16.mxu0 %v3284_v13 }
0x1085   :  { %v3058_v4 = vsel %vm200_vm7, %v3052_v45, %v3054_v32  ;;  %v3056_v42 = vpop.permute.xlu0 %3055  ;;  %3364 = vmatprep.subr.bf16.mxu1 %v3286_v31  ;;  %v3287_v33 = vpack.c.bf16 %v3253_v50, %v3249_v14 }
0x1086   :  { %v3254_v44 = vmul.f32 %v3190_v62, %v3058_v4  ;;  %v3057_v52 = vsel %vm200_vm7, %v3054_v32, %v3056_v42  ;;  %v3060_v10 = vsel %vm200_vm7, %v3056_v42, %v3050_v8 }
0x1087   :  { %v3255_v19 = vmul.f32 %v3191_v39, %v3057_v52  ;;  %v3256_v25 = vmul.f32 %v3192_v22, %v3060_v10  ;;  %3322 = vmatpush1.bf16.msra.mxu0 %v6217_v57 }
0x1088   :  { %3365 = vmatpush1.bf16.msra.mxu1 %v3285_v2  ;;  %v3288_v1 = vpack.c.bf16 %v3254_v44, %v3250_v9 }
0x1089   :  { %v3289_v55 = vpack.c.bf16 %v3255_v19, %v3251_v61  ;;  %v3290_v11 = vpack.c.bf16 %v3256_v25, %v3252_v38 }
0x108a   :  { %3323 = vmatprep.subr.bf16.mxu0 %v3288_v1 }
0x108b   :  { %3324 = vmatpush1.bf16.msra.mxu0 %v3287_v33  ;;  %3366 = vmatprep.subr.bf16.mxu1 %v3290_v11 }
0x108c   :  { %3367 = vmatpush1.bf16.msra.mxu1 %v3289_v55 }
0x108e   :  { %3342 = vmatmul.mubr.bf16.vlgmr.msra.gmra.mrb[32].mxu0 %v3453_v17 }
0x108f   :  { %3385 = vmatmul.mubr.bf16.vlgmr.msra.gmra.mrb[32].mxu1 %v3453_v17 }
0x1095   :  { %v3296_v7 = vpop.permute.xlu1 %3295 }
0x1096   :  { %v3301_v16 = vpop.permute.xlu0 %3300 }
0x1161   :  { %v3343_v0 = vpop.f32.mrb[32].mxu0 }
0x1162   :  { %v3344_v58 = vadd.f32 %v3343_v0, %v3296_v7  ;;  %v3345_v63 = vpop.f32.mrb[33].mxu0  ;;  %v3386_v56 = vpop.f32.mrb[32].mxu1 }
0x1163   :  { %v3346_v21 = vadd.f32 %v3345_v63, %v3296_v7  ;;  %v3387_v54 = vadd.f32 %v3386_v56, %v3296_v7  ;;  %v3347_v46 = vpop.f32.mrb[34].mxu0  ;;  %v3388_v23 = vpop.f32.mrb[33].mxu1 }
0x1164   :  { %3395 = vst [vmem:[%s6154_s19] sm:$0xff] %v3344_v58  ;;  %v3348_v49 = vadd.f32 %v3347_v46, %v3301_v16  ;;  %v3389_v5 = vadd.f32 %v3388_v23, %v3296_v7  ;;  %v3349_v47 = vpop.f32.mrb[35].mxu0  ;;  %v3390_v41 = vpop.f32.mrb[34].mxu1 }
0x1165   :  { %3396 = vst [vmem:[%s6154_s19 + $0x8] sm:$0xff] %v3346_v21  ;;  %3397 = vst [vmem:[%s6154_s19 + $0x10] sm:$0xff] %v3387_v54  ;;  %v3350_v59 = vadd.f32 %v3349_v47, %v3301_v16  ;;  %v3391_v20 = vadd.f32 %v3390_v41, %v3301_v16  ;;  %v3392_v43 = vpop.f32.mrb[35].mxu1 }
0x1166   :  { %3399 = vst [vmem:[%s6154_s19 + $0x20] sm:$0xf] %v3348_v49  ;;  %3398 = vst [vmem:[%s6154_s19 + $0x18] sm:$0xff] %v3389_v5  ;;  %v3393_v48 = vadd.f32 %v3392_v43, %v3301_v16 }
0x1167   :  { %3400 = vst [vmem:[%s6154_s19 + $0x28] sm:$0xf] %v3350_v59  ;;  %3401 = vst [vmem:[%s6154_s19 + $0x30] sm:$0xf] %v3391_v20 }
0x1168   :  { %3402 = vst [vmem:[%s6154_s19 + $0x38] sm:$0xf] %v3393_v48 }

</bundles_post_ra>
